<compile_context>
chip_gen: v7x
topology: tpu7x:2x2x1
jax: 0.10.0
libtpu: 0.0.40
codegen_flags: <defaults>
</compile_context>

<pallas_src>
import functools

import jax
import jax.numpy as jnp
from jax import lax
from jax.experimental import pallas as pl
from jax.experimental.pallas import tpu as pltpu

EPS = 1e-5                       # PyTorch InstanceNorm2d default
COMPUTE_DTYPE = jnp.bfloat16     # MXU input dtype (accumulation stays f32)

# 40 MiB: above the 16/32 MiB scoped defaults (v5e/v6e) and <= ~62% of v7x's
# 64 MiB physical VMEM, leaving headroom for the double-buffered input/output.
VMEM_LIMIT_BYTES = 40 * 1024 * 1024


# ---------------------------------------------------------------------------
# In-kernel helpers (operate on VMEM-resident values)
# ---------------------------------------------------------------------------
def _reflect_pad_hw(x):
    """(H, W, C) -> (H+2, W+2, C), PyTorch 'reflect' (edge row/col not repeated)."""
    H, W = x.shape[0], x.shape[1]
    xr = jnp.concatenate([x[1:2], x, x[H - 2:H - 1]], axis=0)                 # pad H
    return jnp.concatenate([xr[:, 1:2], xr, xr[:, W - 2:W - 1]], axis=1)      # pad W


def _im2col_3x3(xp, H, W):
    """(H+2, W+2, C) padded tile -> (H*W, 9*C) im2col, tap-major (tap = kh*3+kw)."""
    C = xp.shape[2]
    cols = [xp[kh:kh + H, kw:kw + W, :].reshape(H * W, C)
            for kh in range(3) for kw in range(3)]
    return jnp.concatenate(cols, axis=-1)


def _conv_instancenorm(x_hwc, w_slab, gamma, beta, *, H, W, relu):
    """conv3x3(reflect, no bias) + InstanceNorm (+ReLU) for one sample.

    x_hwc : (H, W, C)   bf16 value (stays bf16 straight into the MXU)
    w_slab: (9*C, Cout) bf16 weight slab, tap-major rows
    gamma, beta: (1, Cout) f32
    returns (H*W, Cout) f32
    """
    HW = H * W
    col = _im2col_3x3(_reflect_pad_hw(x_hwc), H, W)                   # (HW, 9C) bf16
    # Single long-K MXU matmul; accumulation happens inside the MXU in f32.
    y = jnp.dot(col, w_slab, preferred_element_type=jnp.float32)      # (HW, Cout) f32
    inv_hw = 1.0 / float(HW)
    mean = jnp.sum(y, axis=0, keepdims=True) * inv_hw                 # (1, Cout)
    yc = y - mean
    var = jnp.sum(yc * yc, axis=0, keepdims=True) * inv_hw            # biased, centered
    out = yc * (gamma * lax.rsqrt(var + EPS)) + beta
    if relu:
        out = jnp.maximum(out, 0.0)
    return out


def _resblock_kernel(x_ref, w1_ref, g1_ref, be1_ref, w2_ref, g2_ref, be2_ref,
                     o_ref, *, H, W):
    """Fused ConvBlock1 (ReLU) + ConvBlock2 for one batch sample.

    x_ref  : (1, H, W, C)   unpadded NHWC sample, bf16
    w*_ref : (9*C, C)       bf16 weight slabs
    g*,be* : (1, C)         f32 InstanceNorm affine params
    o_ref  : (1, H*W, C)    output (channels on lanes)
    """
    C = x_ref.shape[3]
    x = x_ref[0]                                          # (H, W, C) bf16, no f32 copy
    h1 = _conv_instancenorm(x, w1_ref[...], g1_ref[...], be1_ref[...],
                            H=H, W=W, relu=True)          # (HW, C) f32
    h1 = h1.astype(COMPUTE_DTYPE).reshape(H, W, C)        # intermediate stays in VMEM
    h2 = _conv_instancenorm(h1, w2_ref[...], g2_ref[...], be2_ref[...],
                            H=H, W=W, relu=False)         # (HW, C) f32
    o_ref[0] = h2.astype(o_ref.dtype)


# ---------------------------------------------------------------------------
# Host-side wrapper
# ---------------------------------------------------------------------------
def _weight_slab(w):
    """(Cout, Cin, 3, 3) PyTorch conv weight -> (9*Cin, Cout) bf16, tap = kh*3+kw."""
    Cout, Cin = w.shape[0], w.shape[1]
    return w.transpose(2, 3, 1, 0).reshape(9 * Cin, Cout).astype(COMPUTE_DTYPE)


def res_block(x_nchw, params):
    """ResBlock.forward — matches the PyTorch module (up to bf16 MXU precision)."""
    B, C, H, W = x_nchw.shape
    assert H >= 2 and W >= 2, "reflect padding requires H, W >= 2"
    HW = H * W

    # NCHW -> NHWC + bf16 cast once at the boundary (single fused XLA pass).
    x_nhwc = x_nchw.transpose(0, 2, 3, 1).astype(COMPUTE_DTYPE)

    w1 = _weight_slab(params["w1"])
    w2 = _weight_slab(params["w2"])
    g1 = params["g1"].reshape(1, C).astype(jnp.float32)
    be1 = params["be1"].reshape(1, C).astype(jnp.float32)
    g2 = params["g2"].reshape(1, C).astype(jnp.float32)
    be2 = params["be2"].reshape(1, C).astype(jnp.float32)
    # NOTE: conv biases b1/b2 are intentionally NOT passed to the kernel —
    # InstanceNorm's mean subtraction cancels a per-channel constant exactly.

    out_dtype = x_nchw.dtype
    bf = jnp.dtype(COMPUTE_DTYPE).itemsize
    cost = pl.CostEstimate(
        flops=2 * 2 * B * HW * 9 * C * C,                  # two conv blocks
        transcendentals=0,
        bytes_accessed=(B * HW * C * bf                    # input activations
                        + 2 * 9 * C * C * bf               # weight slabs
                        + 4 * C * 4                        # gamma / beta
                        + B * HW * C * jnp.dtype(out_dtype).itemsize),
    )

    const2 = lambda b: (0, 0)
    out = pl.pallas_call(
        functools.partial(_resblock_kernel, H=H, W=W),
        out_shape=jax.ShapeDtypeStruct((B, HW, C), out_dtype),
        grid_spec=pltpu.PrefetchScalarGridSpec(
            num_scalar_prefetch=0,
            grid=(B,),
            in_specs=[
                # one unpadded sample per grid step
                pl.BlockSpec((1, H, W, C), lambda b: (b, 0, 0, 0)),
                # grid-invariant operands: constant index_map => fetched once.
                pl.BlockSpec((9 * C, C), const2),
                pl.BlockSpec((1, C), const2),
                pl.BlockSpec((1, C), const2),
                pl.BlockSpec((9 * C, C), const2),
                pl.BlockSpec((1, C), const2),
                pl.BlockSpec((1, C), const2),
            ],
            out_specs=pl.BlockSpec((1, HW, C), lambda b: (b, 0, 0)),
        ),
        compiler_params=pltpu.CompilerParams(
            dimension_semantics=("parallel",),       # batch across TCs
            vmem_limit_bytes=VMEM_LIMIT_BYTES,
        ),
        cost_estimate=cost,
    )(x_nhwc, w1, g1, be1, w2, g2, be2)

    # (B, HW, C) -> NCHW; reshape/transpose at the boundary is XLA-side only.
    return out.reshape(B, H, W, C).transpose(0, 3, 1, 2)


# ---------------------------------------------------------------------------
# Pure-JAX f32 reference (keeps the conv bias) for numerical validation
# ---------------------------------------------------------------------------
def _conv_block_ref(x_nhwc, w, b, g, be, relu):
    xp = jnp.pad(x_nhwc, ((0, 0), (1, 1), (1, 1), (0, 0)), mode="reflect")
    y = lax.conv_general_dilated(
        xp, w.transpose(2, 3, 1, 0), window_strides=(1, 1), padding="VALID",
        dimension_numbers=("NHWC", "HWIO", "NHWC")) + b
    mean = jnp.mean(y, axis=(1, 2), keepdims=True)
    var = jnp.var(y, axis=(1, 2), keepdims=True)          # biased (ddof=0)
    out = (y - mean) * lax.rsqrt(var + EPS) * g + be
    return jnp.maximum(out, 0.0) if relu else out


def res_block_ref(x_nchw, params):
    x = x_nchw.transpose(0, 2, 3, 1)
    y = _conv_block_ref(x, params["w1"], params["b1"], params["g1"],
                        params["be1"], True)
    y = _conv_block_ref(y, params["w2"], params["b2"], params["g2"],
                        params["be2"], False)
    return y.transpose(0, 3, 1, 2)


def init_params(key, channels):
    k1, k2, k3, k4 = jax.random.split(key, 4)
    scale = 0.1
    return {
        # conv1
        "w1": scale * jax.random.normal(k1, (channels, channels, 3, 3), jnp.float32),
        "b1": scale * jax.random.normal(k2, (channels,), jnp.float32),
        "g1": jnp.ones((channels,), jnp.float32),    # InstanceNorm affine init
        "be1": jnp.zeros((channels,), jnp.float32),
        # conv2
        "w2": scale * jax.random.normal(k3, (channels, channels, 3, 3), jnp.float32),
        "b2": scale * jax.random.normal(k4, (channels,), jnp.float32),
        "g2": jnp.ones((channels,), jnp.float32),
        "be2": jnp.zeros((channels,), jnp.float32),
    }


if __name__ == "__main__":
    B, C, H, W = 2, 4, 16, 16
    key = jax.random.PRNGKey(0)
    kx, kp = jax.random.split(key)
    x = jax.random.normal(kx, (B, C, H, W), jnp.float32)
    params = init_params(kp, C)

    out = jax.block_until_ready(jax.jit(res_block)(x, params))
    assert out.shape == (B, C, H, W), out.shape
    assert bool(jnp.all(jnp.isfinite(out)))

    # Validate against the f32 reference (which includes the conv bias).
    # bf16 MXU inputs + bf16 on-chip intermediate => loose absolute tolerance
    # on instance-normalized (O(1)-scale) outputs.
    ref = res_block_ref(x, params)
    err = float(jnp.max(jnp.abs(out - ref)))
    assert err < 0.2, f"max abs error vs f32 reference: {err}"
    print("KERNEL_OK")
</pallas_src>

<mosaic_0001>
module attributes {stable_mosaic.version = 11 : i64} {
  func.func @_resblock_kernel(%arg0: i32, %arg1: memref<1x16x16x4xbf16, #tpu.memory_space<vmem>>, %arg2: memref<36x4xbf16, #tpu.memory_space<vmem>>, %arg3: memref<1x4xf32, #tpu.memory_space<vmem>>, %arg4: memref<1x4xf32, #tpu.memory_space<vmem>>, %arg5: memref<36x4xbf16, #tpu.memory_space<vmem>>, %arg6: memref<1x4xf32, #tpu.memory_space<vmem>>, %arg7: memref<1x4xf32, #tpu.memory_space<vmem>>, %arg8: memref<1x256x4xf32, #tpu.memory_space<vmem>>) attributes {dimension_semantics = [#tpu.dimension_semantics<parallel>], iteration_bounds = array<i64: 2>, scalar_prefetch = 0 : i64, scratch_operands = 0 : i64, tpu.core_type = #tpu.core_type<tc>, window_params = [{transform_indices = @transform_0, window_bounds = array<i64: 1, 16, 16, 4>}, {pipeline_mode = #tpu.pipeline_mode<synchronous>, transform_indices = @transform_1, window_bounds = array<i64: 36, 4>}, {pipeline_mode = #tpu.pipeline_mode<synchronous>, transform_indices = @transform_2, window_bounds = array<i64: 1, 4>}, {pipeline_mode = #tpu.pipeline_mode<synchronous>, transform_indices = @transform_3, window_bounds = array<i64: 1, 4>}, {pipeline_mode = #tpu.pipeline_mode<synchronous>, transform_indices = @transform_4, window_bounds = array<i64: 36, 4>}, {pipeline_mode = #tpu.pipeline_mode<synchronous>, transform_indices = @transform_5, window_bounds = array<i64: 1, 4>}, {pipeline_mode = #tpu.pipeline_mode<synchronous>, transform_indices = @transform_6, window_bounds = array<i64: 1, 4>}, {transform_indices = @transform_7, window_bounds = array<i64: 1, 256, 4>}]} {
    %c0 = arith.constant 0 : index
    %c0_0 = arith.constant 0 : index
    %c0_1 = arith.constant 0 : index
    %c0_2 = arith.constant 0 : index
    %0 = vector.load %arg1[%c0, %c0_0, %c0_1, %c0_2] : memref<1x16x16x4xbf16, #tpu.memory_space<vmem>>, vector<1x16x16x4xbf16>
    %1 = vector.shape_cast %0 : vector<1x16x16x4xbf16> to vector<16x16x4xbf16>
    %c0_3 = arith.constant 0 : index
    %c0_4 = arith.constant 0 : index
    %2 = vector.load %arg2[%c0_3, %c0_4] : memref<36x4xbf16, #tpu.memory_space<vmem>>, vector<36x4xbf16>
    %c0_5 = arith.constant 0 : index
    %c0_6 = arith.constant 0 : index
    %3 = vector.load %arg3[%c0_5, %c0_6] : memref<1x4xf32, #tpu.memory_space<vmem>>, vector<1x4xf32>
    %c0_7 = arith.constant 0 : index
    %c0_8 = arith.constant 0 : index
    %4 = vector.load %arg4[%c0_7, %c0_8] : memref<1x4xf32, #tpu.memory_space<vmem>>, vector<1x4xf32>
    %5 = vector.extract_strided_slice %1 {offsets = [1, 0, 0], sizes = [1, 16, 4], strides = [1, 1, 1]} : vector<16x16x4xbf16> to vector<1x16x4xbf16>
    %6 = vector.extract_strided_slice %1 {offsets = [14, 0, 0], sizes = [1, 16, 4], strides = [1, 1, 1]} : vector<16x16x4xbf16> to vector<1x16x4xbf16>
    %7 = tpu.concatenate %5, %1, %6 in 0 : vector<1x16x4xbf16>, vector<16x16x4xbf16>, vector<1x16x4xbf16> -> vector<18x16x4xbf16>
    %8 = vector.extract_strided_slice %7 {offsets = [0, 1, 0], sizes = [18, 1, 4], strides = [1, 1, 1]} : vector<18x16x4xbf16> to vector<18x1x4xbf16>
    %9 = vector.extract_strided_slice %7 {offsets = [0, 14, 0], sizes = [18, 1, 4], strides = [1, 1, 1]} : vector<18x16x4xbf16> to vector<18x1x4xbf16>
    %10 = tpu.concatenate %8, %7, %9 in 1 : vector<18x1x4xbf16>, vector<18x16x4xbf16>, vector<18x1x4xbf16> -> vector<18x18x4xbf16>
    %11 = vector.extract_strided_slice %10 {offsets = [0, 0, 0], sizes = [16, 16, 4], strides = [1, 1, 1]} : vector<18x18x4xbf16> to vector<16x16x4xbf16>
    %12 = vector.shape_cast %11 : vector<16x16x4xbf16> to vector<256x4xbf16>
    %13 = vector.extract_strided_slice %10 {offsets = [0, 1, 0], sizes = [16, 16, 4], strides = [1, 1, 1]} : vector<18x18x4xbf16> to vector<16x16x4xbf16>
    %14 = vector.shape_cast %13 : vector<16x16x4xbf16> to vector<256x4xbf16>
    %15 = vector.extract_strided_slice %10 {offsets = [0, 2, 0], sizes = [16, 16, 4], strides = [1, 1, 1]} : vector<18x18x4xbf16> to vector<16x16x4xbf16>
    %16 = vector.shape_cast %15 : vector<16x16x4xbf16> to vector<256x4xbf16>
    %17 = vector.extract_strided_slice %10 {offsets = [1, 0, 0], sizes = [16, 16, 4], strides = [1, 1, 1]} : vector<18x18x4xbf16> to vector<16x16x4xbf16>
    %18 = vector.shape_cast %17 : vector<16x16x4xbf16> to vector<256x4xbf16>
    %19 = vector.extract_strided_slice %10 {offsets = [1, 1, 0], sizes = [16, 16, 4], strides = [1, 1, 1]} : vector<18x18x4xbf16> to vector<16x16x4xbf16>
    %20 = vector.shape_cast %19 : vector<16x16x4xbf16> to vector<256x4xbf16>
    %21 = vector.extract_strided_slice %10 {offsets = [1, 2, 0], sizes = [16, 16, 4], strides = [1, 1, 1]} : vector<18x18x4xbf16> to vector<16x16x4xbf16>
    %22 = vector.shape_cast %21 : vector<16x16x4xbf16> to vector<256x4xbf16>
    %23 = vector.extract_strided_slice %10 {offsets = [2, 0, 0], sizes = [16, 16, 4], strides = [1, 1, 1]} : vector<18x18x4xbf16> to vector<16x16x4xbf16>
    %24 = vector.shape_cast %23 : vector<16x16x4xbf16> to vector<256x4xbf16>
    %25 = vector.extract_strided_slice %10 {offsets = [2, 1, 0], sizes = [16, 16, 4], strides = [1, 1, 1]} : vector<18x18x4xbf16> to vector<16x16x4xbf16>
    %26 = vector.shape_cast %25 : vector<16x16x4xbf16> to vector<256x4xbf16>
    %27 = vector.extract_strided_slice %10 {offsets = [2, 2, 0], sizes = [16, 16, 4], strides = [1, 1, 1]} : vector<18x18x4xbf16> to vector<16x16x4xbf16>
    %28 = vector.shape_cast %27 : vector<16x16x4xbf16> to vector<256x4xbf16>
    %29 = tpu.concatenate %12, %14, %16, %18, %20, %22, %24, %26, %28 in 1 : vector<256x4xbf16>, vector<256x4xbf16>, vector<256x4xbf16>, vector<256x4xbf16>, vector<256x4xbf16>, vector<256x4xbf16>, vector<256x4xbf16>, vector<256x4xbf16>, vector<256x4xbf16> -> vector<256x36xbf16>
    %cst = arith.constant dense<0.000000e+00> : vector<256x4xf32>
    %30 = tpu.matmul %29, %2, %cst {dimension_numbers = #tpu.dot_dimension_numbers<[1], [0], [0], [1], [0, 0, 1, 1], [], []>} : vector<256x36xbf16>, vector<36x4xbf16>, vector<256x4xf32> -> vector<256x4xf32>
    %cst_9 = arith.constant dense<0.000000e+00> : vector<4xf32>
    %31 = vector.multi_reduction <add>, %30, %cst_9 [0] : vector<256x4xf32> to vector<4xf32>
    %32 = vector.shape_cast %31 : vector<4xf32> to vector<1x4xf32>
    %cst_10 = arith.constant 3.906250e-03 : f32
    %33 = vector.broadcast %cst_10 : f32 to vector<1x4xf32>
    %34 = arith.mulf %32, %33 : vector<1x4xf32>
    %35 = vector.broadcast %34 : vector<1x4xf32> to vector<256x4xf32>
    %36 = arith.subf %30, %35 : vector<256x4xf32>
    %37 = arith.mulf %36, %36 : vector<256x4xf32>
    %cst_11 = arith.constant dense<0.000000e+00> : vector<4xf32>
    %38 = vector.multi_reduction <add>, %37, %cst_11 [0] : vector<256x4xf32> to vector<4xf32>
    %39 = vector.shape_cast %38 : vector<4xf32> to vector<1x4xf32>
    %cst_12 = arith.constant 3.906250e-03 : f32
    %40 = vector.broadcast %cst_12 : f32 to vector<1x4xf32>
    %41 = arith.mulf %39, %40 : vector<1x4xf32>
    %cst_13 = arith.constant 9.99999974E-6 : f32
    %42 = vector.broadcast %cst_13 : f32 to vector<1x4xf32>
    %43 = arith.addf %41, %42 : vector<1x4xf32>
    %44 = math.rsqrt %43 : vector<1x4xf32>
    %45 = arith.mulf %3, %44 : vector<1x4xf32>
    %46 = vector.broadcast %45 : vector<1x4xf32> to vector<256x4xf32>
    %47 = arith.mulf %36, %46 : vector<256x4xf32>
    %48 = vector.broadcast %4 : vector<1x4xf32> to vector<256x4xf32>
    %49 = arith.addf %47, %48 : vector<256x4xf32>
    %cst_14 = arith.constant 0.000000e+00 : f32
    %50 = vector.broadcast %cst_14 : f32 to vector<256x4xf32>
    %51 = arith.maximumf %49, %50 : vector<256x4xf32>
    %52 = arith.truncf %51 : vector<256x4xf32> to vector<256x4xbf16>
    %53 = vector.shape_cast %52 : vector<256x4xbf16> to vector<16x16x4xbf16>
    %c0_15 = arith.constant 0 : index
    %c0_16 = arith.constant 0 : index
    %54 = vector.load %arg5[%c0_15, %c0_16] : memref<36x4xbf16, #tpu.memory_space<vmem>>, vector<36x4xbf16>
    %c0_17 = arith.constant 0 : index
    %c0_18 = arith.constant 0 : index
    %55 = vector.load %arg6[%c0_17, %c0_18] : memref<1x4xf32, #tpu.memory_space<vmem>>, vector<1x4xf32>
    %c0_19 = arith.constant 0 : index
    %c0_20 = arith.constant 0 : index
    %56 = vector.load %arg7[%c0_19, %c0_20] : memref<1x4xf32, #tpu.memory_space<vmem>>, vector<1x4xf32>
    %57 = vector.extract_strided_slice %53 {offsets = [1, 0, 0], sizes = [1, 16, 4], strides = [1, 1, 1]} : vector<16x16x4xbf16> to vector<1x16x4xbf16>
    %58 = vector.extract_strided_slice %53 {offsets = [14, 0, 0], sizes = [1, 16, 4], strides = [1, 1, 1]} : vector<16x16x4xbf16> to vector<1x16x4xbf16>
    %59 = tpu.concatenate %57, %53, %58 in 0 : vector<1x16x4xbf16>, vector<16x16x4xbf16>, vector<1x16x4xbf16> -> vector<18x16x4xbf16>
    %60 = vector.extract_strided_slice %59 {offsets = [0, 1, 0], sizes = [18, 1, 4], strides = [1, 1, 1]} : vector<18x16x4xbf16> to vector<18x1x4xbf16>
    %61 = vector.extract_strided_slice %59 {offsets = [0, 14, 0], sizes = [18, 1, 4], strides = [1, 1, 1]} : vector<18x16x4xbf16> to vector<18x1x4xbf16>
    %62 = tpu.concatenate %60, %59, %61 in 1 : vector<18x1x4xbf16>, vector<18x16x4xbf16>, vector<18x1x4xbf16> -> vector<18x18x4xbf16>
    %63 = vector.extract_strided_slice %62 {offsets = [0, 0, 0], sizes = [16, 16, 4], strides = [1, 1, 1]} : vector<18x18x4xbf16> to vector<16x16x4xbf16>
    %64 = vector.shape_cast %63 : vector<16x16x4xbf16> to vector<256x4xbf16>
    %65 = vector.extract_strided_slice %62 {offsets = [0, 1, 0], sizes = [16, 16, 4], strides = [1, 1, 1]} : vector<18x18x4xbf16> to vector<16x16x4xbf16>
    %66 = vector.shape_cast %65 : vector<16x16x4xbf16> to vector<256x4xbf16>
    %67 = vector.extract_strided_slice %62 {offsets = [0, 2, 0], sizes = [16, 16, 4], strides = [1, 1, 1]} : vector<18x18x4xbf16> to vector<16x16x4xbf16>
    %68 = vector.shape_cast %67 : vector<16x16x4xbf16> to vector<256x4xbf16>
    %69 = vector.extract_strided_slice %62 {offsets = [1, 0, 0], sizes = [16, 16, 4], strides = [1, 1, 1]} : vector<18x18x4xbf16> to vector<16x16x4xbf16>
    %70 = vector.shape_cast %69 : vector<16x16x4xbf16> to vector<256x4xbf16>
    %71 = vector.extract_strided_slice %62 {offsets = [1, 1, 0], sizes = [16, 16, 4], strides = [1, 1, 1]} : vector<18x18x4xbf16> to vector<16x16x4xbf16>
    %72 = vector.shape_cast %71 : vector<16x16x4xbf16> to vector<256x4xbf16>
    %73 = vector.extract_strided_slice %62 {offsets = [1, 2, 0], sizes = [16, 16, 4], strides = [1, 1, 1]} : vector<18x18x4xbf16> to vector<16x16x4xbf16>
    %74 = vector.shape_cast %73 : vector<16x16x4xbf16> to vector<256x4xbf16>
    %75 = vector.extract_strided_slice %62 {offsets = [2, 0, 0], sizes = [16, 16, 4], strides = [1, 1, 1]} : vector<18x18x4xbf16> to vector<16x16x4xbf16>
    %76 = vector.shape_cast %75 : vector<16x16x4xbf16> to vector<256x4xbf16>
    %77 = vector.extract_strided_slice %62 {offsets = [2, 1, 0], sizes = [16, 16, 4], strides = [1, 1, 1]} : vector<18x18x4xbf16> to vector<16x16x4xbf16>
    %78 = vector.shape_cast %77 : vector<16x16x4xbf16> to vector<256x4xbf16>
    %79 = vector.extract_strided_slice %62 {offsets = [2, 2, 0], sizes = [16, 16, 4], strides = [1, 1, 1]} : vector<18x18x4xbf16> to vector<16x16x4xbf16>
    %80 = vector.shape_cast %79 : vector<16x16x4xbf16> to vector<256x4xbf16>
    %81 = tpu.concatenate %64, %66, %68, %70, %72, %74, %76, %78, %80 in 1 : vector<256x4xbf16>, vector<256x4xbf16>, vector<256x4xbf16>, vector<256x4xbf16>, vector<256x4xbf16>, vector<256x4xbf16>, vector<256x4xbf16>, vector<256x4xbf16>, vector<256x4xbf16> -> vector<256x36xbf16>
    %cst_21 = arith.constant dense<0.000000e+00> : vector<256x4xf32>
    %82 = tpu.matmul %81, %54, %cst_21 {dimension_numbers = #tpu.dot_dimension_numbers<[1], [0], [0], [1], [0, 0, 1, 1], [], []>} : vector<256x36xbf16>, vector<36x4xbf16>, vector<256x4xf32> -> vector<256x4xf32>
    %cst_22 = arith.constant dense<0.000000e+00> : vector<4xf32>
    %83 = vector.multi_reduction <add>, %82, %cst_22 [0] : vector<256x4xf32> to vector<4xf32>
    %84 = vector.shape_cast %83 : vector<4xf32> to vector<1x4xf32>
    %cst_23 = arith.constant 3.906250e-03 : f32
    %85 = vector.broadcast %cst_23 : f32 to vector<1x4xf32>
    %86 = arith.mulf %84, %85 : vector<1x4xf32>
    %87 = vector.broadcast %86 : vector<1x4xf32> to vector<256x4xf32>
    %88 = arith.subf %82, %87 : vector<256x4xf32>
    %89 = arith.mulf %88, %88 : vector<256x4xf32>
    %cst_24 = arith.constant dense<0.000000e+00> : vector<4xf32>
    %90 = vector.multi_reduction <add>, %89, %cst_24 [0] : vector<256x4xf32> to vector<4xf32>
    %91 = vector.shape_cast %90 : vector<4xf32> to vector<1x4xf32>
    %cst_25 = arith.constant 3.906250e-03 : f32
    %92 = vector.broadcast %cst_25 : f32 to vector<1x4xf32>
    %93 = arith.mulf %91, %92 : vector<1x4xf32>
    %cst_26 = arith.constant 9.99999974E-6 : f32
    %94 = vector.broadcast %cst_26 : f32 to vector<1x4xf32>
    %95 = arith.addf %93, %94 : vector<1x4xf32>
    %96 = math.rsqrt %95 : vector<1x4xf32>
    %97 = arith.mulf %55, %96 : vector<1x4xf32>
    %98 = vector.broadcast %97 : vector<1x4xf32> to vector<256x4xf32>
    %99 = arith.mulf %88, %98 : vector<256x4xf32>
    %100 = vector.broadcast %56 : vector<1x4xf32> to vector<256x4xf32>
    %101 = arith.addf %99, %100 : vector<256x4xf32>
    %c0_27 = arith.constant 0 : index
    %c0_28 = arith.constant 0 : index
    %c0_29 = arith.constant 0 : index
    %102 = vector.load %arg8[%c0_27, %c0_28, %c0_29] : memref<1x256x4xf32, #tpu.memory_space<vmem>>, vector<1x256x4xf32>
    %103 = vector.shape_cast %102 : vector<1x256x4xf32> to vector<256x4xf32>
    %104 = vector.shape_cast %101 : vector<256x4xf32> to vector<1x256x4xf32>
    tpu.vector_store %arg8[%c0_27, %c0_28, %c0_29], %104 {strides = array<i32>} : memref<1x256x4xf32, #tpu.memory_space<vmem>>, vector<1x256x4xf32>,
    return
  }
  func.func @transform_0(%arg0: i32) -> (i32, i32, i32, i32) {
    %c0_i32 = arith.constant 0 : i32
    %c0_i32_0 = arith.constant 0 : i32
    %c0_i32_1 = arith.constant 0 : i32
    %c0_i32_2 = arith.constant 0 : i32
    return %arg0, %c0_i32, %c0_i32_0, %c0_i32_1 : i32, i32, i32, i32
  }
  func.func @transform_1(%arg0: i32) -> (i32, i32) {
    %c0_i32 = arith.constant 0 : i32
    %c0_i32_0 = arith.constant 0 : i32
    %c0_i32_1 = arith.constant 0 : i32
    return %c0_i32, %c0_i32_0 : i32, i32
  }
  func.func @transform_2(%arg0: i32) -> (i32, i32) {
    %c0_i32 = arith.constant 0 : i32
    %c0_i32_0 = arith.constant 0 : i32
    %c0_i32_1 = arith.constant 0 : i32
    return %c0_i32, %c0_i32_0 : i32, i32
  }
  func.func @transform_3(%arg0: i32) -> (i32, i32) {
    %c0_i32 = arith.constant 0 : i32
    %c0_i32_0 = arith.constant 0 : i32
    %c0_i32_1 = arith.constant 0 : i32
    return %c0_i32, %c0_i32_0 : i32, i32
  }
  func.func @transform_4(%arg0: i32) -> (i32, i32) {
    %c0_i32 = arith.constant 0 : i32
    %c0_i32_0 = arith.constant 0 : i32
    %c0_i32_1 = arith.constant 0 : i32
    return %c0_i32, %c0_i32_0 : i32, i32
  }
  func.func @transform_5(%arg0: i32) -> (i32, i32) {
    %c0_i32 = arith.constant 0 : i32
    %c0_i32_0 = arith.constant 0 : i32
    %c0_i32_1 = arith.constant 0 : i32
    return %c0_i32, %c0_i32_0 : i32, i32
  }
  func.func @transform_6(%arg0: i32) -> (i32, i32) {
    %c0_i32 = arith.constant 0 : i32
    %c0_i32_0 = arith.constant 0 : i32
    %c0_i32_1 = arith.constant 0 : i32
    return %c0_i32, %c0_i32_0 : i32, i32
  }
  func.func @transform_7(%arg0: i32) -> (i32, i32, i32) {
    %c0_i32 = arith.constant 0 : i32
    %c0_i32_0 = arith.constant 0 : i32
    %c0_i32_1 = arith.constant 0 : i32
    return %arg0, %c0_i32, %c0_i32_0 : i32, i32, i32
  }
}

</mosaic_0001>

<bundles_post_ra>
// kernel: res_block.1
= control target key start
LH: loop header
LB: loop body
LE: loop exit
PB: predicated region body
PF: predicated region fallthrough
CT: control target
= control target key end

     0   :  { %s4001_s24 = smov 0   ;;  %s6425_s0 = inlined_call_operand.vmem [shape: bf16[2,16,16,4], index: 0, kind: input, shape index: {}]   ;;  %s6426_s1 = inlined_call_operand.vmem [shape: bf16[36,4], index: 1, kind: input, shape index: {}]   ;;  %s6427_s2 = inlined_call_operand.vmem [shape: f32[1,4], index: 2, kind: input, shape index: {}]   ;;  %s6428_s3 = inlined_call_operand.vmem [shape: f32[1,4], index: 3, kind: input, shape index: {}]   ;;  %s6429_s4 = inlined_call_operand.vmem [shape: bf16[36,4], index: 4, kind: input, shape index: {}]   ;;  %s6430_s5 = inlined_call_operand.vmem [shape: f32[1,4], index: 5, kind: input, shape index: {}]   ;;  %s6431_s6 = inlined_call_operand.vmem [shape: f32[1,4], index: 6, kind: input, shape index: {}]   ;;  %s6432_s7 = inlined_call_operand.vmem [shape: f32[2,256,4], index: 7, kind: output, shape index: {}]  }
   0x1 LB: > { %s3654_s25 = sadd.s32 4294967295, %s3951_s24   ;;  %p3658_p0 = scmp.ge.s32.totalorder %s3951_s24, 1  ;;  %s3951_s24 = sphi %s4001_s24, %s17_s24  }
   0x2   : > { %p237_p1 = scmp.lt.s32.totalorder %s3951_s24, 3 }
   0x4   : > { %p238_p2 = pnand %p3658_p0, %p237_p1 }
   0x6   : > { %241 = sbr.rel (%p238_p2) target bundleno = 1480 (0x5c8), region = 48 }
   0xd   : > { %p269_p3 = scmp.lt.s32.totalorder %s3654_s25, 1  ;;  %vm719_vm0 = vcmask 1040384   ;;  %vm720_vm1 = vsmask.f32 256  ;;  %vm965_vm3 = vcmask 1046528   ;;  %s3953_s30 = smov 12  }
   0xe   : > { %vm4023_vm2 = vmand %vm719_vm0, %vm720_vm1  ;;  %s3954_s8 = smov 24   ;;  %v3916_v53 = vld [vmem:[%s6426_s1] sm:$0xff]   ;;  %vm754_vm4 = vsmask.f32 7424  ;;  %s3955_s11 = smov 8   ;;  %v3918_v62 = vld [vmem:[%s6426_s1 + $0x8] sm:$0xff]  }
   0xf   : > { %s6536_s25 = smov (!%p269_p3, %s3654_s25), 1  ;;  %3793 = vmatprep.subr.bf16.mxu0 %v3916_v53  ;;  %s3956_s14 = smov 20   ;;  %vm1579_vm5 = vcmask 1041408   ;;  %vm1274_vm6 = vcmask 31744   ;;  %vm1305_vm7 = vcmask 64512   ;;  %vm1336_vm8 = vcmask 97280  }
  0x10   : > { %s3753_s26 = sshll.u32 %s6536_s25, 7  ;;  %3794 = vmatpush3.bf16.msra.mxu0 %v3916_v53  ;;  %s3957_s15 = smov 4   ;;  %vm1369_vm9 = vcmask 130048   ;;  %vm1402_vm10 = vcmask 162816   ;;  %vm1435_vm11 = vcmask 195584   ;;  %vm1467_vm12 = vcmask 228352  }
  0x11   : > { %s4015_s29 = scalar_lea.vmem %s6425_s0, %s3753_s26  ;;  %3795 = vmatprep.subr.bf16.mxu0 %v3918_v62  ;;  %s3958_s16 = smov 16   ;;  %vm1499_vm13 = vcmask 261120   ;;  %vm1546_vm14 = vcmask 293888  }
  0x12   : > { %v282_v0 = vld [vmem:[%s4015_s29 + $0x8] sm:$0xf]  ;;  %v283_v1 = vld [vmem:[%s4015_s29 + $0xc] sm:$0xf]  ;;  %v280_v2 = vld [vmem:[%s4015_s29] sm:$0xf] }
  0x13   : > { %v3663_v3 = vcombine.low %v282_v0, %v282_v0  ;;  %v3679_v4 = vcombine.low %v282_v0, %v283_v1  ;;  %v281_v5 = vld [vmem:[%s4015_s29 + $0x4] sm:$0xf]  ;;  %v3664_v6 = vcombine.low %v280_v2, %v280_v2  ;;  %v284_v7 = vld [vmem:[%s4015_s29 + $0x10] sm:$0xf]  ;;  %v285_v8 = vld [vmem:[%s4015_s29 + $0x14] sm:$0xf]  ;;  %v3695_v9 = vcombine.low %v283_v1, %v283_v1 }
  0x14   : > { %v3680_v10 = vcombine.low %v280_v2, %v281_v5  ;;  %v3665_v11 = vcombine.low %v284_v7, %v284_v7  ;;  %v3681_v12 = vcombine.low %v284_v7, %v285_v8  ;;  %v3696_v13 = vcombine.low %v281_v5, %v281_v5  ;;  %v286_v41 = vld [vmem:[%s4015_s29 + $0x18] sm:$0xf]  ;;  %v287_v46 = vld [vmem:[%s4015_s29 + $0x1c] sm:$0xf]  ;;  %3796 = vmatpush3.bf16.msra.mxu0 %v3918_v62  ;;  %s3959_s17 = smov 28   ;;  %s3960_s18 = smov 32  }
  0x15   : > { %v480_v14 = vshrl.u32 %v3679_v4, 16  ;;  %v483_v15 = vshll.u32 %v3679_v4, 16  ;;  %v368_v16 = vshrl.u32 %v3663_v3, 16  ;;  %v640_v22 = vshll.u32 %v3695_v9, 16  ;;  %s3754_s12 = sshll.u32 %s6536_s25, 8 }
  0x16   : > { %v487_v17 = vshrl.u32 %v3680_v10, 16  ;;  %v490_v18 = vshll.u32 %v3680_v10, 16  ;;  %v494_v19 = vshrl.u32 %v3681_v12, 16  ;;  %v497_v21 = vshll.u32 %v3681_v12, 16 }
  0x17   : > { %v482_v20 = vrot.slane %v480_v14, 7  ;;  %v644_v23 = vshll.u32 %v3696_v13, 16  ;;  %v371_v25 = vshrl.u32 %v3664_v6, 16  ;;  %v374_v27 = vshrl.u32 %v3665_v11, 16  ;;  %v288_v13 = vld [vmem:[%s4015_s29 + $0x20] sm:$0xf] }
  0x18   : > { %v489_v26 = vrot.slane %v487_v17, 7  ;;  %v496_v28 = vrot.slane %v494_v19, 7  ;;  %v642_v30 = vrot.slane %v640_v22, 3  ;;  %v3697_v34 = vcombine.low %v285_v8, %v285_v8  ;;  %v289_v14 = vld [vmem:[%s4015_s29 + $0x24] sm:$0xf] }
  0x19   : > { %v485_v29 = vor.u32 %v483_v15, %v482_v20  ;;  %v646_v31 = vrot.slane %v644_v23, 3  ;;  %v3682_v52 = vcombine.low %v286_v41, %v287_v46  ;;  %v3666_v8 = vcombine.low %v286_v41, %v286_v41 }
  0x1a   : > { %v492_v32 = vor.u32 %v490_v18, %v489_v26  ;;  %v499_v33 = vor.u32 %v497_v21, %v496_v28  ;;  %v738_v36 = vsel %vm4023_vm2, %v482_v20, %v642_v30  ;;  %v648_v50 = vshll.u32 %v3697_v34, 16 }
  0x1b   : > { %v4029_v35 = vsel %vm4023_vm2, %v368_v16, %v485_v29  ;;  %v739_v37 = vsel %vm4023_vm2, %v489_v26, %v646_v31  ;;  %v967_v42 = vrot.slane %v738_v36, 1  ;;  %v763_v48 = vshll.u32 %v738_v36, 16 }
  0x1c   : > { %1090 = vrot.lane.b32.xlu1 %v4029_v35, %s3953_s30  ;;  %v4039_v38 = vsel %vm4023_vm2, %v371_v25, %v492_v32  ;;  %v4043_v39 = vsel %vm4023_vm2, %v374_v27, %v499_v33  ;;  %v966_v40 = vrot.slane %v4029_v35, 1  ;;  %v970_v44 = vrot.slane %v739_v37, 1 }
  0x1d   : > { %1088 = vrot.lane.b32.xlu0 %v4039_v38, %s3953_s30  ;;  %v969_v43 = vrot.slane %v4039_v38, 1  ;;  %v758_v45 = vshll.u32 %v4029_v35, 16  ;;  %v756_v47 = vshrl.u32 %v4029_v35, 16  ;;  %v770_v49 = vshll.u32 %v4039_v38, 16 }
  0x1e   : > { %v4062_v54 = vsel %vm965_vm3, %v966_v40, %v967_v42  ;;  %v768_v56 = vshrl.u32 %v4039_v38, 16  ;;  %v775_v57 = vshll.u32 %v739_v37, 16  ;;  %v765_v59 = vrot.slane %v763_v48, 1  ;;  %v290_v48 = vld [vmem:[%s4015_s29 + $0x28] sm:$0xf] }
  0x1f   : > { %v760_v51 = vrot.slane %v758_v45, 1  ;;  %v971_v55 = vsel %vm965_vm3, %v969_v43, %v970_v44  ;;  %v772_v60 = vrot.slane %v770_v49, 1  ;;  %v650_v61 = vrot.slane %v648_v50, 3  ;;  %v291_v49 = vld [vmem:[%s4015_s29 + $0x2c] sm:$0xf] }
  0x20   : > { %1186 = vrot.lane.b32.xlu1 %v4043_v39, %s3954_s8  ;;  %v782_v63 = vshll.u32 %v4043_v39, 16  ;;  %v501_v0 = vshrl.u32 %v3682_v52, 16  ;;  %v777_v3 = vrot.slane %v775_v57, 1  ;;  %v780_v5 = vshrl.u32 %v4043_v39, 16 }
  0x21   : > { %1184 = vrot.lane.b32.xlu0 %v4029_v35, %s3954_s8  ;;  %v761_v58 = vor.u32 %v760_v51, %v756_v47  ;;  %v773_v2 = vor.u32 %v772_v60, %v768_v56  ;;  %v740_v4 = vsel %vm4023_vm2, %v496_v28, %v650_v61  ;;  %v504_v11 = vshll.u32 %v3682_v52, 16  ;;  %v3919_v56 = vld [vmem:[%s6426_s1 + $0x10] ss:$0 sps:$4 sm:$0x33]  }
  0x22   : > { %v784_v6 = vrot.slane %v782_v63, 1  ;;  %v787_v7 = vshll.u32 %v740_v4, 16  ;;  %v503_v10 = vrot.slane %v501_v0, 7  ;;  %v3698_v12 = vcombine.low %v287_v46, %v287_v46  ;;  %3869 = vmatprep.subr.msk.bf16.mxu0 %vm1579_vm5, %v3919_v56 }
  0x23   : > { %v766_v1 = vsel %vm754_vm4, %v761_v58, %v765_v59  ;;  %v778_v9 = vsel %vm754_vm4, %v773_v2, %v777_v3  ;;  %v377_v17 = vshrl.u32 %v3666_v8, 16  ;;  %v3683_v20 = vcombine.low %v288_v13, %v289_v14 }
  0x24   : > { %1058 = vrot.lane.b32.xlu1 %v4062_v54, %s3955_s11  ;;  %v785_v15 = vor.u32 %v784_v6, %v780_v5  ;;  %v789_v16 = vrot.slane %v787_v7, 1  ;;  %v506_v18 = vor.u32 %v504_v11, %v503_v10  ;;  %v652_v19 = vshll.u32 %v3698_v12, 16  ;;  %v292_v5 = vld [vmem:[%s4015_s29 + $0x30] sm:$0xf]  ;;  %v293_v6 = vld [vmem:[%s4015_s29 + $0x34] sm:$0xf] }
  0x25   : > { %1152 = vrot.lane.b32.xlu0 %v971_v55, %s3956_s14  ;;  %v972_v22 = vrot.slane %v4043_v39, 1  ;;  %v973_v23 = vrot.slane %v740_v4, 1  ;;  %v508_v27 = vshrl.u32 %v3683_v20, 16  ;;  %v3667_v30 = vcombine.low %v288_v13, %v288_v13 }
  0x26   : > { %v790_v21 = vsel %vm754_vm4, %v785_v15, %v789_v16  ;;  %v4091_v25 = vsel %vm4023_vm2, %v377_v17, %v506_v18  ;;  %v654_v26 = vrot.slane %v652_v19, 3  ;;  %v511_v33 = vshll.u32 %v3683_v20, 16 }
  0x27   : > { %v974_v28 = vsel %vm965_vm3, %v972_v22, %v973_v23  ;;  %v794_v29 = vshll.u32 %v4091_v25, 16  ;;  %v510_v32 = vrot.slane %v508_v27, 7  ;;  %v3699_v34 = vcombine.low %v289_v14, %v289_v14 }
  0x28   : > { %1060 = vrot.lane.b32.xlu1 %v971_v55, %s3955_s11  ;;  %v741_v31 = vsel %vm4023_vm2, %v503_v10, %v654_v26  ;;  %v792_v36 = vshrl.u32 %v4091_v25, 16  ;;  %v380_v41 = vshrl.u32 %v3667_v30, 16  ;;  %v975_v51 = vrot.slane %v4091_v25, 1 }
  0x29   : > { %1028 = vrot.lane.b32.xlu0 %v766_v1, %s3957_s15  ;;  %v796_v37 = vrot.slane %v794_v29, 1  ;;  %v799_v40 = vshll.u32 %v741_v31, 16  ;;  %v513_v42 = vor.u32 %v511_v33, %v510_v32  ;;  %v656_v43 = vshll.u32 %v3699_v34, 16 }
  0x2a   : > { %v976_v52 = vrot.slane %v741_v31, 1  ;;  %v3684_v55 = vcombine.low %v290_v48, %v291_v49  ;;  %v1581_v62 = vsel %vm1579_vm5, %v3919_v56, 0  ;;  %v3700_v4 = vcombine.low %v291_v49, %v291_v49 }
  0x2b   : > { %v797_v44 = vor.u32 %v796_v37, %v792_v36  ;;  %v801_v45 = vrot.slane %v799_v40, 1  ;;  %v4107_v46 = vsel %vm4023_vm2, %v380_v41, %v513_v42  ;;  %v658_v47 = vrot.slane %v656_v43, 3  ;;  %3798 = vmatpush3.bf16.msra.mxu0 %v1581_v62  ;;  %v294_v37 = vld [vmem:[%s4015_s29 + $0x38] sm:$0xf]  ;;  %v295_v40 = vld [vmem:[%s4015_s29 + $0x3c] sm:$0xf] }
  0x2c   : > { %1154 = vrot.lane.b32.xlu1 %v4062_v54, %s3956_s14  ;;  %v806_v53 = vshll.u32 %v4107_v46, 16  ;;  %v977_v57 = vsel %vm965_vm3, %v975_v51, %v976_v52  ;;  %v804_v58 = vshrl.u32 %v4107_v46, 16  ;;  %v515_v61 = vshrl.u32 %v3684_v55, 16 }
  0x2d   : > { %1030 = vrot.lane.b32.xlu0 %v778_v9, %s3957_s15  ;;  %v802_v50 = vsel %vm754_vm4, %v797_v44, %v801_v45  ;;  %v518_v3 = vshll.u32 %v3684_v55, 16  ;;  %v660_v10 = vshll.u32 %v3700_v4, 16  ;;  %v3685_v11 = vcombine.low %v292_v5, %v293_v6 }
  0x2e   : > { %v808_v59 = vrot.slane %v806_v53, 1  ;;  %v517_v2 = vrot.slane %v515_v61, 7  ;;  %v978_v12 = vrot.slane %v4107_v46, 1  ;;  %v3669_v19 = vcombine.low %v292_v5, %v292_v5 }
  0x2f   : > { %v662_v15 = vrot.slane %v660_v10, 3  ;;  %v522_v16 = vshrl.u32 %v3685_v11, 16  ;;  %v525_v22 = vshll.u32 %v3685_v11, 16  ;;  %v3701_v23 = vcombine.low %v293_v6, %v293_v6 }
  0x30   : > { %1122 = vrot.lane.b32.xlu1 %v766_v1, %s3958_s16  ;;  %v809_v63 = vor.u32 %v808_v59, %v804_v58  ;;  %v386_v29 = vshrl.u32 %v3669_v19, 16  ;;  %v3670_v55 = vcombine.low %v294_v37, %v294_v37  ;;  %v3702_v58 = vcombine.low %v295_v40, %v295_v40  ;;  %v296_v59 = vld [vmem:[%s4015_s29 + $0x40] sm:$0xf] }
  0x31   : > { %1120 = vrot.lane.b32.xlu0 %v778_v9, %s3958_s16  ;;  %v520_v9 = vor.u32 %v518_v3, %v517_v2  ;;  %v743_v20 = vsel %vm4023_vm2, %v517_v2, %v662_v15  ;;  %v664_v31 = vshll.u32 %v3701_v23, 16 }
  0x32   : > { %v982_v43 = vrot.slane %v743_v20, 1  ;;  %v389_v62 = vshrl.u32 %v3670_v55, 16 }
  0x33   : > { %v666_v36 = vrot.slane %v664_v31, 3 }
  0x34   : > { %1216 = vrot.lane.b32.xlu1 %v790_v21, %s3959_s17 }
  0x35   : > { %1214 = vrot.lane.b32.xlu0 %v766_v1, %s3959_s17  ;;  %v3668_v1 = vcombine.low %v290_v48, %v290_v48 }
  0x37   : > { %v383_v8 = vshrl.u32 %v3668_v1, 16 }
  0x38   : > { %1246 = vrot.lane.b32.xlu1 %v974_v28, %s3960_s18 }
  0x39   : > { %1244 = vrot.lane.b32.xlu0 %v4062_v54, %s3960_s18  ;;  %v742_v54 = vsel %vm4023_vm2, %v510_v32, %v658_v47  ;;  %v4143_v14 = vsel %vm4023_vm2, %v383_v8, %v520_v9  ;;  %v3686_v47 = vcombine.low %v294_v37, %v295_v40  ;;  %v3671_v8 = vcombine.low %v296_v59, %v296_v59 }
  0x3a   : > { %v811_v60 = vshll.u32 %v742_v54, 16  ;;  %v979_v13 = vrot.slane %v742_v54, 1  ;;  %v818_v18 = vshll.u32 %v4143_v14, 16  ;;  %v816_v26 = vshrl.u32 %v4143_v14, 16 }
  0x3b   : > { %v981_v42 = vrot.slane %v4143_v14, 1  ;;  %v529_v52 = vshrl.u32 %v3686_v47, 16 }
  0x3c   : > { %1062 = vrot.lane.b32.xlu1 %v974_v28, %s3955_s11  ;;  %v813_v0 = vrot.slane %v811_v60, 1  ;;  %v980_v17 = vsel %vm965_vm3, %v978_v12, %v979_v13  ;;  %v820_v27 = vrot.slane %v818_v18, 1  ;;  %v297_v60 = vld [vmem:[%s4015_s29 + $0x44] sm:$0xf]  ;;  %v392_v18 = vshrl.u32 %v3671_v8, 16 }
  0x3d   : > { %1032 = vrot.lane.b32.xlu0 %v790_v21, %s3957_s15  ;;  %v983_v48 = vsel %vm965_vm3, %v981_v42, %v982_v43  ;;  %v531_v56 = vrot.slane %v529_v52, 7  ;;  %v3687_v1 = vcombine.low %v296_v59, %v297_v60  ;;  %v3703_v9 = vcombine.low %v297_v60, %v297_v60  ;;  %v301_v52 = vld [vmem:[%s4015_s29 + $0x54] sm:$0xf] }
  0x3e   : > { %v814_v7 = vsel %vm754_vm4, %v809_v63, %v813_v0  ;;  %v821_v32 = vor.u32 %v820_v27, %v816_v26  ;;  %v668_v0 = vshll.u32 %v3702_v58, 16  ;;  %v298_v27 = vld [vmem:[%s4015_s29 + $0x48] sm:$0xf] }
  0x3f   : > { %v536_v6 = vshrl.u32 %v3687_v1, 16  ;;  %v539_v13 = vshll.u32 %v3687_v1, 16 }
  0x40   : > { %1094 = vrot.lane.b32.xlu1 %v4091_v25, %s3953_s30  ;;  %v670_v5 = vrot.slane %v668_v0, 3 }
  0x41   : > { %1092 = vrot.lane.b32.xlu0 %v4043_v39, %s3953_s30  ;;  %v538_v12 = vrot.slane %v536_v6, 7 }
  0x42   : > { %v745_v11 = vsel %vm4023_vm2, %v531_v56, %v670_v5 }
  0x43   : > { %v541_v19 = vor.u32 %v539_v13, %v538_v12  ;;  %v988_v31 = vrot.slane %v745_v11, 1 }
  0x44   : > { %1126 = vrot.lane.b32.xlu1 %v802_v50, %s3958_s16 }
  0x45   : > { %1124 = vrot.lane.b32.xlu0 %v790_v21, %s3958_s16  ;;  %v524_v21 = vrot.slane %v522_v16, 7  ;;  %v4204_v23 = vsel %vm4023_vm2, %v392_v18, %v541_v19 }
  0x46   : > { %v852_v40 = vshrl.u32 %v4204_v23, 16  ;;  %v990_v60 = vrot.slane %v4204_v23, 1 }
  0x47   : > { %v527_v30 = vor.u32 %v525_v22, %v524_v21  ;;  %v744_v45 = vsel %vm4023_vm2, %v524_v21, %v666_v36 }
  0x48   : > { %1158 = vrot.lane.b32.xlu1 %v977_v57, %s3956_s14  ;;  %v835_v51 = vshll.u32 %v744_v45, 16  ;;  %v985_v2 = vrot.slane %v744_v45, 1 }
  0x49   : > { %1156 = vrot.lane.b32.xlu0 %v974_v28, %s3956_s14  ;;  %v823_v28 = vshll.u32 %v743_v20, 16  ;;  %v4158_v34 = vsel %vm4023_vm2, %v386_v29, %v527_v30  ;;  %v672_v20 = vshll.u32 %v3703_v9, 16 }
  0x4a   : > { %v830_v44 = vshll.u32 %v4158_v34, 16  ;;  %v828_v49 = vshrl.u32 %v4158_v34, 16  ;;  %v837_v54 = vrot.slane %v835_v51, 1  ;;  %v984_v3 = vrot.slane %v4158_v34, 1  ;;  %v300_v51 = vld [vmem:[%s4015_s29 + $0x50] sm:$0xf] }
  0x4b   : > { %v825_v33 = vrot.slane %v823_v28, 1  ;;  %v674_v26 = vrot.slane %v672_v20, 3  ;;  %v299_v28 = vld [vmem:[%s4015_s29 + $0x4c] sm:$0xf]  ;;  %v3689_v58 = vcombine.low %v300_v51, %v301_v52  ;;  %v3673_v6 = vcombine.low %v300_v51, %v300_v51 }
  0x4c   : > { %1190 = vrot.lane.b32.xlu1 %v4107_v46, %s3954_s8  ;;  %v986_v10 = vsel %vm965_vm3, %v984_v3, %v985_v2  ;;  %v3688_v36 = vcombine.low %v298_v27, %v299_v28 }
  0x4d   : > { %1188 = vrot.lane.b32.xlu0 %v4091_v25, %s3954_s8  ;;  %v826_v41 = vsel %vm754_vm4, %v821_v32, %v825_v33  ;;  %v854_v32 = vshll.u32 %v4204_v23, 16  ;;  %v746_v33 = vsel %vm4023_vm2, %v538_v12, %v674_v26  ;;  %v550_v1 = vshrl.u32 %v3689_v58, 16 }
  0x4e   : > { %v859_v42 = vshll.u32 %v746_v33, 16  ;;  %v543_v43 = vshrl.u32 %v3688_v36, 16  ;;  %v398_v18 = vshrl.u32 %v3673_v6, 16 }
  0x4f   : > { %v552_v9 = vrot.slane %v550_v1, 7 }
  0x50   : > { %1220 = vrot.lane.b32.xlu1 %v814_v7, %s3959_s17  ;;  %v861_v45 = vrot.slane %v859_v42, 1 }
  0x51   : > { %1218 = vrot.lane.b32.xlu0 %v802_v50, %s3959_s17 }
  0x54   : > { %1034 = vrot.lane.b32.xlu1 %v802_v50, %s3957_s15  ;;  %v832_v50 = vrot.slane %v830_v44, 1 }
  0x55   : > { %1248 = vrot.lane.b32.xlu0 %v977_v57, %s3960_s18 }
  0x56   : > { %v833_v53 = vor.u32 %v832_v50, %v828_v49  ;;  %v546_v49 = vshll.u32 %v3688_v36, 16  ;;  %v3704_v50 = vcombine.low %v299_v28, %v299_v28 }
  0x58   : > { %1036 = vrot.lane.b32.xlu1 %v814_v7, %s3957_s15  ;;  %v838_v61 = vsel %vm754_vm4, %v833_v53, %v837_v54 }
  0x59   : > { %1250 = vrot.lane.b32.xlu0 %v980_v17, %s3960_s18 }
  0x5c   : > { %1066 = vrot.lane.b32.xlu1 %v980_v17, %s3955_s11 }
  0x5d   : > { %1064 = vrot.lane.b32.xlu0 %v977_v57, %s3955_s11  ;;  %v532_v57 = vshll.u32 %v3686_v47, 16  ;;  %v3672_v47 = vcombine.low %v298_v27, %v298_v27 }
  0x5f   : > { %v534_v63 = vor.u32 %v532_v57, %v531_v56  ;;  %v395_v55 = vshrl.u32 %v3672_v47, 16  ;;  %v676_v57 = vshll.u32 %v3704_v50, 16 }
  0x60   : > { %1098 = vrot.lane.b32.xlu1 %v4143_v14, %s3953_s30 }
  0x61   : > { %1096 = vrot.lane.b32.xlu0 %v4107_v46, %s3953_s30  ;;  %v4189_v4 = vsel %vm4023_vm2, %v389_v62, %v534_v63  ;;  %v678_v0 = vrot.slane %v676_v57, 3 }
  0x62   : > { %v840_v15 = vshrl.u32 %v4189_v4, 16  ;;  %v987_v30 = vrot.slane %v4189_v4, 1 }
  0x64   : > { %1130 = vrot.lane.b32.xlu1 %v826_v41, %s3958_s16  ;;  %v989_v37 = vsel %vm965_vm3, %v987_v30, %v988_v31 }
  0x65   : > { %1128 = vrot.lane.b32.xlu0 %v814_v7, %s3958_s16  ;;  %v842_v7 = vshll.u32 %v4189_v4, 16 }
  0x67   : > { %v844_v16 = vrot.slane %v842_v7, 1 }
  0x68   : > { %1162 = vrot.lane.b32.xlu1 %v983_v48, %s3956_s14 }
  0x69   : > { %1160 = vrot.lane.b32.xlu0 %v980_v17, %s3956_s14  ;;  %v847_v17 = vshll.u32 %v745_v11, 16  ;;  %v845_v21 = vor.u32 %v844_v16, %v840_v15  ;;  %v3705_v11 = vcombine.low %v301_v52, %v301_v52 }
  0x6b   : > { %v849_v22 = vrot.slane %v847_v17, 1  ;;  %v680_v20 = vshll.u32 %v3705_v11, 16 }
  0x6c   : > { %1194 = vrot.lane.b32.xlu1 %v4158_v34, %s3954_s8 }
  0x6d   : > { %1192 = vrot.lane.b32.xlu0 %v4143_v14, %s3954_s8  ;;  %v850_v29 = vsel %vm754_vm4, %v845_v21, %v849_v22  ;;  %v682_v30 = vrot.slane %v680_v20, 3 }
  0x70   : > { %1224 = vrot.lane.b32.xlu1 %v838_v61, %s3959_s17 }
  0x71   : > { %1222 = vrot.lane.b32.xlu0 %v826_v41, %s3959_s17 }
  0x74   : > { %1038 = vrot.lane.b32.xlu1 %v826_v41, %s3957_s15  ;;  %v856_v41 = vrot.slane %v854_v32, 1  ;;  %v302_v32 = vld [vmem:[%s4015_s29 + $0x58] sm:$0xf] }
  0x75   : > { %1252 = vrot.lane.b32.xlu0 %v983_v48, %s3960_s18  ;;  %v3674_v6 = vcombine.low %v302_v32, %v302_v32 }
  0x76   : > { %v857_v44 = vor.u32 %v856_v41, %v852_v40 }
  0x78   : > { %1040 = vrot.lane.b32.xlu1 %v838_v61, %s3957_s15  ;;  %v4230_v53 = vsel %vm754_vm4, %v857_v44, %v861_v45  ;;  %v4287_v45 = vsel %vm4023_vm2, %v552_v9, %v682_v30 }
  0x79   : > { %1254 = vrot.lane.b32.xlu0 %v986_v10, %s3960_s18 }
  0x7c   : > { %1070 = vrot.lane.b32.xlu1 %v986_v10, %s3955_s11 }
  0x7d   : > { %1068 = vrot.lane.b32.xlu0 %v983_v48, %s3955_s11  ;;  %v545_v48 = vrot.slane %v543_v43, 7 }
  0x7f   : > { %v548_v56 = vor.u32 %v546_v49, %v545_v48  ;;  %v747_v8 = vsel %vm4023_vm2, %v545_v48, %v678_v0 }
  0x80   : > { %1102 = vrot.lane.b32.xlu1 %v4189_v4, %s3953_s30  ;;  %v871_v16 = vshll.u32 %v747_v8, 16  ;;  %v994_v40 = vrot.slane %v747_v8, 1 }
  0x81   : > { %1100 = vrot.lane.b32.xlu0 %v4158_v34, %s3953_s30  ;;  %v4242_v63 = vsel %vm4023_vm2, %v395_v55, %v548_v56 }
  0x82   : > { %v866_v5 = vshll.u32 %v4242_v63, 16  ;;  %v864_v13 = vshrl.u32 %v4242_v63, 16  ;;  %v873_v27 = vrot.slane %v871_v16, 1 }
  0x84   : > { %1134 = vrot.lane.b32.xlu1 %v850_v29, %s3958_s16  ;;  %v868_v15 = vrot.slane %v866_v5, 1 }
  0x85   : > { %1132 = vrot.lane.b32.xlu0 %v838_v61, %s3958_s16  ;;  %v991_v61 = vrot.slane %v746_v33, 1  ;;  %v303_v33 = vld [vmem:[%s4015_s29 + $0x5c] sm:$0xf] }
  0x86   : > { %v869_v26 = vor.u32 %v868_v15, %v864_v13  ;;  %v3690_v47 = vcombine.low %v302_v32, %v303_v33  ;;  %v304_v13 = vld [vmem:[%s4015_s29 + $0x60] sm:$0xf]  ;;  %v305_v15 = vld [vmem:[%s4015_s29 + $0x64] sm:$0xf] }
  0x87   : > { %v4249_v3 = vsel %vm965_vm3, %v990_v60, %v991_v61 }
  0x88   : > { %1166 = vrot.lane.b32.xlu1 %v989_v37, %s3956_s14  ;;  %v874_v42 = vsel %vm754_vm4, %v869_v26, %v873_v27  ;;  %v557_v60 = vshrl.u32 %v3690_v47, 16 }
  0x89   : > { %1164 = vrot.lane.b32.xlu0 %v986_v10, %s3956_s14  ;;  %v553_v10 = vshll.u32 %v3689_v58, 16  ;;  %v883_v58 = vshll.u32 %v4287_v45, 16 }
  0x8a   : > { %v559_v8 = vrot.slane %v557_v60, 7 }
  0x8b   : > { %v555_v19 = vor.u32 %v553_v10, %v552_v9  ;;  %v885_v5 = vrot.slane %v883_v58, 1  ;;  %v560_v9 = vshll.u32 %v3690_v47, 16  ;;  %v3706_v10 = vcombine.low %v303_v33, %v303_v33 }
  0x8c   : > { %1198 = vrot.lane.b32.xlu1 %v4204_v23, %s3954_s8 }
  0x8d   : > { %1196 = vrot.lane.b32.xlu0 %v4189_v4, %s3954_s8  ;;  %v684_v20 = vshll.u32 %v3706_v10, 16 }
  0x8e   : > { %v4232_v54 = vpop.permute.xlu1 %1090 }
  0x8f   : > { %v1089_v59 = vpop.permute.xlu0 %1088 }
  0x90   : > { %1228 = vrot.lane.b32.xlu1 %v4230_v53, %s3959_s17 }
  0x91   : > { %1226 = vrot.lane.b32.xlu0 %v850_v29, %s3959_s17 }
  0x92   : > { %v4238_v62 = vpop.permute.xlu1 %1186 }
  0x93   : > { %v4244_v2 = vpop.permute.xlu0 %1184 }
  0x94   : > { %1042 = vrot.lane.b32.xlu1 %v850_v29, %s3957_s15  ;;  %v4266_v29 = vsel %vm4023_vm2, %v398_v18, %v555_v19  ;;  %v401_v18 = vshrl.u32 %v3674_v6, 16  ;;  %v562_v19 = vor.u32 %v560_v9, %v559_v8 }
  0x95   : > { %1256 = vrot.lane.b32.xlu0 %v989_v37, %s3960_s18  ;;  %v878_v43 = vshll.u32 %v4266_v29, 16  ;;  %v876_v56 = vshrl.u32 %v4266_v29, 16  ;;  %v996_v26 = vrot.slane %v4266_v29, 1 }
  0x96   : > { %v1059_v7 = vpop.permute.xlu1 %1058  ;;  %v4335_v30 = vsel %vm4023_vm2, %v401_v18, %v562_v19 }
  0x97   : > { %v1153_v12 = vpop.permute.xlu0 %1152  ;;  %v880_v57 = vrot.slane %v878_v43, 1 }
  0x98   : > { %1044 = vrot.lane.b32.xlu1 %v4230_v53, %s3957_s15 }
  0x99   : > { %1258 = vrot.lane.b32.xlu0 %v4249_v3, %s3960_s18 }
  0x9a   : > { %v1061_v17 = vpop.permute.xlu1 %1060 }
  0x9b   : > { %v1029_v21 = vpop.permute.xlu0 %1028 }
  0x9c   : > { %1074 = vrot.lane.b32.xlu1 %v4249_v3, %s3955_s11  ;;  %v1276_v22 = vsel %vm1274_vm6, %v4029_v35, %v1029_v21  ;;  %v3691_v21 = vcombine.low %v304_v13, %v305_v15 }
  0x9d   : > { %1072 = vrot.lane.b32.xlu0 %v989_v37, %s3955_s11  ;;  %v4271_v36 = vsel %vm1305_vm7, %v1276_v22, %v1059_v7  ;;  %v993_v37 = vrot.slane %v4242_v63, 1 }
  0x9e   : > { %v1155_v28 = vpop.permute.xlu1 %1154  ;;  %v1338_v49 = vsel %vm1336_vm8, %v4271_v36, %v1089_v59  ;;  %v564_v32 = vshrl.u32 %v3691_v21, 16 }
  0x9f   : > { %v1031_v31 = vpop.permute.xlu0 %1030 }
  0xa0   : > { %v1278_v35 = vsel %vm1274_vm6, %v4039_v38, %v1031_v31  ;;  %1106 = vrot.lane.b32.xlu1 %v4242_v63, %s3953_s30  ;;  %v686_v31 = vrot.slane %v684_v20, 3 }
  0xa1   : > { %v1309_v41 = vsel %vm1305_vm7, %v1278_v35, %v1061_v17  ;;  %1104 = vrot.lane.b32.xlu0 %v4204_v23, %s3953_s30  ;;  %v890_v35 = vshll.u32 %v4335_v30, 16 }
  0xa2   : > { %v1123_v44 = vpop.permute.xlu1 %1122  ;;  %v1340_v38 = vsel %vm1336_vm8, %v1309_v41, %v4232_v54  ;;  %v4296_v54 = vsel %vm965_vm3, %v993_v37, %v994_v40  ;;  %v3675_v37 = vcombine.low %v304_v13, %v304_v13  ;;  %v567_v40 = vshll.u32 %v3691_v21, 16 }
  0xa3   : > { %v1373_v48 = vsel %vm1369_vm9, %v1340_v38, %v1123_v44  ;;  %v1121_v50 = vpop.permute.xlu0 %1120  ;;  %v749_v44 = vsel %vm4023_vm2, %v559_v8, %v686_v31  ;;  %v566_v38 = vrot.slane %v564_v32, 7 }
  0xa4   : > { %v1406_v51 = vsel %vm1402_vm10, %v1373_v48, %v1155_v28  ;;  %v1371_v52 = vsel %vm1369_vm9, %v1338_v49, %v1121_v50  ;;  %1138 = vrot.lane.b32.xlu1 %v874_v42, %s3958_s16  ;;  %v997_v28 = vrot.slane %v4287_v45, 1  ;;  %v3707_v45 = vcombine.low %v305_v15, %v305_v15 }
  0xa5   : > { %v1404_v55 = vsel %vm1402_vm10, %v1371_v52, %v1153_v12  ;;  %1136 = vrot.lane.b32.xlu0 %v4230_v53, %s3958_s16  ;;  %v1439_v61 = vsel %vm1435_vm11, %v1406_v51, %v4238_v62  ;;  %v881_v53 = vor.u32 %v880_v57, %v876_v56  ;;  %v892_v48 = vrot.slane %v890_v35, 1 }
  0xa6   : > { %v1217_v59 = vpop.permute.xlu1 %1216  ;;  %v1437_v1 = vsel %vm1435_vm11, %v1404_v55, %v4244_v2  ;;  %v998_v43 = vsel %vm965_vm3, %v996_v26, %v997_v28  ;;  %v895_v49 = vshll.u32 %v749_v44, 16  ;;  %v404_v51 = vshrl.u32 %v3675_v37, 16 }
  0xa7   : > { %v1215_v0 = vpop.permute.xlu0 %1214  ;;  %v1471_v7 = vsel %vm1467_vm12, %v1439_v61, %v1217_v59  ;;  %v4323_v16 = vsel %vm754_vm4, %v881_v53, %v885_v5  ;;  %v569_v52 = vor.u32 %v567_v40, %v566_v38  ;;  %v688_v55 = vshll.u32 %v3707_v45, 16  ;;  %v307_v53 = vld [vmem:[%s4015_s29 + $0x6c] sm:$0xf] }
  0xa8   : > { %1170 = vrot.lane.b32.xlu1 %v4296_v54, %s3956_s14  ;;  %v1469_v2 = vsel %vm1467_vm12, %v1437_v1, %v1215_v0  ;;  %v897_v58 = vrot.slane %v895_v49, 1  ;;  %v306_v1 = vld [vmem:[%s4015_s29 + $0x68] sm:$0xf]  ;;  %v999_v5 = vrot.slane %v4335_v30, 1  ;;  %v1000_v6 = vrot.slane %v749_v44, 1 }
  0xa9   : > { %1168 = vrot.lane.b32.xlu0 %v4249_v3, %s3956_s14  ;;  %v4353_v60 = vsel %vm4023_vm2, %v404_v51, %v569_v52  ;;  %v690_v61 = vrot.slane %v688_v55, 3  ;;  %v3692_v9 = vcombine.low %v306_v1, %v307_v53  ;;  %v3676_v40 = vcombine.low %v306_v1, %v306_v1 }
  0xaa   : > { %v1247_v62 = vpop.permute.xlu1 %1246  ;;  %v4373_v13 = vsel %vm965_vm3, %v999_v5, %v1000_v6 }
  0xab   : > { %v1503_v11 = vsel %vm1499_vm13, %v1471_v7, %v1247_v62  ;;  %v1245_v12 = vpop.permute.xlu0 %1244  ;;  %v902_v7 = vshll.u32 %v4353_v60, 16  ;;  %v750_v8 = vsel %vm4023_vm2, %v566_v38, %v690_v61  ;;  %v571_v21 = vshrl.u32 %v3692_v9, 16 }
  0xac   : > { %1202 = vrot.lane.b32.xlu1 %v4266_v29, %s3954_s8  ;;  %v1501_v3 = vsel %vm1499_vm13, %v1469_v2, %v1245_v12  ;;  %v574_v44 = vshll.u32 %v3692_v9, 16  ;;  %v407_v51 = vshrl.u32 %v3676_v40, 16 }
  0xad   : > { %1200 = vrot.lane.b32.xlu0 %v4242_v63, %s3954_s8  ;;  %3799 = vmatprep.mubr.msk.bf16.mxu0 %vm1546_vm14, %v1501_v3  ;;  %v900_v3 = vshrl.u32 %v4353_v60, 16  ;;  %v904_v18 = vrot.slane %v902_v7, 1 }
  0xae   : > { %3800 = vmatmul.mubr.msk.bf16.vlgmr.msra.gmra.mrb[0].mxu0 %vm1546_vm14, %v1503_v11  ;;  %v4326_v17 = vpop.permute.xlu1 %1062 }
  0xaf   : > { %v1033_v22 = vpop.permute.xlu0 %1032  ;;  %v905_v32 = vor.u32 %v904_v18, %v900_v3 }
  0xb0   : > { %1232 = vrot.lane.b32.xlu1 %v4323_v16, %s3959_s17  ;;  %v1280_v10 = vsel %vm1274_vm6, %v4043_v39, %v1033_v22  ;;  %v907_v39 = vshll.u32 %v750_v8, 16 }
  0xb1   : > { %1230 = vrot.lane.b32.xlu0 %v874_v42, %s3959_s17 }
  0xb2   : > { %v1095_v27 = vpop.permute.xlu1 %1094 }
  0xb3   : > { %v1093_v33 = vpop.permute.xlu0 %1092 }
  0xb4   : > { %1046 = vrot.lane.b32.xlu1 %v874_v42, %s3957_s15  ;;  %v888_v42 = vshrl.u32 %v4335_v30, 16  ;;  %v1342_v2 = vsel %vm1336_vm8, %v4271_v36, %v1093_v33  ;;  %v1311_v36 = vsel %vm1305_vm7, %v1280_v10, %v4326_v17  ;;  %v3708_v33 = vcombine.low %v307_v53, %v307_v53 }
  0xb5   : > { %1260 = vrot.lane.b32.xlu0 %v4296_v54, %s3960_s18  ;;  %v1344_v22 = vsel %vm1336_vm8, %v1311_v36, %v1095_v27  ;;  %v909_v27 = vrot.slane %v907_v39, 1 }
  0xb6   : > { %v1127_v41 = vpop.permute.xlu1 %1126  ;;  %v893_v57 = vor.u32 %v892_v48, %v888_v42  ;;  %v309_v42 = vld [vmem:[%s4015_s29 + $0x74] sm:$0xf]  ;;  %v692_v49 = vshll.u32 %v3708_v33, 16 }
  0xb7   : > { %v1125_v47 = vpop.permute.xlu0 %1124  ;;  %v1377_v31 = vsel %vm1369_vm9, %v1344_v22, %v1127_v41  ;;  %v573_v41 = vrot.slane %v571_v21, 7 }
  0xb8   : > { %1048 = vrot.lane.b32.xlu1 %v4323_v16, %s3957_s15  ;;  %v1375_v12 = vsel %vm1369_vm9, %v1342_v2, %v1125_v47  ;;  %v308_v47 = vld [vmem:[%s4015_s29 + $0x70] sm:$0xf]  ;;  %v3709_v2 = vcombine.low %v309_v42, %v309_v42 }
  0xb9   : > { %1262 = vrot.lane.b32.xlu0 %v998_v43, %s3960_s18  ;;  %v576_v52 = vor.u32 %v574_v44, %v573_v41  ;;  %v3693_v55 = vcombine.low %v308_v47, %v309_v42 }
  0xba   : > { %v1159_v50 = vpop.permute.xlu1 %1158  ;;  %v696_v36 = vshll.u32 %v3709_v2, 16 }
  0xbb   : > { %v1157_v56 = vpop.permute.xlu0 %1156  ;;  %v1410_v17 = vsel %vm1402_vm10, %v1377_v31, %v1159_v50  ;;  %v578_v1 = vshrl.u32 %v3693_v55, 16  ;;  %v581_v10 = vshll.u32 %v3693_v55, 16 }
  0xbc   : > { %1078 = vrot.lane.b32.xlu1 %v998_v43, %s3955_s11  ;;  %v1408_v15 = vsel %vm1402_vm10, %v1375_v12, %v1157_v56  ;;  %v698_v31 = vrot.slane %v696_v36, 3 }
  0xbd   : > { %1076 = vrot.lane.b32.xlu0 %v4296_v54, %s3955_s11  ;;  %v898_v54 = vsel %vm754_vm4, %v893_v57, %v897_v58  ;;  %v1002_v57 = vrot.slane %v4353_v60, 1  ;;  %v1003_v58 = vrot.slane %v750_v8, 1  ;;  %v3677_v8 = vcombine.low %v308_v47, %v308_v47 }
  0xbe   : > { %v1191_v59 = vpop.permute.xlu1 %1190  ;;  %v580_v9 = vrot.slane %v578_v1, 7 }
  0xbf   : > { %v1189_v0 = vpop.permute.xlu0 %1188  ;;  %v1443_v35 = vsel %vm1435_vm11, %v1410_v17, %v1191_v59  ;;  %v694_v59 = vrot.slane %v692_v49, 3  ;;  %v4422_v5 = vsel %vm965_vm3, %v1002_v57, %v1003_v58  ;;  %v410_v18 = vshrl.u32 %v3677_v8, 16  ;;  %v310_v17 = vld [vmem:[%s4015_s29 + $0x78] sm:$0xf] }
  0xc0   : > { %1110 = vrot.lane.b32.xlu1 %v4335_v30, %s3953_s30  ;;  %v1441_v19 = vsel %vm1435_vm11, %v1408_v15, %v1189_v0  ;;  %v4416_v0 = vsel %vm4023_vm2, %v407_v51, %v576_v52  ;;  %v583_v39 = vor.u32 %v581_v10, %v580_v9  ;;  %v3678_v8 = vcombine.low %v310_v17, %v310_v17 }
  0xc1   : > { %1108 = vrot.lane.b32.xlu0 %v4266_v29, %s3953_s30  ;;  %v751_v6 = vsel %vm4023_vm2, %v573_v41, %v694_v59  ;;  %v914_v7 = vshll.u32 %v4416_v0, 16 }
  0xc2   : > { %v1221_v62 = vpop.permute.xlu1 %1220  ;;  %v919_v15 = vshll.u32 %v751_v6, 16  ;;  %v1006_v33 = vrot.slane %v751_v6, 1 }
  0xc3   : > { %v1219_v11 = vpop.permute.xlu0 %1218  ;;  %v1475_v38 = vsel %vm1467_vm12, %v1443_v35, %v1221_v62  ;;  %v916_v12 = vrot.slane %v914_v7, 1 }
  0xc4   : > { %1142 = vrot.lane.b32.xlu1 %v898_v54, %s3958_s16  ;;  %v1473_v26 = vsel %vm1467_vm12, %v1441_v19, %v1219_v11  ;;  %v921_v22 = vrot.slane %v919_v15, 1 }
  0xc5   : > { %1140 = vrot.lane.b32.xlu0 %v4323_v16, %s3958_s16 }
  0xc6   : > { %v4382_v20 = vpop.permute.xlu1 %1034 }
  0xc7   : > { %v1249_v28 = vpop.permute.xlu0 %1248 }
  0xc8   : > { %v1505_v16 = vsel %vm1499_vm13, %v1473_v26, %v1249_v28  ;;  %1174 = vrot.lane.b32.xlu1 %v4373_v13, %s3956_s14  ;;  %v4438_v28 = vsel %vm4023_vm2, %v410_v18, %v583_v39 }
  0xc9   : > { %1172 = vrot.lane.b32.xlu0 %v998_v43, %s3956_s14  ;;  %3803 = vmatprep.mubr.msk.bf16.mxu0 %vm1546_vm14, %v1505_v16  ;;  %v4406_v43 = vsel %vm754_vm4, %v905_v32, %v909_v27  ;;  %v311_v32 = vld [vmem:[%s4015_s29 + $0x7c] sm:$0xf]  ;;  %v1005_v27 = vrot.slane %v4416_v0, 1  ;;  %v926_v40 = vshll.u32 %v4438_v28, 16  ;;  %v924_v51 = vshrl.u32 %v4438_v28, 16 }
  0xca   : > { %v4394_v37 = vpop.permute.xlu1 %1036 }
  0xcb   : > { %v1251_v45 = vpop.permute.xlu0 %1250  ;;  %v1284_v47 = vsel %vm1274_vm6, %v4107_v46, %v4394_v37  ;;  %v928_v52 = vrot.slane %v926_v40, 1 }
  0xcc   : > { %v1507_v48 = vsel %vm1499_vm13, %v1475_v38, %v1251_v45  ;;  %1206 = vrot.lane.b32.xlu1 %v4353_v60, %s3954_s8  ;;  %v752_v38 = vsel %vm4023_vm2, %v580_v9, %v698_v31  ;;  %v3694_v45 = vcombine.low %v310_v17, %v311_v32 }
  0xcd   : > { %1204 = vrot.lane.b32.xlu0 %v4335_v30, %s3954_s8  ;;  %3804 = vmatmul.mubr.msk.bf16.gmra.mrb[4].mxu0 %vm1546_vm14, %v1507_v48  ;;  %v1007_v48 = vsel %vm965_vm3, %v1005_v27, %v1006_v33  ;;  %v931_v55 = vshll.u32 %v752_v38, 16 }
  0xce   : > { %v4408_v50 = vpop.permute.xlu1 %1066  ;;  %v585_v57 = vshrl.u32 %v3694_v45, 16  ;;  %v588_v2 = vshll.u32 %v3694_v45, 16 }
  0xcf   : > { %v1065_v56 = vpop.permute.xlu0 %1064  ;;  %v1315_v46 = vsel %vm1305_vm7, %v1284_v47, %v4408_v50  ;;  %v929_v50 = vor.u32 %v928_v52, %v924_v51  ;;  %v933_v7 = vrot.slane %v931_v55, 1 }
  0xd0   : > { %1236 = vrot.lane.b32.xlu1 %v4406_v43, %s3959_s17  ;;  %v587_v10 = vrot.slane %v585_v57, 7 }
  0xd1   : > { %1234 = vrot.lane.b32.xlu0 %v898_v54, %s3959_s17 }
  0xd2   : > { %v1099_v61 = vpop.permute.xlu1 %1098  ;;  %v590_v18 = vor.u32 %v588_v2, %v587_v10 }
  0xd3   : > { %v1097_v53 = vpop.permute.xlu0 %1096  ;;  %v1348_v58 = vsel %vm1336_vm8, %v1315_v46, %v1099_v61 }
  0xd4   : > { %1050 = vrot.lane.b32.xlu1 %v898_v54, %s3957_s15  ;;  %v912_v54 = vshrl.u32 %v4416_v0, 16 }
  0xd5   : > { %1264 = vrot.lane.b32.xlu0 %v4373_v13, %s3960_s18 }
  0xd6   : > { %v1131_v62 = vpop.permute.xlu1 %1130  ;;  %v917_v21 = vor.u32 %v916_v12, %v912_v54 }
  0xd7   : > { %v1129_v11 = vpop.permute.xlu0 %1128 }
  0xd8   : > { %1052 = vrot.lane.b32.xlu1 %v4406_v43, %s3957_s15  ;;  %v922_v35 = vsel %vm754_vm4, %v917_v21, %v921_v22  ;;  %v1008_v21 = vrot.slane %v4438_v28, 1  ;;  %v1009_v22 = vrot.slane %v752_v38, 1 }
  0xd9   : > { %1266 = vrot.lane.b32.xlu0 %v4422_v5, %s3960_s18 }
  0xda   : > { %v1163_v3 = vpop.permute.xlu1 %1162  ;;  %v1010_v27 = vsel %vm965_vm3, %v1008_v21, %v1009_v22 }
  0xdb   : > { %v1161_v19 = vpop.permute.xlu0 %1160 }
  0xdc   : > { %1082 = vrot.lane.b32.xlu1 %v4422_v5, %s3955_s11 }
  0xdd   : > { %1080 = vrot.lane.b32.xlu0 %v4373_v13, %s3955_s11  ;;  %v1282_v13 = vsel %vm1274_vm6, %v4091_v25, %v4382_v20 }
  0xde   : > { %v1195_v26 = vpop.permute.xlu1 %1194  ;;  %v1313_v41 = vsel %vm1305_vm7, %v1282_v13, %v1065_v56 }
  0xdf   : > { %v1193_v16 = vpop.permute.xlu0 %1192  ;;  %v1346_v25 = vsel %vm1336_vm8, %v1313_v41, %v1097_v53  ;;  %v1381_v53 = vsel %vm1369_vm9, %v1348_v58, %v1131_v62  ;;  %v3710_v62 = vcombine.low %v311_v32, %v311_v32 }
  0xe0   : > { %1114 = vrot.lane.b32.xlu1 %v4416_v0, %s3953_s30  ;;  %v1379_v42 = vsel %vm1369_vm9, %v1346_v25, %v1129_v11  ;;  %v1414_v6 = vsel %vm1402_vm10, %v1381_v53, %v1163_v3  ;;  %v413_v3 = vshrl.u32 %v3678_v8, 16 }
  0xe1   : > { %1112 = vrot.lane.b32.xlu0 %v4353_v60, %s3953_s30  ;;  %v1412_v49 = vsel %vm1402_vm10, %v1379_v42, %v1161_v19  ;;  %v1447_v61 = vsel %vm1435_vm11, %v1414_v6, %v1195_v26  ;;  %v700_v39 = vshll.u32 %v3710_v62, 16 }
  0xe2   : > { %v1225_v44 = vpop.permute.xlu1 %1224  ;;  %v1445_v37 = vsel %vm1435_vm11, %v1412_v49, %v1193_v16  ;;  %v737_v26 = vsel %vm4023_vm2, %v413_v3, %v590_v18 }
  0xe3   : > { %v1223_v20 = vpop.permute.xlu0 %1222  ;;  %v1479_v11 = vsel %vm1467_vm12, %v1447_v61, %v1225_v44  ;;  %v702_v31 = vrot.slane %v700_v39, 3  ;;  %v1014_v17 = vshll.u32 %v737_v26, 16  ;;  %v1012_v40 = vshrl.u32 %v737_v26, 16 }
  0xe4   : > { %1146 = vrot.lane.b32.xlu1 %v922_v35, %s3958_s16  ;;  %v1477_v59 = vsel %vm1467_vm12, %v1445_v37, %v1223_v20  ;;  %v1025_v51 = vrot.slane %v737_v26, 1 }
  0xe5   : > { %1144 = vrot.lane.b32.xlu0 %v4406_v43, %s3958_s16  ;;  %v753_v33 = vsel %vm4023_vm2, %v587_v10, %v702_v31  ;;  %v1016_v41 = vrot.slane %v1014_v17, 1 }
  0xe6   : > { %v1039_v56 = vpop.permute.xlu1 %1038  ;;  %v1019_v44 = vshll.u32 %v753_v33, 16  ;;  %v1026_v52 = vrot.slane %v753_v33, 1 }
  0xe7   : > { %v1253_v1 = vpop.permute.xlu0 %1252  ;;  %v1286_v42 = vsel %vm1274_vm6, %v4143_v14, %v1039_v56 }
  0xe8   : > { %v1509_v43 = vsel %vm1499_vm13, %v1477_v59, %v1253_v1  ;;  %1178 = vrot.lane.b32.xlu1 %v1007_v48, %s3956_s14  ;;  %v1021_v47 = vrot.slane %v1019_v44, 1  ;;  %v1027_v56 = vsel %vm965_vm3, %v1025_v51, %v1026_v52 }
  0xe9   : > { %1176 = vrot.lane.b32.xlu0 %v4422_v5, %s3956_s14  ;;  %3807 = vmatprep.mubr.msk.bf16.mxu0 %vm1546_vm14, %v1509_v43  ;;  %v934_v5 = vsel %vm754_vm4, %v929_v50, %v933_v7 }
  0xea   : > { %v1041_v9 = vpop.permute.xlu1 %1040 }
  0xeb   : > { %v1255_v54 = vpop.permute.xlu0 %1254 }
  0xec   : > { %v1511_v12 = vsel %vm1499_vm13, %v1479_v11, %v1255_v54  ;;  %1210 = vrot.lane.b32.xlu1 %v4438_v28, %s3954_s8 }
  0xed   : > { %1208 = vrot.lane.b32.xlu0 %v4416_v0, %s3954_s8  ;;  %3808 = vmatmul.mubr.msk.bf16.gmra.mrb[8].mxu0 %vm1546_vm14, %v1511_v12 }
  0xee   : > { %v1071_v15 = vpop.permute.xlu1 %1070 }
  0xef   : > { %v1069_v36 = vpop.permute.xlu0 %1068 }
  0xf0   : > { %1240 = vrot.lane.b32.xlu1 %v934_v5, %s3959_s17  ;;  %v1317_v55 = vsel %vm1305_vm7, %v1286_v42, %v1069_v36 }
  0xf1   : > { %1238 = vrot.lane.b32.xlu0 %v922_v35, %s3959_s17 }
  0xf2   : > { %v1103_v19 = vpop.permute.xlu1 %1102 }
  0xf3   : > { %v1101_v16 = vpop.permute.xlu0 %1100 }
  0xf4   : > { %1054 = vrot.lane.b32.xlu1 %v922_v35, %s3957_s15  ;;  %v1017_v35 = vor.u32 %v1016_v41, %v1012_v40  ;;  %v1350_v37 = vsel %vm1336_vm8, %v1317_v55, %v1101_v16 }
  0xf5   : > { %1268 = vrot.lane.b32.xlu0 %v1007_v48, %s3960_s18 }
  0xf6   : > { %v1135_v32 = vpop.permute.xlu1 %1134  ;;  %v1022_v49 = vsel %vm754_vm4, %v1017_v35, %v1021_v47 }
  0xf7   : > { %v1133_v13 = vpop.permute.xlu0 %1132 }
  0xf8   : > { %1056 = vrot.lane.b32.xlu1 %v934_v5, %s3957_s15  ;;  %v1383_v58 = vsel %vm1369_vm9, %v1350_v37, %v1133_v13 }
  0xf9   : > { %1270 = vrot.lane.b32.xlu0 %v1010_v27, %s3960_s18 }
  0xfa   : > { %v1167_v38 = vpop.permute.xlu1 %1166 }
  0xfb   : > { %v1165_v45 = vpop.permute.xlu0 %1164 }
  0xfc   : > { %1086 = vrot.lane.b32.xlu1 %v1010_v27, %s3955_s11  ;;  %v1416_v14 = vsel %vm1402_vm10, %v1383_v58, %v1165_v45 }
  0xfd   : > { %1084 = vrot.lane.b32.xlu0 %v1007_v48, %s3955_s11  ;;  %v1288_v48 = vsel %vm1274_vm6, %v4158_v34, %v1041_v9 }
  0xfe   : > { %v1199_v25 = vpop.permute.xlu1 %1198  ;;  %v1319_v59 = vsel %vm1305_vm7, %v1288_v48, %v1071_v15 }
  0xff   : > { %v1197_v20 = vpop.permute.xlu0 %1196  ;;  %v1352_v34 = vsel %vm1336_vm8, %v1319_v59, %v1103_v19 }
 0x100   : > { %1118 = vrot.lane.b32.xlu1 %v737_v26, %s3953_s30  ;;  %v1449_v1 = vsel %vm1435_vm11, %v1416_v14, %v1197_v20  ;;  %v1385_v50 = vsel %vm1369_vm9, %v1352_v34, %v1135_v32 }
 0x101   : > { %1116 = vrot.lane.b32.xlu0 %v4438_v28, %s3953_s30  ;;  %v1418_v8 = vsel %vm1402_vm10, %v1385_v50, %v1167_v38 }
 0x102   : > { %v1229_v46 = vpop.permute.xlu1 %1228  ;;  %v1451_v61 = vsel %vm1435_vm11, %v1418_v8, %v1199_v25 }
 0x103   : > { %v1227_v57 = vpop.permute.xlu0 %1226  ;;  %v1483_v10 = vsel %vm1467_vm12, %v1451_v61, %v1229_v46 }
 0x104   : > { %1150 = vrot.lane.b32.xlu1 %v1022_v49, %s3958_s16  ;;  %v1481_v43 = vsel %vm1467_vm12, %v1449_v1, %v1227_v57 }
 0x105   : > { %1148 = vrot.lane.b32.xlu0 %v934_v5, %s3958_s16 }
 0x106   : > { %v1043_v53 = vpop.permute.xlu1 %1042 }
 0x107   : > { %v1257_v6 = vpop.permute.xlu0 %1256  ;;  %v1290_v21 = vsel %vm1274_vm6, %v4189_v4, %v1043_v53 }
 0x108   : > { %v1513_v7 = vsel %vm1499_vm13, %v1481_v43, %v1257_v6  ;;  %1182 = vrot.lane.b32.xlu1 %v1027_v56, %s3956_s14 }
 0x109   : > { %1180 = vrot.lane.b32.xlu0 %v1010_v27, %s3956_s14  ;;  %3811 = vmatprep.mubr.msk.bf16.mxu0 %vm1546_vm14, %v1513_v7 }
 0x10a   : > { %v1045_v9 = vpop.permute.xlu1 %1044 }
 0x10b   : > { %v1259_v2 = vpop.permute.xlu0 %1258  ;;  %v1292_v31 = vsel %vm1274_vm6, %v4204_v23, %v1045_v9 }
 0x10c   : > { %v1515_v62 = vsel %vm1499_vm13, %v1483_v10, %v1259_v2  ;;  %1242 = vrot.lane.b32.xlu1 %v1022_v49, %s3959_s17 }
 0x10d   : > { %1212 = vrot.lane.b32.xlu0 %v737_v26, %s3954_s8  ;;  %3812 = vmatmul.mubr.msk.bf16.gmra.mrb[12].mxu0 %vm1546_vm14, %v1515_v62 }
 0x10e   : > { %v1075_v11 = vpop.permute.xlu1 %1074 }
 0x10f   : > { %v1073_v54 = vpop.permute.xlu0 %1072  ;;  %v1323_v33 = vsel %vm1305_vm7, %v1292_v31, %v1075_v11 }
 0x110   : > { %v1321_v22 = vsel %vm1305_vm7, %v1290_v21, %v1073_v54 }
 0x111   : > { %1272 = vrot.lane.b32.xlu0 %v1027_v56, %s3960_s18 }
 0x112   : > { %v1107_v12 = vpop.permute.xlu1 %1106 }
 0x113   : > { %v1105_v5 = vpop.permute.xlu0 %1104  ;;  %v1356_v4 = vsel %vm1336_vm8, %v1323_v33, %v1107_v12 }
 0x114   : > { %v1354_v16 = vsel %vm1336_vm8, %v1321_v22, %v1105_v5 }
 0x116   : > { %v1139_v15 = vpop.permute.xlu1 %1138 }
 0x117   : > { %v1137_v3 = vpop.permute.xlu0 %1136  ;;  %v1389_v38 = vsel %vm1369_vm9, %v1356_v4, %v1139_v15 }
 0x118   : > { %v1387_v32 = vsel %vm1369_vm9, %v1354_v16, %v1137_v3 }
 0x11a   : > { %v1171_v18 = vpop.permute.xlu1 %1170 }
 0x11b   : > { %v1169_v39 = vpop.permute.xlu0 %1168  ;;  %v1422_v45 = vsel %vm1402_vm10, %v1389_v38, %v1171_v18 }
 0x11c   : > { %v1420_v27 = vsel %vm1402_vm10, %v1387_v32, %v1169_v39 }
 0x11e   : > { %v1203_v36 = vpop.permute.xlu1 %1202 }
 0x11f   : > { %v1201_v19 = vpop.permute.xlu0 %1200  ;;  %v1455_v35 = vsel %vm1435_vm11, %v1422_v45, %v1203_v36 }
 0x120   : > { %v1453_v13 = vsel %vm1435_vm11, %v1420_v27, %v1201_v19 }
 0x122   : > { %v1233_v26 = vpop.permute.xlu1 %1232 }
 0x123   : > { %v1231_v17 = vpop.permute.xlu0 %1230  ;;  %v1487_v25 = vsel %vm1467_vm12, %v1455_v35, %v1233_v26 }
 0x124   : > { %v1485_v41 = vsel %vm1467_vm12, %v1453_v13, %v1231_v17 }
 0x126   : > { %v1047_v40 = vpop.permute.xlu1 %1046 }
 0x127   : > { %v1261_v44 = vpop.permute.xlu0 %1260  ;;  %v1294_v56 = vsel %vm1274_vm6, %v4242_v63, %v1047_v40 }
 0x128   : > { %v1517_v23 = vsel %vm1499_vm13, %v1485_v41, %v1261_v44 }
 0x129   : > { %3815 = vmatprep.mubr.msk.bf16.mxu0 %vm1546_vm14, %v1517_v23 }
 0x12a   : > { %v1049_v47 = vpop.permute.xlu1 %1048 }
 0x12b   : > { %v1263_v20 = vpop.permute.xlu0 %1262  ;;  %v1296_v53 = vsel %vm1274_vm6, %v4266_v29, %v1049_v47 }
 0x12c   : > { %v1519_v42 = vsel %vm1499_vm13, %v1487_v25, %v1263_v20 }
 0x12d   : > { %3816 = vmatmul.mubr.msk.bf16.gmra.mrb[16].mxu0 %vm1546_vm14, %v1519_v42 }
 0x12e   : > { %v1079_v49 = vpop.permute.xlu1 %1078 }
 0x12f   : > { %v1077_v51 = vpop.permute.xlu0 %1076  ;;  %v1327_v7 = vsel %vm1305_vm7, %v1296_v53, %v1079_v49 }
 0x130   : > { %v1325_v59 = vsel %vm1305_vm7, %v1294_v56, %v1077_v51 }
 0x132   : > { %v1111_v52 = vpop.permute.xlu1 %1110 }
 0x133   : > { %v1109_v55 = vpop.permute.xlu0 %1108  ;;  %v1360_v63 = vsel %vm1336_vm8, %v1327_v7, %v1111_v52 }
 0x134   : > { %v1358_v34 = vsel %vm1336_vm8, %v1325_v59, %v1109_v55 }
 0x136   : > { %v1143_v46 = vpop.permute.xlu1 %1142 }
 0x137   : > { %v1141_v48 = vpop.permute.xlu0 %1140  ;;  %v1393_v2 = vsel %vm1369_vm9, %v1360_v63, %v1143_v46 }
 0x138   : > { %v1391_v6 = vsel %vm1369_vm9, %v1358_v34, %v1141_v48 }
 0x13a   : > { %v1175_v37 = vpop.permute.xlu1 %1174 }
 0x13b   : > { %v1173_v57 = vpop.permute.xlu0 %1172  ;;  %v1426_v62 = vsel %vm1402_vm10, %v1393_v2, %v1175_v37 }
 0x13c   : > { %v1424_v50 = vsel %vm1402_vm10, %v1391_v6, %v1173_v57 }
 0x13e   : > { %v1207_v58 = vpop.permute.xlu1 %1206 }
 0x13f   : > { %v1205_v14 = vpop.permute.xlu0 %1204  ;;  %v1459_v11 = vsel %vm1435_vm11, %v1426_v62, %v1207_v58 }
 0x140   : > { %v1457_v8 = vsel %vm1435_vm11, %v1424_v50, %v1205_v14 }
 0x142   : > { %v1237_v1 = vpop.permute.xlu1 %1236 }
 0x143   : > { %v1235_v43 = vpop.permute.xlu0 %1234  ;;  %v1491_v12 = vsel %vm1467_vm12, %v1459_v11, %v1237_v1 }
 0x144   : > { %v1489_v9 = vsel %vm1467_vm12, %v1457_v8, %v1235_v43 }
 0x146   : > { %v1051_v61 = vpop.permute.xlu1 %1050 }
 0x147   : > { %v1265_v10 = vpop.permute.xlu0 %1264  ;;  %v1298_v17 = vsel %vm1274_vm6, %v4335_v30, %v1051_v61 }
 0x148   : > { %v1521_v29 = vsel %vm1499_vm13, %v1489_v9, %v1265_v10 }
 0x149   : > { %3819 = vmatprep.mubr.msk.bf16.mxu0 %vm1546_vm14, %v1521_v29 }
 0x14a   : > { %v1053_v54 = vpop.permute.xlu1 %1052 }
 0x14b   : > { %v1267_v5 = vpop.permute.xlu0 %1266  ;;  %v1300_v33 = vsel %vm1274_vm6, %v4353_v60, %v1053_v54 }
 0x14c   : > { %v1523_v15 = vsel %vm1499_vm13, %v1491_v12, %v1267_v5 }
 0x14d   : > { %3820 = vmatmul.mubr.msk.bf16.gmra.mrb[20].mxu0 %vm1546_vm14, %v1523_v15 }
 0x14e   : > { %v1083_v3 = vpop.permute.xlu1 %1082 }
 0x14f   : > { %v1081_v18 = vpop.permute.xlu0 %1080  ;;  %v1331_v44 = vsel %vm1305_vm7, %v1300_v33, %v1083_v3 }
 0x150   : > { %v1329_v32 = vsel %vm1305_vm7, %v1298_v17, %v1081_v18 }
 0x152   : > { %v1115_v39 = vpop.permute.xlu1 %1114 }
 0x153   : > { %v1113_v36 = vpop.permute.xlu0 %1112  ;;  %v1364_v30 = vsel %vm1336_vm8, %v1331_v44, %v1115_v39 }
 0x154   : > { %v1362_v13 = vsel %vm1336_vm8, %v1329_v32, %v1113_v36 }
 0x156   : > { %v1147_v19 = vpop.permute.xlu1 %1146 }
 0x157   : > { %v1145_v21 = vpop.permute.xlu0 %1144  ;;  %v1397_v47 = vsel %vm1369_vm9, %v1364_v30, %v1147_v19 }
 0x158   : > { %v1395_v4 = vsel %vm1369_vm9, %v1362_v13, %v1145_v21 }
 0x15a   : > { %v1179_v22 = vpop.permute.xlu1 %1178 }
 0x15b   : > { %v1177_v26 = vpop.permute.xlu0 %1176  ;;  %v1430_v25 = vsel %vm1402_vm10, %v1397_v47, %v1179_v22 }
 0x15c   : > { %v1428_v41 = vsel %vm1402_vm10, %v1395_v4, %v1177_v26 }
 0x15e   : > { %v1211_v31 = vpop.permute.xlu1 %1210 }
 0x15f   : > { %v1209_v16 = vpop.permute.xlu0 %1208  ;;  %v1463_v20 = vsel %vm1435_vm11, %v1430_v25, %v1211_v31 }
 0x160   : > { %v1461_v38 = vsel %vm1435_vm11, %v1428_v41, %v1209_v16 }
 0x162   : > { %v1241_v27 = vpop.permute.xlu1 %1240 }
 0x163   : > { %v1239_v40 = vpop.permute.xlu0 %1238  ;;  %v1495_v49 = vsel %vm1467_vm12, %v1463_v20, %v1241_v27 }
 0x164   : > { %v1493_v45 = vsel %vm1467_vm12, %v1461_v38, %v1239_v40 }
 0x166   : > { %v1055_v23 = vpop.permute.xlu1 %1054 }
 0x167   : > { %v1269_v35 = vpop.permute.xlu0 %1268  ;;  %v1302_v53 = vsel %vm1274_vm6, %v4416_v0, %v1055_v23 }
 0x168   : > { %v1525_v60 = vsel %vm1499_vm13, %v1493_v45, %v1269_v35 }
 0x169   : > { %3823 = vmatprep.mubr.msk.bf16.mxu0 %vm1546_vm14, %v1525_v60 }
 0x16a   : > { %v1057_v42 = vpop.permute.xlu1 %1056 }
 0x16b   : > { %v1271_v51 = vpop.permute.xlu0 %1270  ;;  %v1304_v57 = vsel %vm1274_vm6, %v4438_v28, %v1057_v42 }
 0x16c   : > { %v1527_v52 = vsel %vm1499_vm13, %v1495_v49, %v1271_v51 }
 0x16d   : > { %3824 = vmatmul.mubr.msk.bf16.gmra.mrb[24].mxu0 %vm1546_vm14, %v1527_v52 }
 0x16e   : > { %v1087_v55 = vpop.permute.xlu1 %1086 }
 0x16f   : > { %v1085_v46 = vpop.permute.xlu0 %1084  ;;  %v1335_v56 = vsel %vm1305_vm7, %v1304_v57, %v1087_v55 }
 0x170   : > { %v1333_v6 = vsel %vm1305_vm7, %v1302_v53, %v1085_v46 }
 0x172   : > { %v1119_v48 = vpop.permute.xlu1 %1118 }
 0x173   : > { %v1117_v37 = vpop.permute.xlu0 %1116  ;;  %v1368_v59 = vsel %vm1336_vm8, %v1335_v56, %v1119_v48 }
 0x174   : > { %v1366_v7 = vsel %vm1336_vm8, %v1333_v6, %v1117_v37 }
 0x176   : > { %v1151_v58 = vpop.permute.xlu1 %1150 }
 0x177   : > { %v1149_v14 = vpop.permute.xlu0 %1148  ;;  %v1401_v34 = vsel %vm1369_vm9, %v1368_v59, %v1151_v58 }
 0x178   : > { %v1399_v28 = vsel %vm1369_vm9, %v1366_v7, %v1149_v14 }
 0x17a   : > { %v1183_v1 = vpop.permute.xlu1 %1182 }
 0x17b   : > { %v1181_v43 = vpop.permute.xlu0 %1180  ;;  %v1434_v50 = vsel %vm1402_vm10, %v1401_v34, %v1183_v1 }
 0x17c   : > { %v1466_v8 = vsel %vm1435_vm11, %v1434_v50, %v1211_v31  ;;  %v1432_v61 = vsel %vm1402_vm10, %v1399_v28, %v1181_v43 }
 0x17d   : > { %v1498_v29 = vsel %vm1467_vm12, %v1466_v8, %v1241_v27 }
 0x17e   : > { %v1243_v10 = vpop.permute.xlu1 %1242  ;;  %v1530_v18 = vsel %vm1499_vm13, %v1498_v29, %v1271_v51 }
 0x17f   : > { %v1213_v63 = vpop.permute.xlu0 %1212 }
 0x180   : > { %v1465_v9 = vsel %vm1435_vm11, %v1432_v61, %v1213_v63 }
 0x181   : > { %v4607_v0 = vpop.f32.mrb[0].mxu0  ;;  %v1497_v62 = vsel %vm1467_vm12, %v1465_v9, %v1243_v10 }
 0x182   : > { %v4609_v2 = vpop.f32.mrb[1].mxu0  ;;  %v1747_v36 = vsel %vm1274_vm6, %v4607_v0, 0.0 }
 0x183   : > { %v4613_v11 = vpop.f32.mrb[2].mxu0  ;;  %v1273_v54 = vpop.permute.xlu0 %1272  ;;  %v1744_v15 = vsel %vm1274_vm6, %v4609_v2, 0.0 }
 0x184   : > { %v1529_v12 = vsel %vm1499_vm13, %v1497_v62, %v1273_v54  ;;  %v4616_v5 = vpop.f32.mrb[3].mxu0  ;;  %v1749_v21 = vsel %vm1274_vm6, %v4613_v11, 0.0 }
 0x185   : > { %v1745_v3 = vsel %vm1274_vm6, %v4616_v5, 0.0  ;;  %3827 = vmatprep.mubr.msk.bf16.mxu0 %vm1546_vm14, %v1529_v12 }
 0x186   : > { %v1746_v39 = vadd.f32 %v1745_v3, %v1744_v15  ;;  %3828 = vmatmul.mubr.msk.bf16.gmra.mrb[28].mxu0 %vm1546_vm14, %v1530_v18 }
 0x188   : > { %v1748_v19 = vadd.f32 %v1747_v36, %v1746_v39 }
 0x18a   : > { %v1750_v22 = vadd.f32 %v1749_v21, %v1748_v19 }
 0x1a0   : > { %v4629_v26 = vpop.f32.mrb[4].mxu0 }
 0x1a1   : > { %v4631_v31 = vpop.f32.mrb[5].mxu0  ;;  %v1755_v40 = vsel %vm1274_vm6, %v4629_v26, 0.0 }
 0x1a2   : > { %v1751_v16 = vsel %vm1274_vm6, %v4631_v31, 0.0  ;;  %v4635_v17 = vpop.f32.mrb[6].mxu0 }
 0x1a3   : > { %v1752_v32 = vadd.f32 %v1751_v16, %v1750_v22  ;;  %v4637_v27 = vpop.f32.mrb[7].mxu0  ;;  %v1757_v41 = vsel %vm1274_vm6, %v4635_v17, 0.0 }
 0x1a4   : > { %v1753_v33 = vsel %vm1274_vm6, %v4637_v27, 0.0 }
 0x1a5   : > { %v1754_v13 = vadd.f32 %v1753_v33, %v1752_v32 }
 0x1a7   : > { %v1756_v4 = vadd.f32 %v1755_v40, %v1754_v13 }
 0x1a9   : > { %v1758_v44 = vadd.f32 %v1757_v41, %v1756_v4 }
 0x1c0   : > { %v4645_v38 = vpop.f32.mrb[8].mxu0 }
 0x1c1   : > { %v4647_v23 = vpop.f32.mrb[9].mxu0  ;;  %v1763_v20 = vsel %vm1274_vm6, %v4645_v38, 0.0 }
 0x1c2   : > { %v1759_v30 = vsel %vm1274_vm6, %v4647_v23, 0.0  ;;  %v4651_v45 = vpop.f32.mrb[10].mxu0 }
 0x1c3   : > { %v1760_v35 = vadd.f32 %v1759_v30, %v1758_v44  ;;  %v4653_v47 = vpop.f32.mrb[11].mxu0  ;;  %v1765_v49 = vsel %vm1274_vm6, %v4651_v45, 0.0 }
 0x1c4   : > { %v1761_v60 = vsel %vm1274_vm6, %v4653_v47, 0.0 }
 0x1c5   : > { %v1762_v25 = vadd.f32 %v1761_v60, %v1760_v35 }
 0x1c7   : > { %v1764_v42 = vadd.f32 %v1763_v20, %v1762_v25 }
 0x1c9   : > { %v1766_v51 = vadd.f32 %v1765_v49, %v1764_v42 }
 0x1e0   : > { %v4661_v52 = vpop.f32.mrb[12].mxu0 }
 0x1e1   : > { %v4663_v55 = vpop.f32.mrb[13].mxu0  ;;  %v1771_v56 = vsel %vm1274_vm6, %v4661_v52, 0.0 }
 0x1e2   : > { %v1767_v46 = vsel %vm1274_vm6, %v4663_v55, 0.0  ;;  %v4667_v48 = vpop.f32.mrb[14].mxu0 }
 0x1e3   : > { %v1768_v37 = vadd.f32 %v1767_v46, %v1766_v51  ;;  %v4669_v57 = vpop.f32.mrb[15].mxu0  ;;  %v1773_v1 = vsel %vm1274_vm6, %v4667_v48, 0.0 }
 0x1e4   : > { %v1769_v58 = vsel %vm1274_vm6, %v4669_v57, 0.0 }
 0x1e5   : > { %v1770_v14 = vadd.f32 %v1769_v58, %v1768_v37 }
 0x1e7   : > { %v1772_v59 = vadd.f32 %v1771_v56, %v1770_v14 }
 0x1e9   : > { %v1774_v53 = vadd.f32 %v1773_v1, %v1772_v59 }
 0x200   : > { %v4677_v34 = vpop.f32.mrb[16].mxu0 }
 0x201   : > { %v4679_v43 = vpop.f32.mrb[17].mxu0  ;;  %v1779_v63 = vsel %vm1274_vm6, %v4677_v34, 0.0 }
 0x202   : > { %v1775_v6 = vsel %vm1274_vm6, %v4679_v43, 0.0  ;;  %v4683_v50 = vpop.f32.mrb[18].mxu0 }
 0x203   : > { %v1776_v7 = vadd.f32 %v1775_v6, %v1774_v53  ;;  %v4685_v28 = vpop.f32.mrb[19].mxu0  ;;  %v1781_v10 = vsel %vm1274_vm6, %v4683_v50, 0.0 }
 0x204   : > { %v1777_v8 = vsel %vm1274_vm6, %v4685_v28, 0.0 }
 0x205   : > { %v1778_v61 = vadd.f32 %v1777_v8, %v1776_v7 }
 0x207   : > { %v1780_v9 = vadd.f32 %v1779_v63, %v1778_v61 }
 0x209   : > { %v1782_v29 = vadd.f32 %v1781_v10, %v1780_v9 }
 0x220   : > { %v4693_v62 = vpop.f32.mrb[20].mxu0 }
 0x221   : > { %v1697_v54 = vpop.f32.mrb[21].mxu0  ;;  %v1787_v19 = vsel %vm1274_vm6, %v4693_v62, 0.0 }
 0x222   : > { %v1783_v12 = vsel %vm1274_vm6, %v1697_v54, 0.0  ;;  %v4696_v15 = vpop.f32.mrb[22].mxu0 }
 0x223   : > { %v1784_v3 = vadd.f32 %v1783_v12, %v1782_v29  ;;  %v1700_v18 = vpop.f32.mrb[23].mxu0  ;;  %v1789_v22 = vsel %vm1274_vm6, %v4696_v15, 0.0 }
 0x224   : > { %v1785_v39 = vsel %vm1274_vm6, %v1700_v18, 0.0 }
 0x225   : > { %v1786_v36 = vadd.f32 %v1785_v39, %v1784_v3 }
 0x227   : > { %v1788_v21 = vadd.f32 %v1787_v19, %v1786_v36 }
 0x229   : > { %v1790_v16 = vadd.f32 %v1789_v22, %v1788_v21 }
 0x240   : > { %v3825_v32 = vpop.f32.mrb[24].mxu0 }
 0x241   : > { %v1713_v33 = vpop.f32.mrb[25].mxu0  ;;  %v1795_v35 = vsel %vm1274_vm6, %v3825_v32, 0.0 }
 0x242   : > { %v1791_v13 = vsel %vm1274_vm6, %v1713_v33, 0.0  ;;  %v3826_v40 = vpop.f32.mrb[26].mxu0 }
 0x243   : > { %v1792_v4 = vadd.f32 %v1791_v13, %v1790_v16  ;;  %v1716_v41 = vpop.f32.mrb[27].mxu0  ;;  %v1797_v25 = vsel %vm1274_vm6, %v3826_v40, 0.0 }
 0x244   : > { %v1793_v44 = vsel %vm1274_vm6, %v1716_v41, 0.0 }
 0x245   : > { %v1794_v30 = vadd.f32 %v1793_v44, %v1792_v4 }
 0x247   : > { %v1796_v60 = vadd.f32 %v1795_v35, %v1794_v30 }
 0x249   : > { %v1798_v20 = vadd.f32 %v1797_v25, %v1796_v60 }
 0x259   : > { %v3829_v42 = vpop.f32.mrb[28].mxu0 }
 0x25a   : > { %v1729_v49 = vpop.f32.mrb[29].mxu0  ;;  %v1803_v59 = vsel %vm1274_vm6, %v3829_v42, 0.0 }
 0x25b   : > { %v1799_v51 = vsel %vm1274_vm6, %v1729_v49, 0.0  ;;  %v3830_v46 = vpop.f32.mrb[30].mxu0 }
 0x25c   : > { %v1800_v37 = vadd.f32 %v1799_v51, %v1798_v20  ;;  %v1732_v58 = vpop.f32.mrb[31].mxu0  ;;  %v1805_v53 = vsel %vm1274_vm6, %v3830_v46, 0.0 }
 0x25d   : > { %v1801_v14 = vsel %vm1274_vm6, %v1732_v58, 0.0 }
 0x25e   : > { %v1802_v56 = vadd.f32 %v1801_v14, %v1800_v37 }
 0x260   : > { %v1804_v1 = vadd.f32 %v1803_v59, %v1802_v56 }
 0x262   : > { %v1806_v6 = vadd.f32 %v1805_v53, %v1804_v1 }
 0x264   : > { %v1807_v7 = vrot.slane %v1806_v6, 4 }
 0x266   : > { %v1808_v8 = vadd.f32 %v1807_v7, %v1806_v6 }
 0x268   : > { %v1809_v61 = vrot.slane %v1808_v8, 2 }
 0x26a   : > { %v1810_v63 = vadd.f32 %v1809_v61, %v1808_v8 }
 0x26c   : > { %v1811_v9 = vrot.slane %v1810_v63, 1 }
 0x26e   : > { %v1812_v10 = vadd.f32 %v1811_v9, %v1810_v63 }
 0x270   : > { %v1813_v29 = vmul.f32 0.00390625, %v1812_v10 }
 0x272   : > { %v4712_v12 = vsub.f32 %v4609_v2, %v1813_v29  ;;  %v4715_v3 = vsub.f32 %v4616_v5, %v1813_v29  ;;  %v4718_v39 = vsub.f32 %v4607_v0, %v1813_v29  ;;  %v4721_v36 = vsub.f32 %v4613_v11, %v1813_v29 }
 0x273   : > { %v4724_v19 = vsub.f32 %v4631_v31, %v1813_v29  ;;  %v4727_v21 = vsub.f32 %v4637_v27, %v1813_v29  ;;  %v4730_v22 = vsub.f32 %v4629_v26, %v1813_v29  ;;  %v4733_v2 = vsub.f32 %v4635_v17, %v1813_v29 }
 0x274   : > { %v4736_v5 = vsub.f32 %v4647_v23, %v1813_v29  ;;  %v4739_v0 = vsub.f32 %v4653_v47, %v1813_v29  ;;  %v4742_v11 = vsub.f32 %v4645_v38, %v1813_v29  ;;  %v4745_v31 = vsub.f32 %v4651_v45, %v1813_v29 }
 0x275   : > { %v4748_v27 = vsub.f32 %v4663_v55, %v1813_v29  ;;  %v4751_v26 = vsub.f32 %v4669_v57, %v1813_v29  ;;  %v4754_v17 = vsub.f32 %v4661_v52, %v1813_v29  ;;  %v4757_v23 = vsub.f32 %v4667_v48, %v1813_v29 }
 0x276   : > { %v4760_v47 = vsub.f32 %v4679_v43, %v1813_v29  ;;  %v4763_v38 = vsub.f32 %v4685_v28, %v1813_v29  ;;  %v4766_v45 = vsub.f32 %v4677_v34, %v1813_v29  ;;  %v4769_v55 = vsub.f32 %v4683_v50, %v1813_v29 }
 0x277   : > { %v4771_v57 = vsub.f32 %v1697_v54, %v1813_v29  ;;  %v4773_v16 = vsub.f32 %v1700_v18, %v1813_v29  ;;  %v4776_v52 = vsub.f32 %v4693_v62, %v1813_v29  ;;  %v4779_v48 = vsub.f32 %v4696_v15, %v1813_v29 }
 0x278   : > { %v4781_v43 = vsub.f32 %v1713_v33, %v1813_v29  ;;  %v4783_v28 = vsub.f32 %v1716_v41, %v1813_v29  ;;  %v4785_v13 = vsub.f32 %v3825_v32, %v1813_v29  ;;  %v4787_v34 = vsub.f32 %v3826_v40, %v1813_v29 }
 0x279   : > { %v4789_v50 = vsub.f32 %v1729_v49, %v1813_v29  ;;  %v4791_v54 = vsub.f32 %v1732_v58, %v1813_v29  ;;  %v4793_v18 = vsub.f32 %v3829_v42, %v1813_v29  ;;  %v4795_v4 = vsub.f32 %v3830_v46, %v1813_v29 }
 0x27a   : > { %v1846_v62 = vmul.f32 %v4712_v12, %v4712_v12  ;;  %v1847_v15 = vmul.f32 %v4715_v3, %v4715_v3  ;;  %v1848_v32 = vmul.f32 %v4718_v39, %v4718_v39  ;;  %v1849_v33 = vmul.f32 %v4721_v36, %v4721_v36 }
 0x27b   : > { %v1850_v30 = vmul.f32 %v4724_v19, %v4724_v19  ;;  %v1851_v25 = vmul.f32 %v4727_v21, %v4727_v21  ;;  %v1852_v49 = vmul.f32 %v4730_v22, %v4730_v22  ;;  %v1853_v37 = vmul.f32 %v4733_v2, %v4733_v2 }
 0x27c   : > { %v1878_v40 = vsel %vm1274_vm6, %v1846_v62, 0.0  ;;  %v1879_v41 = vsel %vm1274_vm6, %v1847_v15, 0.0  ;;  %v1881_v35 = vsel %vm1274_vm6, %v1848_v32, 0.0  ;;  %v1883_v20 = vsel %vm1274_vm6, %v1849_v33, 0.0 }
 0x27d   : > { %v1880_v44 = vadd.f32 %v1879_v41, %v1878_v40  ;;  %v1885_v51 = vsel %vm1274_vm6, %v1850_v30, 0.0  ;;  %v1887_v58 = vsel %vm1274_vm6, %v1851_v25, 0.0  ;;  %v1854_v56 = vmul.f32 %v4736_v5, %v4736_v5 }
 0x27e   : > { %v1889_v59 = vsel %vm1274_vm6, %v1852_v49, 0.0  ;;  %v1855_v53 = vmul.f32 %v4739_v0, %v4739_v0  ;;  %v1891_v6 = vsel %vm1274_vm6, %v1853_v37, 0.0  ;;  %v1856_v8 = vmul.f32 %v4742_v11, %v4742_v11 }
 0x27f   : > { %v1882_v60 = vadd.f32 %v1881_v35, %v1880_v44  ;;  %v1893_v61 = vsel %vm1274_vm6, %v1854_v56, 0.0  ;;  %v1857_v9 = vmul.f32 %v4745_v31, %v4745_v31  ;;  %v1858_v62 = vmul.f32 %v4748_v27, %v4748_v27 }
 0x280   : > { %v1895_v10 = vsel %vm1274_vm6, %v1855_v53, 0.0  ;;  %v1897_v15 = vsel %vm1274_vm6, %v1856_v8, 0.0  ;;  %v1859_v33 = vmul.f32 %v4751_v26, %v4751_v26  ;;  %v1860_v44 = vmul.f32 %v4754_v17, %v4754_v17 }
 0x281   : > { %v1884_v42 = vadd.f32 %v1883_v20, %v1882_v60  ;;  %v1899_v40 = vsel %vm1274_vm6, %v1857_v9, 0.0  ;;  %v1901_v30 = vsel %vm1274_vm6, %v1858_v62, 0.0  ;;  %v1861_v60 = vmul.f32 %v4757_v23, %v4757_v23 }
 0x282   : > { %v1903_v25 = vsel %vm1274_vm6, %v1859_v33, 0.0  ;;  %v1905_v49 = vsel %vm1274_vm6, %v1860_v44, 0.0 }
 0x283   : > { %v1886_v46 = vadd.f32 %v1885_v51, %v1884_v42  ;;  %v1862_v42 = vmul.f32 %v4760_v47, %v4760_v47  ;;  %v1907_v37 = vsel %vm1274_vm6, %v1861_v60, 0.0 }
 0x285   : > { %v1888_v14 = vadd.f32 %v1887_v58, %v1886_v46  ;;  %v1863_v46 = vmul.f32 %v4763_v38, %v4763_v38  ;;  %v1909_v56 = vsel %vm1274_vm6, %v1862_v42, 0.0 }
 0x287   : > { %v1890_v1 = vadd.f32 %v1889_v59, %v1888_v14  ;;  %v1864_v14 = vmul.f32 %v4766_v45, %v4766_v45  ;;  %v1911_v53 = vsel %vm1274_vm6, %v1863_v46, 0.0 }
 0x289   : > { %v1892_v7 = vadd.f32 %v1891_v6, %v1890_v1  ;;  %v1865_v1 = vmul.f32 %v4769_v55, %v4769_v55  ;;  %v1913_v8 = vsel %vm1274_vm6, %v1864_v14, 0.0 }
 0x28b   : > { %v1894_v63 = vadd.f32 %v1893_v61, %v1892_v7  ;;  %v1866_v7 = vmul.f32 %v4771_v57, %v4771_v57  ;;  %v1915_v9 = vsel %vm1274_vm6, %v1865_v1, 0.0 }
 0x28d   : > { %v1896_v29 = vadd.f32 %v1895_v10, %v1894_v63  ;;  %v1867_v63 = vmul.f32 %v4773_v16, %v4773_v16  ;;  %v1917_v62 = vsel %vm1274_vm6, %v1866_v7, 0.0 }
 0x28f   : > { %v1898_v32 = vadd.f32 %v1897_v15, %v1896_v29  ;;  %v1868_v29 = vmul.f32 %v4776_v52, %v4776_v52  ;;  %v1919_v33 = vsel %vm1274_vm6, %v1867_v63, 0.0 }
 0x291   : > { %v1900_v41 = vadd.f32 %v1899_v40, %v1898_v32  ;;  %v1869_v32 = vmul.f32 %v4779_v48, %v4779_v48  ;;  %v1921_v44 = vsel %vm1274_vm6, %v1868_v29, 0.0 }
 0x293   : > { %v1902_v35 = vadd.f32 %v1901_v30, %v1900_v41  ;;  %v1870_v41 = vmul.f32 %v4781_v43, %v4781_v43  ;;  %v1923_v60 = vsel %vm1274_vm6, %v1869_v32, 0.0 }
 0x295   : > { %v1904_v20 = vadd.f32 %v1903_v25, %v1902_v35  ;;  %v1871_v35 = vmul.f32 %v4783_v28, %v4783_v28  ;;  %v1925_v42 = vsel %vm1274_vm6, %v1870_v41, 0.0 }
 0x297   : > { %v1906_v51 = vadd.f32 %v1905_v49, %v1904_v20  ;;  %v1872_v20 = vmul.f32 %v4785_v13, %v4785_v13  ;;  %v1927_v46 = vsel %vm1274_vm6, %v1871_v35, 0.0 }
 0x299   : > { %v1908_v58 = vadd.f32 %v1907_v37, %v1906_v51  ;;  %v1873_v51 = vmul.f32 %v4787_v34, %v4787_v34  ;;  %v1929_v14 = vsel %vm1274_vm6, %v1872_v20, 0.0 }
 0x29b   : > { %v1910_v59 = vadd.f32 %v1909_v56, %v1908_v58  ;;  %v1874_v58 = vmul.f32 %v4789_v50, %v4789_v50  ;;  %v1931_v1 = vsel %vm1274_vm6, %v1873_v51, 0.0 }
 0x29d   : > { %v1912_v6 = vadd.f32 %v1911_v53, %v1910_v59  ;;  %v1875_v59 = vmul.f32 %v4791_v54, %v4791_v54  ;;  %v1933_v7 = vsel %vm1274_vm6, %v1874_v58, 0.0  ;;  %v4906_v58 = vld [vmem:[%s6428_s3] ss:$0 sm:$0xff] }
 0x29f   : > { %v1914_v61 = vadd.f32 %v1913_v8, %v1912_v6  ;;  %v1876_v6 = vmul.f32 %v4793_v18, %v4793_v18  ;;  %v1935_v63 = vsel %vm1274_vm6, %v1875_v59, 0.0 }
 0x2a1   : > { %v1916_v10 = vadd.f32 %v1915_v9, %v1914_v61  ;;  %v1877_v61 = vmul.f32 %v4795_v4, %v4795_v4 }
 0x2a3   : > { %v1918_v15 = vadd.f32 %v1917_v62, %v1916_v10  ;;  %v1937_v10 = vsel %vm1274_vm6, %v1876_v6, 0.0  ;;  %v1939_v62 = vsel %vm1274_vm6, %v1877_v61, 0.0 }
 0x2a5   : > { %v1920_v40 = vadd.f32 %v1919_v33, %v1918_v15 }
 0x2a7   : > { %v1922_v30 = vadd.f32 %v1921_v44, %v1920_v40 }
 0x2a9   : > { %v1924_v25 = vadd.f32 %v1923_v60, %v1922_v30 }
 0x2ab   : > { %v1926_v49 = vadd.f32 %v1925_v42, %v1924_v25  ;;  %v1952_v25 = vlaneseq  ;;  %v317_v42 = vld [vmem:[%s6427_s2] sm:$0x1] }
 0x2ad   : > { %v1928_v37 = vadd.f32 %v1927_v46, %v1926_v49  ;;  %v4893_v20 = vshrl.u32 %v1952_v25, 7 }
 0x2af   : > { %v1930_v56 = vadd.f32 %v1929_v14, %v1928_v37  ;;  %6446 = vst [vmem:[#allocation2_spill] sm:$0xff] %v4893_v20  ;;  %v6433_v49 = vsub.s32 0, %v4893_v20 }
 0x2b1   : > { %v1932_v53 = vadd.f32 %v1931_v1, %v1930_v56 }
 0x2b3   : > { %v1934_v8 = vadd.f32 %v1933_v7, %v1932_v53 }
 0x2b5   : > { %v1936_v9 = vadd.f32 %v1935_v63, %v1934_v8 }
 0x2b7   : > { %v1938_v29 = vadd.f32 %v1937_v10, %v1936_v9 }
 0x2b9   : > { %v1940_v15 = vadd.f32 %v1939_v62, %v1938_v29 }
 0x2bb   : > { %v1941_v32 = vrot.slane %v1940_v15, 4 }
 0x2bd   : > { %v1942_v33 = vadd.f32 %v1941_v32, %v1940_v15 }
 0x2bf   : > { %v1943_v40 = vrot.slane %v1942_v33, 2 }
 0x2c1   : > { %v1944_v41 = vadd.f32 %v1943_v40, %v1942_v33 }
 0x2c3   : > { %v1945_v44 = vrot.slane %v1944_v41, 1 }
 0x2c5   : > { %v1946_v30 = vadd.f32 %v1945_v44, %v1944_v41 }
 0x2c7   : > { %v1947_v35 = vmul.f32 0.00390625, %v1946_v30 }
 0x2c9   : > { %v1948_v60 = vadd.f32 1e-05, %v1947_v35 }
 0x2cb   : > { %3941 = vrsqrt.f32 %v1948_v60 }
 0x2d5   : > { %v3942_v51 = vpop.eup %3941 }
 0x2d6   : > { %v1950_v46 = vmul.f32 %v3942_v51, %v317_v42 }
 0x2d8   : > { %v4901_v37 = vrot.slane %v1950_v46, %v6433_v49 }
 0x2da   : > { %v1985_v14 = vmul.f32 %v4901_v37, %v4789_v50  ;;  %v1986_v56 = vmul.f32 %v4901_v37, %v4791_v54  ;;  %v1959_v7 = vmul.f32 %v4901_v37, %v4718_v39  ;;  %v1960_v61 = vmul.f32 %v4901_v37, %v4721_v36 }
 0x2db   : > { %v1957_v54 = vmul.f32 %v4901_v37, %v4712_v12  ;;  %v1958_v10 = vmul.f32 %v4901_v37, %v4715_v3  ;;  %v1987_v39 = vmul.f32 %v4901_v37, %v4793_v18  ;;  %v1988_v36 = vmul.f32 %v4901_v37, %v4795_v4 }
 0x2dc   : > { %v2023_v59 = vadd.f32 %v4906_v58, %v1985_v14  ;;  %v2024_v1 = vadd.f32 %v4906_v58, %v1986_v56  ;;  %v1997_v63 = vadd.f32 %v4906_v58, %v1959_v7  ;;  %v1998_v50 = vadd.f32 %v4906_v58, %v1960_v61 }
 0x2dd   : > { %v1995_v15 = vadd.f32 %v4906_v58, %v1957_v54  ;;  %v1961_v32 = vmul.f32 %v4901_v37, %v4724_v19  ;;  %v1962_v12 = vmul.f32 %v4901_v37, %v4727_v21  ;;  %v1996_v3 = vadd.f32 %v4906_v58, %v1958_v10 }
 0x2de   : > { %v2055_v53 = vmax.f32 %v2023_v59, 0.0  ;;  %v2056_v6 = vmax.f32 %v2024_v1, 0.0  ;;  %v2029_v9 = vmax.f32 %v1997_v63, 0.0  ;;  %v2030_v29 = vmax.f32 %v1998_v50, 0.0 }
 0x2df   : > { %v1963_v40 = vmul.f32 %v4901_v37, %v4730_v22  ;;  %v1964_v18 = vmul.f32 %v4901_v37, %v4733_v2  ;;  %v1965_v19 = vmul.f32 %v4901_v37, %v4736_v5  ;;  %v2025_v44 = vadd.f32 %v4906_v58, %v1987_v39 }
 0x2e0   : > { %v4916_v8 = vpack.c.bf16 %v2056_v6, %v2055_v53  ;;  %v4926_v62 = vpack.c.bf16 %v2030_v29, %v2029_v9  ;;  %v2026_v21 = vadd.f32 %v4906_v58, %v1988_v36  ;;  %v2027_v30 = vmax.f32 %v1995_v15, 0.0 }
 0x2e1   : > { %v1999_v22 = vadd.f32 %v4906_v58, %v1961_v32  ;;  %v2000_v2 = vadd.f32 %v4906_v58, %v1962_v12  ;;  %v2028_v60 = vmax.f32 %v1996_v3, 0.0  ;;  %v1966_v25 = vmul.f32 %v4901_v37, %v4739_v0 }
 0x2e2   : > { %v2083_v33 = vshrl.u32 %v4926_v62, 16  ;;  %v2147_v4 = vshll.u32 %v4926_v62, 16  ;;  %v1967_v5 = vmul.f32 %v4901_v37, %v4742_v11  ;;  %v1968_v42 = vmul.f32 %v4901_v37, %v4745_v31 }
 0x2e3   : > { %v1969_v51 = vmul.f32 %v4901_v37, %v4748_v27  ;;  %v1970_v46 = vmul.f32 %v4901_v37, %v4751_v26  ;;  %v1971_v14 = vmul.f32 %v4901_v37, %v4754_v17  ;;  %v4971_v0 = vpack.c.bf16 %v2028_v60, %v2027_v30 }
 0x2e4   : > { %v4943_v41 = vrot.slane %v2083_v33, 7  ;;  %v1972_v11 = vmul.f32 %v4901_v37, %v4757_v23  ;;  %v1973_v31 = vmul.f32 %v4901_v37, %v4760_v47  ;;  %v2001_v27 = vadd.f32 %v4906_v58, %v1963_v40 }
 0x2e5   : > { %v2002_v26 = vadd.f32 %v4906_v58, %v1964_v18  ;;  %v1974_v17 = vmul.f32 %v4901_v37, %v4763_v38  ;;  %v2086_v59 = vshrl.u32 %v4971_v0, 16  ;;  %v2031_v1 = vmax.f32 %v1999_v22, 0.0 }
 0x2e6   : > { %v2149_v35 = vor.u32 %v2147_v4, %v4943_v41  ;;  %v2032_v53 = vmax.f32 %v2000_v2, 0.0  ;;  %v1975_v23 = vmul.f32 %v4901_v37, %v4766_v45  ;;  %v1976_v47 = vmul.f32 %v4901_v37, %v4769_v55 }
 0x2e7   : > { %v2003_v6 = vadd.f32 %v4906_v58, %v1965_v19  ;;  %v2004_v7 = vadd.f32 %v4906_v58, %v1966_v25  ;;  %v1977_v61 = vmul.f32 %v4901_v37, %v4771_v57  ;;  %v1978_v38 = vmul.f32 %v4901_v37, %v4773_v16 }
 0x2e8   : > { %v4969_v56 = vsel %vm4023_vm2, %v2083_v33, %v2149_v35  ;;  %v4994_v63 = vrot.slane %v2086_v59, 7  ;;  %v2151_v50 = vshll.u32 %v4971_v0, 16  ;;  %v2005_v54 = vadd.f32 %v4906_v58, %v1967_v5 }
 0x2e9   : > { %2640 = vrot.lane.b32.xlu0 %v4969_v56, %s3953_s30  ;;  %v2006_v45 = vadd.f32 %v4906_v58, %v1968_v42  ;;  %v2033_v9 = vmax.f32 %v2001_v27, 0.0  ;;  %v2034_v55 = vmax.f32 %v2002_v26, 0.0  ;;  %v2057_v29 = vmax.f32 %v2025_v44, 0.0 }
 0x2ea   : > { %v2153_v10 = vor.u32 %v2151_v50, %v4994_v63  ;;  %v2058_v39 = vmax.f32 %v2026_v21, 0.0  ;;  %v5002_v57 = vpack.c.bf16 %v2032_v53, %v2031_v1  ;;  %v1979_v16 = vmul.f32 %v4901_v37, %v4776_v52 }
 0x2eb   : > { %v1980_v36 = vmul.f32 %v4901_v37, %v4779_v48  ;;  %v2035_v15 = vmax.f32 %v2003_v6, 0.0  ;;  %v2036_v32 = vmax.f32 %v2004_v7, 0.0  ;;  %v2125_v12 = vshrl.u32 %v4916_v8, 16 }
 0x2ec   : > { %v1981_v33 = vmul.f32 %v4901_v37, %v4781_v43  ;;  %v5013_v3 = vsel %vm4023_vm2, %v2086_v59, %v2153_v10  ;;  %v2089_v40 = vshrl.u32 %v5002_v57, 16  ;;  %v2007_v18 = vadd.f32 %v4906_v58, %v1969_v51 }
 0x2ed   : > { %v2008_v52 = vadd.f32 %v4906_v58, %v1970_v46  ;;  %2638 = vrot.lane.b32.xlu1 %v5013_v3, %s3953_s30  ;;  %v2037_v48 = vmax.f32 %v2005_v54, 0.0  ;;  %v5020_v19 = vpack.c.bf16 %v2034_v55, %v2033_v9  ;;  %v2038_v44 = vmax.f32 %v2006_v45, 0.0 }
 0x2ee   : > { %v5022_v21 = vrot.slane %v2089_v40, 7  ;;  %v2155_v43 = vshll.u32 %v5002_v57, 16  ;;  %v5025_v30 = vpack.c.bf16 %v2058_v39, %v2057_v29  ;;  %v1982_v35 = vmul.f32 %v4901_v37, %v4783_v28 }
 0x2ef   : > { %v1983_v22 = vmul.f32 %v4901_v37, %v4785_v13  ;;  %v1984_v2 = vmul.f32 %v4901_v37, %v4787_v34  ;;  %v5033_v60 = vpack.c.bf16 %v2036_v32, %v2035_v15  ;;  %v2009_v25 = vadd.f32 %v4906_v58, %v1971_v14 }
 0x2f0   : > { %v2010_v5 = vadd.f32 %v4906_v58, %v1972_v11  ;;  %v2011_v42 = vadd.f32 %v4906_v58, %v1973_v31  ;;  %v2157_v51 = vor.u32 %v2155_v43, %v5022_v21  ;;  %v2012_v28 = vadd.f32 %v4906_v58, %v1974_v17 }
 0x2f1   : > { %v2013_v46 = vadd.f32 %v4906_v58, %v1975_v23  ;;  %v2014_v13 = vadd.f32 %v4906_v58, %v1976_v47  ;;  %2734 = vrot.lane.b32.xlu1 %v4969_v56, %s3954_s8  ;;  %v2092_v34 = vshrl.u32 %v5020_v19, 16  ;;  %v2039_v37 = vmax.f32 %v2007_v18, 0.0 }
 0x2f2   : > { %v2040_v14 = vmax.f32 %v2008_v52, 0.0  ;;  %v5049_v11 = vsel %vm4023_vm2, %v2089_v40, %v2157_v51  ;;  %v5051_v31 = vpack.c.bf16 %v2038_v44, %v2037_v48  ;;  %v2015_v27 = vadd.f32 %v4906_v58, %v1977_v61 }
 0x2f3   : > { %v2016_v26 = vadd.f32 %v4906_v58, %v1978_v38  ;;  %v2017_v17 = vadd.f32 %v4906_v58, %v1979_v16  ;;  %2736 = vrot.lane.b32.xlu0 %v5049_v11, %s3954_s8  ;;  %v2095_v59 = vshrl.u32 %v5033_v60, 16  ;;  %v2018_v1 = vadd.f32 %v4906_v58, %v1980_v36 }
 0x2f4   : > { %v2019_v53 = vadd.f32 %v4906_v58, %v1981_v33  ;;  %v2020_v23 = vadd.f32 %v4906_v58, %v1982_v35  ;;  %v2021_v47 = vadd.f32 %v4906_v58, %v1983_v22  ;;  %v2041_v6 = vmax.f32 %v2009_v25, 0.0 }
 0x2f5   : > { %v2042_v7 = vmax.f32 %v2010_v5, 0.0  ;;  %v2159_v61 = vshll.u32 %v5020_v19, 16  ;;  %v5064_v38 = vrot.slane %v2092_v34, 7  ;;  %2642 = vrot.lane.b32.xlu1 %v5049_v11, %s3953_s30  ;;  %v2022_v54 = vadd.f32 %v4906_v58, %v1984_v2 }
 0x2f6   : > { %v2043_v45 = vmax.f32 %v2011_v42, 0.0  ;;  %v5069_v9 = vpack.c.bf16 %v2040_v14, %v2039_v37  ;;  %v2098_v55 = vshrl.u32 %v5051_v31, 16  ;;  %v2044_v10 = vmax.f32 %v2012_v28, 0.0 }
 0x2f7   : > { %v2045_v29 = vmax.f32 %v2013_v46, 0.0  ;;  %v2161_v39 = vor.u32 %v2159_v61, %v5064_v38  ;;  %v5075_v16 = vrot.slane %v2095_v59, 7  ;;  %v2046_v36 = vmax.f32 %v2014_v13, 0.0 }
 0x2f8   : > { %v2047_v15 = vmax.f32 %v2015_v27, 0.0  ;;  %v2048_v32 = vmax.f32 %v2016_v26, 0.0  ;;  %v2049_v33 = vmax.f32 %v2017_v17, 0.0  ;;  %v2050_v40 = vmax.f32 %v2018_v1, 0.0 }
 0x2f9   : > { %v5077_v18 = vpack.c.bf16 %v2042_v7, %v2041_v6  ;;  %v2163_v58 = vshll.u32 %v5033_v60, 16  ;;  %v5082_v52 = vsel %vm4023_vm2, %v2092_v34, %v2161_v39  ;;  %v2051_v48 = vmax.f32 %v2019_v53, 0.0 }
 0x2fa   : > { %v2052_v44 = vmax.f32 %v2020_v23, 0.0  ;;  %v2101_v35 = vshrl.u32 %v5069_v9, 16  ;;  %2644 = vrot.lane.b32.xlu0 %v5082_v52, %s3953_s30  ;;  %v2166_v22 = vrot.slane %v2098_v55, 7  ;;  %2738 = vrot.lane.b32.xlu1 %v5082_v52, %s3954_s8  ;;  %v2053_v2 = vmax.f32 %v2021_v47, 0.0 }
 0x2fb   : > { %v2054_v25 = vmax.f32 %v2022_v54, 0.0  ;;  %v5089_v5 = vpack.c.bf16 %v2044_v10, %v2043_v45  ;;  %v2165_v42 = vor.u32 %v2163_v58, %v5075_v16  ;;  %v2203_v51 = vshll.u32 %v4916_v8, 16 }
 0x2fc   : > { %v5095_v28 = vpack.c.bf16 %v2046_v36, %v2045_v29  ;;  %v5097_v46 = vpack.c.bf16 %v2048_v32, %v2047_v15  ;;  %v2167_v13 = vshll.u32 %v5051_v31, 16  ;;  %v2242_v34 = vrot.slane %v2147_v4, 7 }
 0x2fd   : > { %v2243_v37 = vrot.slane %v2151_v50, 7  ;;  %v5104_v14 = vpack.c.bf16 %v2050_v40, %v2049_v33  ;;  %v2104_v27 = vshrl.u32 %v5077_v18, 16  ;;  %v2244_v26 = vrot.slane %v2155_v43, 7 }
 0x2fe   : > { %v2170_v17 = vrot.slane %v2101_v35, 7  ;;  %v2169_v1 = vor.u32 %v2167_v13, %v2166_v22  ;;  %v5111_v53 = vsel %vm4023_vm2, %v2095_v59, %v2165_v42  ;;  %v5113_v31 = vpack.c.bf16 %v2052_v44, %v2051_v48 }
 0x2ff   : > { %v5115_v62 = vpack.c.bf16 %v2054_v25, %v2053_v2  ;;  %v2107_v4 = vshrl.u32 %v5089_v5, 16  ;;  %v2171_v0 = vshll.u32 %v5069_v9, 16  ;;  %2740 = vrot.lane.b32.xlu0 %v5111_v53, %s3954_s8  ;;  %2646 = vrot.lane.b32.xlu1 %v5111_v53, %s3953_s30  ;;  %v2110_v50 = vshrl.u32 %v5095_v28, 16 }
 0x300   : > { %v2113_v57 = vshrl.u32 %v5097_v46, 16  ;;  %v2175_v43 = vshll.u32 %v5077_v18, 16  ;;  %v2179_v59 = vshll.u32 %v5089_v5, 16  ;;  %v2183_v23 = vshll.u32 %v5095_v28, 16 }
 0x301   : > { %v2174_v47 = vrot.slane %v2104_v27, 7  ;;  %v2247_v6 = vrot.slane %v2167_v13, 7  ;;  %v5131_v7 = vsel %vm4023_vm2, %v4943_v41, %v2242_v34  ;;  %v2173_v54 = vor.u32 %v2171_v0, %v2170_v17 }
 0x302   : > { %v5135_v45 = vsel %vm4023_vm2, %v2098_v55, %v2169_v1  ;;  %v5140_v9 = vsel %vm4023_vm2, %v4994_v63, %v2243_v37  ;;  %v5145_v10 = vsel %vm4023_vm2, %v5022_v21, %v2244_v26  ;;  %v2116_v29 = vshrl.u32 %v5104_v14, 16 }
 0x303   : > { %v2119_v41 = vshrl.u32 %v5113_v31, 16  ;;  %v2187_v39 = vshll.u32 %v5097_v46, 16  ;;  %v2248_v36 = vrot.slane %v2171_v0, 7  ;;  %2648 = vrot.lane.b32.xlu0 %v5135_v45, %s3953_s30  ;;  %2742 = vrot.lane.b32.xlu1 %v5135_v45, %s3954_s8  ;;  %v2122_v63 = vshrl.u32 %v5115_v62, 16 }
 0x304   : > { %v2191_v55 = vshll.u32 %v5104_v14, 16  ;;  %v2195_v21 = vshll.u32 %v5113_v31, 16  ;;  %v2249_v15 = vrot.slane %v2175_v43, 7  ;;  %v2199_v32 = vshll.u32 %v5115_v62, 16 }
 0x305   : > { %v2178_v33 = vrot.slane %v2107_v4, 7  ;;  %v2182_v40 = vrot.slane %v2110_v50, 7  ;;  %v2250_v18 = vrot.slane %v2179_v59, 7  ;;  %v2251_v48 = vrot.slane %v2183_v23, 7 }
 0x306   : > { %v2177_v44 = vor.u32 %v2175_v43, %v2174_v47  ;;  %v5164_v2 = vsel %vm4023_vm2, %v2101_v35, %v2173_v54  ;;  %v5168_v25 = vsel %vm4023_vm2, %v2166_v22, %v2247_v6  ;;  %v2207_v42 = vshll.u32 %v5025_v30, 16 }
 0x307   : > { %v2186_v13 = vrot.slane %v2113_v57, 7  ;;  %v2252_v34 = vrot.slane %v2187_v39, 7  ;;  %2744 = vrot.lane.b32.xlu0 %v5164_v2, %s3954_s8  ;;  %2650 = vrot.lane.b32.xlu1 %v5164_v2, %s3953_s30  ;;  %v5179_v35 = vsel %vm4023_vm2, %v2170_v17, %v2248_v36  ;;  %v2190_v37 = vrot.slane %v2116_v29, 7 }
 0x308   : > { %v2253_v14 = vrot.slane %v2191_v55, 7  ;;  %v2128_v22 = vshrl.u32 %v5025_v30, 16  ;;  %v5184_v26 = vsel %vm4023_vm2, %v2174_v47, %v2249_v15  ;;  %v2194_v1 = vrot.slane %v2119_v41, 7 }
 0x309   : > { %v2198_v0 = vrot.slane %v2122_v63, 7  ;;  %v2254_v43 = vrot.slane %v2195_v21, 7  ;;  %v5192_v6 = vsel %vm4023_vm2, %v2178_v33, %v2250_v18  ;;  %v2255_v17 = vrot.slane %v2199_v32, 7 }
 0x30a   : > { %v2181_v54 = vor.u32 %v2179_v59, %v2178_v33  ;;  %v5196_v30 = vsel %vm4023_vm2, %v2104_v27, %v2177_v44  ;;  %v5200_v47 = vsel %vm4023_vm2, %v2182_v40, %v2251_v48  ;;  %v2202_v36 = vrot.slane %v2125_v12, 7 }
 0x30b   : > { %6447 = vst [vmem:[#allocation3_spill] sm:$0xff] %v5196_v30  ;;  %v2256_v15 = vrot.slane %v2203_v51, 7  ;;  %2652 = vrot.lane.b32.xlu0 %v5196_v30, %s3953_s30  ;;  %2746 = vrot.lane.b32.xlu1 %v5196_v30, %s3954_s8  ;;  %v5212_v27 = vsel %vm4023_vm2, %v2186_v13, %v2252_v34  ;;  %v2257_v59 = vrot.slane %v2207_v42, 7  ;;  %v2206_v33 = vrot.slane %v2128_v22, 7 }
 0x30c   : > { %v5216_v18 = vsel %vm4023_vm2, %v2190_v37, %v2253_v14  ;;  %v5220_v48 = vsel %vm4023_vm2, %v2194_v1, %v2254_v43  ;;  %v2185_v44 = vor.u32 %v2183_v23, %v2182_v40  ;;  %v5226_v49 = vsel %vm4023_vm2, %v2107_v4, %v2181_v54 }
 0x30d   : > { %v5230_v34 = vsel %vm4023_vm2, %v2198_v0, %v2255_v17  ;;  %v5238_v14 = vsel %vm4023_vm2, %v2202_v36, %v2256_v15  ;;  %v5242_v5 = vsel %vm4023_vm2, %v2206_v33, %v2257_v59  ;;  %v2189_v4 = vor.u32 %v2187_v39, %v2186_v13 }
 0x30e   : > { %v5248_v23 = vsel %vm4023_vm2, %v2110_v50, %v2185_v44  ;;  %v2193_v40 = vor.u32 %v2191_v55, %v2190_v37  ;;  %v2197_v28 = vor.u32 %v2195_v21, %v2194_v1  ;;  %v2201_v46 = vor.u32 %v2199_v32, %v2198_v0 }
 0x30f   : > { %2748 = vrot.lane.b32.xlu0 %v5226_v49, %s3954_s8  ;;  %2654 = vrot.lane.b32.xlu1 %v5226_v49, %s3953_s30  ;;  %6448 = vst [vmem:[#allocation4_spill] sm:$0xff] %v5248_v23  ;;  %v5258_v43 = vsel %vm4023_vm2, %v2113_v57, %v2189_v4  ;;  %v2517_v62 = vrot.slane %v5131_v7, 1  ;;  %v2520_v55 = vrot.slane %v5140_v9, 1  ;;  %v2245_v32 = vrot.slane %v2159_v61, 7 }
 0x310   : > { %6449 = vst [vmem:[#allocation5_spill] sm:$0xff] %v5258_v43  ;;  %v5266_v50 = vsel %vm4023_vm2, %v2116_v29, %v2193_v40  ;;  %v5276_v57 = vsel %vm4023_vm2, %v2119_v41, %v2197_v28  ;;  %v2205_v29 = vor.u32 %v2203_v51, %v2202_v36  ;;  %v5288_v39 = vsel %vm4023_vm2, %v2122_v63, %v2201_v46 }
 0x311   : > { %6450 = vst [vmem:[#allocation6_spill] sm:$0xff] %v5266_v50  ;;  %6451 = vst [vmem:[#allocation7_spill] sm:$0xff] %v5276_v57  ;;  %v2209_v41 = vor.u32 %v2207_v42, %v2206_v33  ;;  %v2516_v51 = vrot.slane %v4969_v56, 1  ;;  %v2522_v42 = vrot.slane %v5049_v11, 1  ;;  %v2523_v13 = vrot.slane %v5145_v10, 1 }
 0x312   : > { %6452 = vst [vmem:[#allocation8_spill] sm:$0xff] %v5288_v39  ;;  %v5298_v31 = vsel %vm4023_vm2, %v2125_v12, %v2205_v29  ;;  %v2519_v12 = vrot.slane %v5013_v3, 1  ;;  %v2246_v37 = vrot.slane %v2163_v58, 7  ;;  %v2525_v19 = vrot.slane %v5082_v52, 1 }
 0x313   : > { %2656 = vrot.lane.b32.xlu0 %v5248_v23, %s3953_s30  ;;  %2750 = vrot.lane.b32.xlu1 %v5248_v23, %s3954_s8  ;;  %6453 = vst [vmem:[#allocation9_spill] sm:$0xff] %v5298_v31  ;;  %v5308_v63 = vsel %vm4023_vm2, %v2128_v22, %v2209_v41  ;;  %v2518_v8 = vsel %vm965_vm3, %v2516_v51, %v2517_v62  ;;  %v2531_v24 = vrot.slane %v5135_v45, 1  ;;  %v2534_v36 = vrot.slane %v5164_v2, 1 }
 0x314   : > { %v2521_v21 = vsel %vm965_vm3, %v2519_v12, %v2520_v55  ;;  %v5330_v22 = vsel %vm4023_vm2, %v5064_v38, %v2245_v32  ;;  %v2524_v1 = vsel %vm965_vm3, %v2522_v42, %v2523_v13  ;;  %v5340_v60 = vsel %vm4023_vm2, %v5075_v16, %v2246_v37 }
 0x315   : > { %v2526_v61 = vrot.slane %v5330_v22, 1  ;;  %v2528_v38 = vrot.slane %v5111_v53, 1  ;;  %v2529_v0 = vrot.slane %v5340_v60, 1  ;;  %v2532_v16 = vrot.slane %v5168_v25, 1 }
 0x316   : > { %v2535_v15 = vrot.slane %v5179_v35, 1  ;;  %v2537_v33 = vrot.slane %v5196_v30, 1  ;;  %v2538_v44 = vrot.slane %v5184_v26, 1  ;;  %v2540_v40 = vrot.slane %v5226_v49, 1 }
 0x317   : > { %2752 = vrot.lane.b32.xlu0 %v5258_v43, %s3954_s8  ;;  %2658 = vrot.lane.b32.xlu1 %v5258_v43, %s3953_s30  ;;  %v2527_v58 = vsel %vm965_vm3, %v2525_v19, %v2526_v61  ;;  %v2530_v17 = vsel %vm965_vm3, %v2528_v38, %v2529_v0  ;;  %v2533_v54 = vsel %vm965_vm3, %v2531_v24, %v2532_v16  ;;  %v2541_v28 = vrot.slane %v5192_v6, 1 }
 0x318   : > { %v2536_v59 = vsel %vm965_vm3, %v2534_v36, %v2535_v15  ;;  %v2539_v4 = vsel %vm965_vm3, %v2537_v33, %v2538_v44  ;;  %v2543_v29 = vrot.slane %v5248_v23, 1  ;;  %v2544_v41 = vrot.slane %v5200_v47, 1 }
 0x319   : > { %v2542_v46 = vsel %vm965_vm3, %v2540_v40, %v2541_v28  ;;  %v2546_v62 = vrot.slane %v5258_v43, 1  ;;  %v2549_v55 = vrot.slane %v5266_v50, 1  ;;  %v2552_v42 = vrot.slane %v5276_v57, 1 }
 0x31a   : > { %v2545_v51 = vsel %vm965_vm3, %v2543_v29, %v2544_v41  ;;  %v2553_v37 = vrot.slane %v5220_v48, 1  ;;  %v2555_v61 = vrot.slane %v5288_v39, 1  ;;  %v2556_v38 = vrot.slane %v5230_v34, 1 }
 0x31b   : > { %2660 = vrot.lane.b32.xlu0 %v5266_v50, %s3953_s30  ;;  %2754 = vrot.lane.b32.xlu1 %v5266_v50, %s3954_s8  ;;  %v2558_v24 = vrot.slane %v5298_v31, 1  ;;  %v2321_v16 = vshll.u32 %v5013_v3, 16  ;;  %v2559_v36 = vrot.slane %v5238_v14, 1  ;;  %v2309_v44 = vshll.u32 %v4969_v56, 16 }
 0x31c   : > { %v5400_v19 = vsel %vm965_vm3, %v2552_v42, %v2553_v37  ;;  %v5410_v0 = vsel %vm965_vm3, %v2555_v61, %v2556_v38  ;;  %v2576_v40 = vrot.slane %v5242_v5, 1  ;;  %v2326_v29 = vshll.u32 %v5140_v9, 16 }
 0x31d   : > { %v5423_v15 = vsel %vm965_vm3, %v2558_v24, %v2559_v36  ;;  %v2323_v33 = vrot.slane %v2321_v16, 1  ;;  %v2307_v42 = vshrl.u32 %v4969_v56, 16  ;;  %v2314_v37 = vshll.u32 %v5131_v7, 16 }
 0x31e   : > { %v2345_v36 = vshll.u32 %v5082_v52, 16  ;;  %v2338_v7 = vshll.u32 %v5145_v10, 16  ;;  %v2343_v10 = vshrl.u32 %v5082_v52, 16 }
 0x31f   : > { %2756 = vrot.lane.b32.xlu0 %v5276_v57, %s3954_s8  ;;  %2662 = vrot.lane.b32.xlu1 %v5276_v57, %s3953_s30 }
 0x323   : > { %2664 = vrot.lane.b32.xlu0 %v5288_v39, %s3953_s30  ;;  %2758 = vrot.lane.b32.xlu1 %v5288_v39, %s3954_s8 }
 0x327   : > { %2760 = vrot.lane.b32.xlu0 %v5298_v31, %s3954_s8  ;;  %2666 = vrot.lane.b32.xlu1 %v5298_v31, %s3953_s30 }
 0x32b   : > { %2668 = vrot.lane.b32.xlu0 %v5308_v63, %s3953_s30  ;;  %2608 = vrot.lane.b32.xlu1 %v2518_v8, %s3955_s11 }
 0x32f   : > { %2610 = vrot.lane.b32.xlu0 %v2521_v21, %s3955_s11  ;;  %2702 = vrot.lane.b32.xlu1 %v2521_v21, %s3956_s14  ;;  %v2550_v21 = vrot.slane %v5216_v18, 1 }
 0x331   : > { %v5388_v32 = vsel %vm965_vm3, %v2549_v55, %v2550_v21  ;;  %v2333_v55 = vshll.u32 %v5049_v11, 16  ;;  %v2328_v21 = vrot.slane %v2326_v29, 1 }
 0x333   : > { %2704 = vrot.lane.b32.xlu0 %v2518_v8, %s3956_s14  ;;  %2794 = vrot.lane.b32.xlu1 %v2518_v8, %s3960_s18  ;;  %v2547_v8 = vrot.slane %v5212_v27, 1  ;;  %v2335_v16 = vrot.slane %v2333_v55, 1  ;;  %v2350_v55 = vshll.u32 %v5330_v22, 16  ;;  %v2362_v22 = vshll.u32 %v5340_v60, 16 }
 0x335   : > { %v5380_v12 = vsel %vm965_vm3, %v2546_v62, %v2547_v8  ;;  %v2311_v8 = vrot.slane %v2309_v44, 1 }
 0x337   : > { %2796 = vrot.lane.b32.xlu0 %v2524_v1, %s3960_s18  ;;  %2706 = vrot.lane.b32.xlu1 %v2524_v1, %s3956_s14  ;;  %v2312_v24 = vor.u32 %v2311_v8, %v2307_v42  ;;  %v2357_v8 = vshll.u32 %v5111_v53, 16 }
 0x33b   : > { %2612 = vrot.lane.b32.xlu0 %v2524_v1, %s3955_s11  ;;  %2798 = vrot.lane.b32.xlu1 %v2527_v58, %s3960_s18 }
 0x33f   : > { %2708 = vrot.lane.b32.xlu0 %v2527_v58, %s3956_s14  ;;  %2800 = vrot.lane.b32.xlu1 %v2530_v17, %s3960_s18 }
 0x343   : > { %2616 = vrot.lane.b32.xlu0 %v2530_v17, %s3955_s11  ;;  %2614 = vrot.lane.b32.xlu1 %v2527_v58, %s3955_s11 }
 0x347   : > { %2712 = vrot.lane.b32.xlu0 %v2533_v54, %s3956_s14  ;;  %2710 = vrot.lane.b32.xlu1 %v2530_v17, %s3956_s14 }
 0x34b   : > { %2620 = vrot.lane.b32.xlu0 %v2536_v59, %s3955_s11  ;;  %2802 = vrot.lane.b32.xlu1 %v2533_v54, %s3960_s18 }
 0x34f   : > { %2716 = vrot.lane.b32.xlu0 %v2539_v4, %s3956_s14  ;;  %2804 = vrot.lane.b32.xlu1 %v2536_v59, %s3960_s18 }
 0x353   : > { %2624 = vrot.lane.b32.xlu0 %v2542_v46, %s3955_s11  ;;  %2618 = vrot.lane.b32.xlu1 %v2533_v54, %s3955_s11 }
 0x357   : > { %2720 = vrot.lane.b32.xlu0 %v2545_v51, %s3956_s14  ;;  %2714 = vrot.lane.b32.xlu1 %v2536_v59, %s3956_s14  ;;  %v2575_v59 = vrot.slane %v5308_v63, 1 }
 0x359   : > { %v5438_v41 = vsel %vm965_vm3, %v2575_v59, %v2576_v40  ;;  %v2316_v59 = vrot.slane %v2314_v37, 1 }
 0x35b   : > { %2628 = vrot.lane.b32.xlu0 %v5380_v12, %s3955_s11  ;;  %2806 = vrot.lane.b32.xlu1 %v2539_v4, %s3960_s18  ;;  %v5397_v1 = vpop.permute.xlu0 %2640 }
 0x35f   : > { %2724 = vrot.lane.b32.xlu0 %v5388_v32, %s3956_s14  ;;  %2808 = vrot.lane.b32.xlu1 %v2542_v46, %s3960_s18  ;;  %v5394_v13 = vpop.permute.xlu1 %2638 }
 0x363   : > { %2632 = vrot.lane.b32.xlu0 %v5400_v19, %s3955_s11  ;;  %2622 = vrot.lane.b32.xlu1 %v2539_v4, %s3955_s11  ;;  %v5406_v58 = vpop.permute.xlu1 %2734 }
 0x365   : > { %v5412_v17 = vpop.permute.xlu0 %2736 }
 0x367   : > { %2728 = vrot.lane.b32.xlu0 %v5410_v0, %s3956_s14  ;;  %2718 = vrot.lane.b32.xlu1 %v2542_v46, %s3956_s14  ;;  %v5419_v54 = vpop.permute.xlu1 %2642  ;;  %v2319_v46 = vshrl.u32 %v5013_v3, 16 }
 0x369   : > { %v2324_v62 = vor.u32 %v2323_v33, %v2319_v46  ;;  %v2331_v33 = vshrl.u32 %v5049_v11, 16  ;;  %v5465_v46 = vsel %vm754_vm4, %v2312_v24, %v2316_v59 }
 0x36b   : > { %2636 = vrot.lane.b32.xlu0 %v5423_v15, %s3955_s11  ;;  %2810 = vrot.lane.b32.xlu1 %v2545_v51, %s3960_s18  ;;  %v5452_v38 = vsel %vm754_vm4, %v2324_v62, %v2328_v21  ;;  %v2336_v29 = vor.u32 %v2335_v16, %v2331_v33  ;;  %v2347_v62 = vrot.slane %v2345_v36, 1  ;;  %v2359_v16 = vrot.slane %v2357_v8, 1 }
 0x36c   : > { %v5430_v4 = vpop.permute.xlu0 %2644  ;;  %v5433_v28 = vpop.permute.xlu1 %2738  ;;  %v2355_v36 = vshrl.u32 %v5111_v53, 16 }
 0x36d   : > { %v2348_v24 = vor.u32 %v2347_v62, %v2343_v10  ;;  %v2364_v62 = vrot.slane %v2362_v22, 1  ;;  %v2369_v10 = vshll.u32 %v5135_v45, 16  ;;  %v2374_v22 = vshll.u32 %v5168_v25, 16 }
 0x36f   : > { %2732 = vrot.lane.b32.xlu0 %v5438_v41, %s3956_s14  ;;  %2812 = vrot.lane.b32.xlu1 %v5380_v12, %s3960_s18 }
 0x371   : > { %v5447_v61 = vpop.permute.xlu0 %2740  ;;  %v5449_v9 = vpop.permute.xlu1 %2646 }
 0x373   : > { %2580 = vrot.lane.b32.xlu0 %v5452_v38, %s3957_s15  ;;  %2626 = vrot.lane.b32.xlu1 %v2545_v51, %s3955_s11  ;;  %v2340_v51 = vrot.slane %v2338_v7, 1 }
 0x375   : > { %v5460_v44 = vpop.permute.xlu0 %2648  ;;  %v5462_v40 = vpop.permute.xlu1 %2742  ;;  %v5479_v37 = vsel %vm754_vm4, %v2336_v29, %v2340_v51  ;;  %v2360_v29 = vor.u32 %v2359_v16, %v2355_v36  ;;  %v2371_v16 = vrot.slane %v2369_v10, 1  ;;  %v2367_v36 = vshrl.u32 %v5135_v45, 16 }
 0x376   : > { %v2376_v10 = vrot.slane %v2374_v22, 1 }
 0x377   : > { %2672 = vrot.lane.b32.xlu0 %v5465_v46, %s3958_s16  ;;  %2722 = vrot.lane.b32.xlu1 %v5380_v12, %s3956_s14  ;;  %v2352_v12 = vrot.slane %v2350_v55, 1  ;;  %v5503_v60 = vsel %vm754_vm4, %v2360_v29, %v2364_v62  ;;  %v2372_v62 = vor.u32 %v2371_v16, %v2367_v36 }
 0x379   : > { %v5474_v21 = vpop.permute.xlu0 %2744  ;;  %v5476_v42 = vpop.permute.xlu1 %2650  ;;  %v5492_v7 = vsel %vm754_vm4, %v2348_v24, %v2352_v12  ;;  %v2381_v12 = vshll.u32 %v5164_v2, 16 }
 0x37a   : > { %6454 = vst [vmem:[#allocation10_spill] sm:$0xff] %v5476_v42 }
 0x37b   : > { %2766 = vrot.lane.b32.xlu0 %v5479_v37, %s3959_s17  ;;  %2814 = vrot.lane.b32.xlu1 %v5388_v32, %s3960_s18  ;;  %v2383_v20 = vrot.slane %v2381_v12, 1  ;;  %v3938_v12 = vld [vmem:[%s6429_s4] sm:$0xff]  }
 0x37c   : > { %3831 = vmatprep.subr.bf16.mxu1 %v3938_v12 }
 0x37d   : > { %v5487_v59 = vpop.permute.xlu0 %2652  ;;  %v5489_v33 = vpop.permute.xlu1 %2746  ;;  %3832 = vmatpush3.bf16.msra.mxu1 %v3938_v12  ;;  %v3940_v12 = vld [vmem:[%s6429_s4 + $0x10] ss:$0 sps:$4 sm:$0x33]  }
 0x37e   : > { %6455 = vst [vmem:[#allocation11_spill] sm:$0xff] %v5489_v33 }
 0x37f   : > { %2676 = vrot.lane.b32.xlu0 %v5492_v7, %s3958_s16  ;;  %2816 = vrot.lane.b32.xlu1 %v5400_v19, %s3960_s18 }
 0x381   : > { %v5498_v8 = vpop.permute.xlu0 %2748  ;;  %v5500_v51 = vpop.permute.xlu1 %2654 }
 0x382   : > { %6456 = vst [vmem:[#allocation12_spill] sm:$0xff] %v5498_v8  ;;  %6457 = vst [vmem:[#allocation13_spill] sm:$0xff] %v5500_v51 }
 0x383   : > { %2770 = vrot.lane.b32.xlu0 %v5503_v60, %s3959_s17  ;;  %2630 = vrot.lane.b32.xlu1 %v5388_v32, %s3955_s11 }
 0x385   : > { %v5510_v55 = vpop.permute.xlu0 %2656  ;;  %v5512_v24 = vpop.permute.xlu1 %2750 }
 0x386   : > { %6458 = vst [vmem:[#allocation14_spill] sm:$0xff] %v5510_v55  ;;  %6459 = vst [vmem:[#allocation15_spill] sm:$0xff] %v5512_v24  ;;  %v2379_v24 = vshrl.u32 %v5164_v2, 16  ;;  %v2482_v55 = vshll.u32 %v5238_v14, 16  ;;  %v2564_v14 = vshll.u32 %v5308_v63, 16 }
 0x387   : > { %2584 = vrot.lane.b32.xlu0 %v5492_v7, %s3957_s15  ;;  %2726 = vrot.lane.b32.xlu1 %v5400_v19, %s3956_s14  ;;  %v2386_v19 = vshll.u32 %v5179_v35, 16 }
 0x388   : > { %v2384_v16 = vor.u32 %v2383_v20, %v2379_v24  ;;  %v2393_v20 = vshll.u32 %v5196_v30, 16  ;;  %v3939_v24 = vld [vmem:[%s6429_s4 + $0x8] sm:$0xff]  }
 0x389   : > { %v5521_v29 = vpop.permute.xlu0 %2752  ;;  %v5523_v32 = vpop.permute.xlu1 %2658  ;;  %v2388_v36 = vrot.slane %v2386_v19, 1  ;;  %3833 = vmatprep.subr.bf16.mxu1 %v3939_v24 }
 0x38a   : > { %6460 = vst [vmem:[#allocation16_spill] sm:$0xff] %v5521_v29  ;;  %6461 = vst [vmem:[#allocation17_spill] sm:$0xff] %v5523_v32  ;;  %v5536_v29 = vsel %vm754_vm4, %v2372_v62, %v2376_v10  ;;  %3834 = vmatpush3.bf16.msra.mxu1 %v3939_v24 }
 0x38b   : > { %2586 = vrot.lane.b32.xlu0 %v5503_v60, %s3957_s15  ;;  %2818 = vrot.lane.b32.xlu1 %v5410_v0, %s3960_s18  ;;  %v5550_v62 = vsel %vm754_vm4, %v2384_v16, %v2388_v36  ;;  %v2395_v16 = vrot.slane %v2393_v20, 1  ;;  %v2405_v36 = vshll.u32 %v5226_v49, 16 }
 0x38c   : > { %3870 = vmatprep.subr.msk.bf16.mxu1 %vm1579_vm5, %v3940_v12 }
 0x38d   : > { %v5531_v51 = vpop.permute.xlu0 %2660  ;;  %v5533_v25 = vpop.permute.xlu1 %2754 }
 0x38e   : > { %6462 = vst [vmem:[#allocation18_spill] sm:$0xff] %v5531_v51  ;;  %6463 = vst [vmem:[#allocation19_spill] sm:$0xff] %v5533_v25  ;;  %v2407_v25 = vrot.slane %v2405_v36, 1  ;;  %v2434_v51 = vshll.u32 %v5212_v27, 16  ;;  %v2441_v27 = vshll.u32 %v5266_v50, 16 }
 0x38f   : > { %2680 = vrot.lane.b32.xlu0 %v5536_v29, %s3958_s16  ;;  %2820 = vrot.lane.b32.xlu1 %v5423_v15, %s3960_s18 }
 0x391   : > { %v5545_v35 = vpop.permute.xlu0 %2756  ;;  %v5547_v22 = vpop.permute.xlu1 %2662 }
 0x392   : > { %6464 = vst [vmem:[#allocation20_spill] sm:$0xff] %v5545_v35  ;;  %6465 = vst [vmem:[#allocation21_spill] sm:$0xff] %v5547_v22  ;;  %v2398_v22 = vshll.u32 %v5184_v26, 16  ;;  %v2403_v35 = vshrl.u32 %v5226_v49, 16  ;;  %v2410_v26 = vshll.u32 %v5192_v6, 16 }
 0x393   : > { %2774 = vrot.lane.b32.xlu0 %v5550_v62, %s3959_s17  ;;  %2634 = vrot.lane.b32.xlu1 %v5410_v0, %s3955_s11  ;;  %v2391_v0 = vshrl.u32 %v5196_v30, 16 }
 0x394   : > { %v2408_v36 = vor.u32 %v2407_v25, %v2403_v35 }
 0x395   : > { %v5560_v10 = vpop.permute.xlu0 %2664  ;;  %v5562_v19 = vpop.permute.xlu1 %2758  ;;  %v2396_v24 = vor.u32 %v2395_v16, %v2391_v0  ;;  %v2412_v0 = vrot.slane %v2410_v26, 1  ;;  %v2422_v26 = vshll.u32 %v5200_v47, 16 }
 0x396   : > { %6466 = vst [vmem:[#allocation22_spill] sm:$0xff] %v5560_v10  ;;  %6467 = vst [vmem:[#allocation23_spill] sm:$0xff] %v5562_v19  ;;  %v2400_v10 = vrot.slane %v2398_v22, 1 }
 0x397   : > { %2588 = vrot.lane.b32.xlu0 %v5536_v29, %s3957_s15  ;;  %2730 = vrot.lane.b32.xlu1 %v5423_v15, %s3956_s14  ;;  %v3121_v15 = vsel %vm1579_vm5, %v3940_v12, 0  ;;  %v2413_v6 = vsel %vm754_vm4, %v2408_v36, %v2412_v0 }
 0x398   : > { %3836 = vmatpush3.bf16.msra.mxu1 %v3121_v15  ;;  %v2401_v16 = vsel %vm754_vm4, %v2396_v24, %v2400_v10  ;;  %v2417_v15 = vshll.u32 %v5248_v23, 16  ;;  %v2415_v24 = vshrl.u32 %v5248_v23, 16 }
 0x399   : > { %v5575_v20 = vpop.permute.xlu0 %2760  ;;  %v5577_v19 = vpop.permute.xlu1 %2666 }
 0x39a   : > { %6468 = vst [vmem:[#allocation24_spill] sm:$0xff] %v5575_v20  ;;  %6469 = vst [vmem:[#allocation25_spill] sm:$0xff] %v5577_v19  ;;  %v2419_v10 = vrot.slane %v2417_v15, 1  ;;  %v2424_v15 = vrot.slane %v2422_v26, 1  ;;  %v2443_v26 = vrot.slane %v2441_v27, 1 }
 0x39b   : > { %2590 = vrot.lane.b32.xlu0 %v5550_v62, %s3957_s15  ;;  %2578 = vrot.lane.b32.xlu1 %v5465_v46, %s3957_s15 }
 0x39d   : > { %v5586_v32 = vpop.permute.xlu0 %2668  ;;  %v5588_v20 = vpop.permute.xlu1 %2608 }
 0x39e   : > { %6470 = vst [vmem:[#allocation26_spill] sm:$0xff] %v5586_v32  ;;  %v2427_v32 = vshrl.u32 %v5258_v43, 16 }
 0x39f   : > { %2684 = vrot.lane.b32.xlu0 %v2401_v16, %s3958_s16  ;;  %2670 = vrot.lane.b32.xlu1 %v5452_v38, %s3958_s16  ;;  %v2429_v38 = vshll.u32 %v5258_v43, 16  ;;  %v2451_v43 = vshrl.u32 %v5276_v57, 16 }
 0x3a1   : > { %v5594_v12 = vpop.permute.xlu0 %2610  ;;  %v5596_v22 = vpop.permute.xlu1 %2702  ;;  %v2431_v19 = vrot.slane %v2429_v38, 1 }
 0x3a3   : > { %2778 = vrot.lane.b32.xlu0 %v2413_v6, %s3959_s17  ;;  %2764 = vrot.lane.b32.xlu1 %v5465_v46, %s3959_s17  ;;  %v2420_v46 = vor.u32 %v2419_v10, %v2415_v24  ;;  %v2432_v30 = vor.u32 %v2431_v19, %v2427_v32  ;;  %v2436_v10 = vrot.slane %v2434_v51, 1  ;;  %v2446_v51 = vshll.u32 %v5216_v18, 16 }
 0x3a5   : > { %v5603_v25 = vpop.permute.xlu0 %2704  ;;  %v5605_v35 = vpop.permute.xlu1 %2794  ;;  %v2425_v47 = vsel %vm754_vm4, %v2420_v46, %v2424_v15  ;;  %v2437_v24 = vsel %vm754_vm4, %v2432_v30, %v2436_v10  ;;  %v2439_v30 = vshrl.u32 %v5266_v50, 16  ;;  %v2448_v27 = vrot.slane %v2446_v51, 1 }
 0x3a7   : > { %2592 = vrot.lane.b32.xlu0 %v2401_v16, %s3957_s15  ;;  %2582 = vrot.lane.b32.xlu1 %v5479_v37, %s3957_s15 }
 0x3a9   : > { %v5613_v36 = vpop.permute.xlu0 %2796  ;;  %v5615_v0 = vpop.permute.xlu1 %2706 }
 0x3ab   : > { %2594 = vrot.lane.b32.xlu0 %v2413_v6, %s3957_s15  ;;  %2674 = vrot.lane.b32.xlu1 %v5479_v37, %s3958_s16 }
 0x3ad   : > { %v5622_v33 = vpop.permute.xlu0 %2612  ;;  %v5624_v23 = vpop.permute.xlu1 %2798 }
 0x3af   : > { %2688 = vrot.lane.b32.xlu0 %v2425_v47, %s3958_s16  ;;  %2768 = vrot.lane.b32.xlu1 %v5492_v7, %s3959_s17  ;;  %v2453_v7 = vshll.u32 %v5276_v57, 16  ;;  %v2475_v57 = vshrl.u32 %v5298_v31, 16 }
 0x3b1   : > { %v5630_v38 = vpop.permute.xlu0 %2708  ;;  %v5632_v37 = vpop.permute.xlu1 %2800  ;;  %v2455_v10 = vrot.slane %v2453_v7, 1 }
 0x3b3   : > { %2782 = vrot.lane.b32.xlu0 %v2437_v24, %s3959_s17  ;;  %2678 = vrot.lane.b32.xlu1 %v5503_v60, %s3958_s16  ;;  %v2444_v60 = vor.u32 %v2443_v26, %v2439_v30  ;;  %v2456_v42 = vor.u32 %v2455_v10, %v2451_v43  ;;  %v2463_v10 = vshrl.u32 %v5288_v39, 16 }
 0x3b5   : > { %v5639_v32 = vpop.permute.xlu0 %2616  ;;  %v5641_v19 = vpop.permute.xlu1 %2614  ;;  %v2449_v18 = vsel %vm754_vm4, %v2444_v60, %v2448_v27 }
 0x3b7   : > { %2596 = vrot.lane.b32.xlu0 %v2425_v47, %s3957_s15  ;;  %2772 = vrot.lane.b32.xlu1 %v5536_v29, %s3959_s17  ;;  %v2458_v29 = vshll.u32 %v5220_v48, 16  ;;  %v2465_v48 = vshll.u32 %v5288_v39, 16 }
 0x3b9   : > { %v5649_v46 = vpop.permute.xlu0 %2712  ;;  %v5651_v15 = vpop.permute.xlu1 %2710  ;;  %v2460_v26 = vrot.slane %v2458_v29, 1  ;;  %v2467_v60 = vrot.slane %v2465_v48, 1 }
 0x3bb   : > { %2598 = vrot.lane.b32.xlu0 %v2437_v24, %s3957_s15  ;;  %2682 = vrot.lane.b32.xlu1 %v5550_v62, %s3958_s16  ;;  %v2461_v30 = vsel %vm754_vm4, %v2456_v42, %v2460_v26  ;;  %v2470_v42 = vshll.u32 %v5230_v34, 16 }
 0x3bd   : > { %v5658_v8 = vpop.permute.xlu0 %2620  ;;  %v5660_v50 = vpop.permute.xlu1 %2802  ;;  %v2472_v48 = vrot.slane %v2470_v42, 1 }
 0x3bf   : > { %2692 = vrot.lane.b32.xlu0 %v2449_v18, %s3958_s16  ;;  %2776 = vrot.lane.b32.xlu1 %v2401_v16, %s3959_s17  ;;  %v2477_v16 = vshll.u32 %v5298_v31, 16 }
 0x3c1   : > { %v5665_v7 = vpop.permute.xlu0 %2716  ;;  %v5667_v62 = vpop.permute.xlu1 %2804  ;;  %v2479_v26 = vrot.slane %v2477_v16, 1 }
 0x3c3   : > { %2786 = vrot.lane.b32.xlu0 %v2461_v30, %s3959_s17  ;;  %2686 = vrot.lane.b32.xlu1 %v2413_v6, %s3958_s16  ;;  %v2468_v6 = vor.u32 %v2467_v60, %v2463_v10  ;;  %v2484_v60 = vrot.slane %v2482_v55, 1  ;;  %v2562_v55 = vshrl.u32 %v5308_v63, 16 }
 0x3c5   : > { %v5673_v51 = vpop.permute.xlu0 %2624  ;;  %v5675_v43 = vpop.permute.xlu1 %2618  ;;  %v2473_v34 = vsel %vm754_vm4, %v2468_v6, %v2472_v48  ;;  %v2566_v6 = vrot.slane %v2564_v14, 1 }
 0x3c7   : > { %2600 = vrot.lane.b32.xlu0 %v2449_v18, %s3957_s15  ;;  %2780 = vrot.lane.b32.xlu1 %v2425_v47, %s3959_s17  ;;  %v2567_v48 = vor.u32 %v2566_v6, %v2562_v55 }
 0x3c9   : > { %v5682_v27 = vpop.permute.xlu0 %2720  ;;  %v5684_v29 = vpop.permute.xlu1 %2714 }
 0x3ca   : > { %6471 = vst [vmem:[#allocation27_spill] sm:$0xff] %v5682_v27  ;;  %v2480_v27 = vor.u32 %v2479_v26, %v2475_v57 }
 0x3cb   : > { %2602 = vrot.lane.b32.xlu0 %v2461_v30, %s3957_s15  ;;  %2690 = vrot.lane.b32.xlu1 %v2437_v24, %s3958_s16 }
 0x3cc   : > { %v2485_v10 = vsel %vm754_vm4, %v2480_v27, %v2484_v60 }
 0x3cd   : > { %v5690_v47 = vpop.permute.xlu0 %2628  ;;  %v5692_v39 = vpop.permute.xlu1 %2806 }
 0x3cf   : > { %2696 = vrot.lane.b32.xlu0 %v2473_v34, %s3958_s16  ;;  %2784 = vrot.lane.b32.xlu1 %v2449_v18, %s3959_s17  ;;  %v2569_v18 = vshll.u32 %v5242_v5, 16 }
 0x3d1   : > { %v5697_v16 = vpop.permute.xlu0 %2724  ;;  %v5699_v24 = vpop.permute.xlu1 %2808 }
 0x3d2   : > { %6472 = vst [vmem:[#allocation28_spill] sm:$0xff] %v5697_v16  ;;  %6473 = vst [vmem:[#allocation29_spill] sm:$0xff] %v5699_v24 }
 0x3d3   : > { %2790 = vrot.lane.b32.xlu0 %v2485_v10, %s3959_s17  ;;  %2694 = vrot.lane.b32.xlu1 %v2461_v30, %s3958_s16  ;;  %v2571_v30 = vrot.slane %v2569_v18, 1 }
 0x3d5   : > { %v5705_v42 = vpop.permute.xlu0 %2632  ;;  %v5707_v57 = vpop.permute.xlu1 %2622 }
 0x3d6   : > { %6474 = vst [vmem:[#allocation30_spill] sm:$0xff] %v5705_v42 }
 0x3d7   : > { %2604 = vrot.lane.b32.xlu0 %v2473_v34, %s3957_s15  ;;  %2788 = vrot.lane.b32.xlu1 %v2473_v34, %s3959_s17  ;;  %v2572_v34 = vsel %vm754_vm4, %v2567_v48, %v2571_v30 }
 0x3d9   : > { %v5713_v27 = vpop.permute.xlu0 %2728  ;;  %v5715_v26 = vpop.permute.xlu1 %2718 }
 0x3da   : > { %6475 = vst [vmem:[#allocation31_spill] sm:$0xff] %v5713_v27  ;;  %6476 = vst [vmem:[#allocation32_spill] sm:$0xff] %v5715_v26 }
 0x3db   : > { %2606 = vrot.lane.b32.xlu0 %v2485_v10, %s3957_s15  ;;  %2762 = vrot.lane.b32.xlu1 %v5308_v63, %s3954_s8 }
 0x3dd   : > { %v5720_v60 = vpop.permute.xlu0 %2636  ;;  %v5722_v14 = vpop.permute.xlu1 %2810 }
 0x3de   : > { %6477 = vst [vmem:[#allocation33_spill] sm:$0xff] %v5720_v60  ;;  %6478 = vst [vmem:[#allocation34_spill] sm:$0xff] %v5722_v14 }
 0x3df   : > { %2700 = vrot.lane.b32.xlu0 %v2572_v34, %s3958_s16  ;;  %2698 = vrot.lane.b32.xlu1 %v2485_v10, %s3958_s16  ;;  %s6320_s16 = scalar_lea.vmem %s6432_s7, %s3754_s12 }
 0x3e1   : > { %v5727_v5 = vpop.permute.xlu0 %2732  ;;  %v5729_v31 = vpop.permute.xlu1 %2812 }
 0x3e2   : > { %6479 = vst [vmem:[#allocation35_spill] sm:$0xff] %v5727_v5  ;;  %6480 = vst [vmem:[#allocation36_spill] sm:$0xff] %v5729_v31 }
 0x3e3   : > { %2792 = vrot.lane.b32.xlu0 %v2572_v34, %s3959_s17  ;;  %2822 = vrot.lane.b32.xlu1 %v5438_v41, %s3960_s18 }
 0x3e5   : > { %v2581_v63 = vpop.permute.xlu0 %2580  ;;  %v5734_v6 = vpop.permute.xlu1 %2626 }
 0x3e6   : > { %6481 = vst [vmem:[#allocation37_spill] sm:$0xff] %v5734_v6 }
 0x3e9   : > { %v2673_v55 = vpop.permute.xlu0 %2672  ;;  %v5736_v18 = vpop.permute.xlu1 %2722 }
 0x3ea   : > { %6482 = vst [vmem:[#allocation38_spill] sm:$0xff] %v5736_v18  ;;  %v2827_v18 = vsel %vm1274_vm6, %v5013_v3, %v2581_v63 }
 0x3ed   : > { %v2767_v48 = vpop.permute.xlu0 %2766  ;;  %v5738_v30 = vpop.permute.xlu1 %2814 }
 0x3ee   : > { %6483 = vst [vmem:[#allocation39_spill] sm:$0xff] %v5738_v30 }
 0x3f1   : > { %v2677_v60 = vpop.permute.xlu0 %2676  ;;  %v5740_v10 = vpop.permute.xlu1 %2816 }
 0x3f2   : > { %6484 = vst [vmem:[#allocation40_spill] sm:$0xff] %v5740_v10  ;;  %v2857_v10 = vsel %vm1305_vm7, %v2827_v18, %v5594_v12 }
 0x3f5   : > { %v2771_v5 = vpop.permute.xlu0 %2770  ;;  %v5742_v27 = vpop.permute.xlu1 %2630 }
 0x3f6   : > { %6485 = vst [vmem:[#allocation41_spill] sm:$0xff] %v5742_v27  ;;  %v2887_v27 = vsel %vm1336_vm8, %v2857_v10, %v5397_v1 }
 0x3f9   : > { %v2585_v42 = vpop.permute.xlu0 %2584  ;;  %v5744_v34 = vpop.permute.xlu1 %2726 }
 0x3fa   : > { %6486 = vst [vmem:[#allocation42_spill] sm:$0xff] %v5744_v34 }
 0x3fd   : > { %v2587_v31 = vpop.permute.xlu0 %2586  ;;  %v5746_v41 = vpop.permute.xlu1 %2818 }
 0x3fe   : > { %6487 = vst [vmem:[#allocation43_spill] sm:$0xff] %v5746_v41  ;;  %v2919_v41 = vsel %vm1369_vm9, %v2887_v27, %v2673_v55 }
 0x3ff   : > { %v2951_v63 = vsel %vm1402_vm10, %v2919_v41, %v5603_v25  ;;  %v2833_v41 = vsel %vm1274_vm6, %v5111_v53, %v2587_v31 }
 0x400   : > { %v2983_v10 = vsel %vm1435_vm11, %v2951_v63, %v5412_v17 }
 0x401   : > { %v2681_v14 = vpop.permute.xlu0 %2680  ;;  %v5748_v16 = vpop.permute.xlu1 %2820  ;;  %v3014_v25 = vsel %vm1467_vm12, %v2983_v10, %v2767_v48  ;;  %v2863_v48 = vsel %vm1305_vm7, %v2833_v41, %v5639_v32 }
 0x402   : > { %6488 = vst [vmem:[#allocation44_spill] sm:$0xff] %v5748_v16 }
 0x405   : > { %v5752_v6 = vpop.permute.xlu0 %2774  ;;  %v5754_v30 = vpop.permute.xlu1 %2634 }
 0x406   : > { %6489 = vst [vmem:[#allocation45_spill] sm:$0xff] %v5754_v30 }
 0x409   : > { %v2589_v34 = vpop.permute.xlu0 %2588  ;;  %v5760_v26 = vpop.permute.xlu1 %2730 }
 0x40d   : > { %v2591_v24 = vpop.permute.xlu0 %2590  ;;  %v2579_v16 = vpop.permute.xlu1 %2578 }
 0x40e   : > { %v2825_v3 = vsel %vm1274_vm6, %v4969_v56, %v2579_v16 }
 0x40f   : > { %v2855_v30 = vsel %vm1305_vm7, %v2825_v3, %v5588_v20 }
 0x410   : > { %v2885_v12 = vsel %vm1336_vm8, %v2855_v30, %v5394_v13 }
 0x411   : > { %v2685_v1 = vpop.permute.xlu0 %2684  ;;  %v2671_v18 = vpop.permute.xlu1 %2670 }
 0x412   : > { %v2917_v27 = vsel %vm1369_vm9, %v2885_v12, %v2671_v18  ;;  %v2889_v18 = vsel %vm1336_vm8, %v2855_v30, %v5419_v54 }
 0x413   : > { %v2949_v55 = vsel %vm1402_vm10, %v2917_v27, %v5596_v22  ;;  %v3045_v22 = vsel %vm1499_vm13, %v3014_v25, %v5613_v36 }
 0x414   : > { %v2981_v56 = vsel %vm1435_vm11, %v2949_v55, %v5406_v58 }
 0x415   : > { %v5779_v16 = vpop.permute.xlu0 %2778  ;;  %v2765_v20 = vpop.permute.xlu1 %2764 }
 0x416   : > { %v3012_v13 = vsel %vm1467_vm12, %v2981_v56, %v2765_v20 }
 0x417   : > { %v3043_v17 = vsel %vm1499_vm13, %v3012_v13, %v5605_v35  ;;  %v2895_v35 = vsel %vm1336_vm8, %v2863_v48, %v5460_v44 }
 0x418   : > { %3837 = vmatprep.mubr.msk.bf16.mxu1 %vm1546_vm14, %v3043_v17  ;;  %v2927_v54 = vsel %vm1369_vm9, %v2895_v35, %v2681_v14  ;;  %v6491_v17 = vld [vmem:[#allocation10_spill] sm:$0xff]  ;;  %v6495_v35 = vld [vmem:[#allocation11_spill] sm:$0xff] }
 0x419   : > { %v2593_v3 = vpop.permute.xlu0 %2592  ;;  %v2583_v58 = vpop.permute.xlu1 %2582  ;;  %3838 = vmatmul.mubr.msk.bf16.vlgmr.msra.gmra.mrb[0].mxu1 %vm1546_vm14, %v3045_v22  ;;  %v6492_v22 = vld [vmem:[#allocation12_spill] sm:$0xff] }
 0x41a   : > { %v2829_v63 = vsel %vm1274_vm6, %v5049_v11, %v2583_v58  ;;  %v6493_v58 = vld [vmem:[#allocation3_spill] sm:$0xff] }
 0x41b   : > { %v2859_v53 = vsel %vm1305_vm7, %v2829_v63, %v5622_v33  ;;  %v2831_v33 = vsel %vm1274_vm6, %v5082_v52, %v2585_v42  ;;  %v2839_v48 = vsel %vm1274_vm6, %v6493_v58, %v2593_v3  ;;  %v6494_v63 = vld [vmem:[#allocation5_spill] sm:$0xff] }
 0x41c   : > { %v2891_v31 = vsel %vm1336_vm8, %v2859_v53, %v5430_v4  ;;  %v2837_v4 = vsel %vm1274_vm6, %v5164_v2, %v2591_v24  ;;  %v2861_v52 = vsel %vm1305_vm7, %v2831_v33, %v5641_v19  ;;  %v6496_v33 = vld [vmem:[#allocation27_spill] sm:$0xff] }
 0x41d   : > { %v2923_v36 = vsel %vm1369_vm9, %v2891_v31, %v2677_v60  ;;  %v2595_v12 = vpop.permute.xlu0 %2594  ;;  %v2675_v10 = vpop.permute.xlu1 %2674  ;;  %v2867_v2 = vsel %vm1305_vm7, %v2837_v4, %v5658_v8  ;;  %v2893_v8 = vsel %vm1336_vm8, %v2861_v52, %v5449_v9  ;;  %v6501_v52 = vld [vmem:[#allocation4_spill] sm:$0xff] }
 0x41e   : > { %v2921_v32 = vsel %vm1369_vm9, %v2889_v18, %v2675_v10  ;;  %v2955_v11 = vsel %vm1402_vm10, %v2923_v36, %v5630_v38  ;;  %v2899_v42 = vsel %vm1336_vm8, %v2867_v2, %v5487_v59 }
 0x41f   : > { %v2953_v44 = vsel %vm1402_vm10, %v2921_v32, %v5615_v0  ;;  %v2987_v60 = vsel %vm1435_vm11, %v2955_v11, %v5447_v61  ;;  %v2959_v61 = vsel %vm1402_vm10, %v2927_v54, %v5649_v46  ;;  %v2931_v56 = vsel %vm1369_vm9, %v2899_v42, %v2685_v1 }
 0x420   : > { %v2985_v30 = vsel %vm1435_vm11, %v2953_v44, %v5433_v28  ;;  %v3018_v38 = vsel %vm1467_vm12, %v2987_v60, %v2771_v5  ;;  %v2991_v46 = vsel %vm1435_vm11, %v2959_v61, %v5474_v21  ;;  %v2835_v5 = vsel %vm1274_vm6, %v5135_v45, %v2589_v34  ;;  %v6497_v44 = vld [vmem:[#allocation29_spill] sm:$0xff]  ;;  %v6498_v60 = vld [vmem:[#allocation18_spill] sm:$0xff] }
 0x421   : > { %v2689_v27 = vpop.permute.xlu0 %2688  ;;  %v2769_v55 = vpop.permute.xlu1 %2768  ;;  %v3049_v28 = vsel %vm1499_vm13, %v3018_v38, %v5632_v37  ;;  %v2841_v37 = vsel %vm1274_vm6, %v5226_v49, %v2595_v12  ;;  %v3022_v25 = vsel %vm1467_vm12, %v2991_v46, %v5752_v6  ;;  %v2865_v13 = vsel %vm1305_vm7, %v2835_v5, %v5675_v43  ;;  %v6490_v6 = vld [vmem:[#allocation14_spill] sm:$0xff] }
 0x422   : > { %v3016_v0 = vsel %vm1467_vm12, %v2985_v30, %v2769_v55  ;;  %v2871_v45 = vsel %vm1305_vm7, %v2841_v37, %v5673_v51  ;;  %v2897_v51 = vsel %vm1336_vm8, %v2865_v13, %v6491_v17  ;;  %v2869_v32 = vsel %vm1305_vm7, %v2839_v48, %v5707_v57  ;;  %v6500_v55 = vld [vmem:[#allocation16_spill] sm:$0xff]  ;;  %v6512_v17 = vld [vmem:[#allocation30_spill] sm:$0xff]  ;;  %v6515_v48 = vld [vmem:[#allocation19_spill] sm:$0xff] }
 0x423   : > { %v3047_v24 = vsel %vm1499_vm13, %v3016_v0, %v5624_v23  ;;  %v2903_v1 = vsel %vm1336_vm8, %v2871_v45, %v6490_v6  ;;  %v6502_v0 = vld [vmem:[#allocation32_spill] sm:$0xff]  ;;  %v6508_v45 = vld [vmem:[#allocation17_spill] sm:$0xff] }
 0x424   : > { %3841 = vmatprep.mubr.msk.bf16.mxu1 %vm1546_vm14, %v3047_v24  ;;  %v2935_v31 = vsel %vm1369_vm9, %v2903_v1, %v2689_v27  ;;  %v6499_v27 = vld [vmem:[#allocation13_spill] sm:$0xff] }
 0x425   : > { %v2783_v19 = vpop.permute.xlu0 %2782  ;;  %v2679_v14 = vpop.permute.xlu1 %2678  ;;  %3842 = vmatmul.mubr.msk.bf16.gmra.mrb[4].mxu1 %vm1546_vm14, %v3049_v28  ;;  %v6503_v28 = vld [vmem:[#allocation15_spill] sm:$0xff] }
 0x426   : > { %v2925_v23 = vsel %vm1369_vm9, %v2893_v8, %v2679_v14 }
 0x427   : > { %v2957_v59 = vsel %vm1402_vm10, %v2925_v23, %v5651_v15  ;;  %v2963_v15 = vsel %vm1402_vm10, %v2931_v56, %v5665_v7  ;;  %v6504_v23 = vld [vmem:[#allocation37_spill] sm:$0xff] }
 0x428   : > { %v2989_v9 = vsel %vm1435_vm11, %v2957_v59, %v5462_v40  ;;  %v3053_v40 = vsel %vm1499_vm13, %v3022_v25, %v5667_v62  ;;  %v2995_v7 = vsel %vm1435_vm11, %v2963_v15, %v6492_v22  ;;  %v6505_v59 = vld [vmem:[#allocation28_spill] sm:$0xff]  ;;  %v6513_v22 = vld [vmem:[#allocation38_spill] sm:$0xff] }
 0x429   : > { %v2597_v21 = vpop.permute.xlu0 %2596  ;;  %v2773_v20 = vpop.permute.xlu1 %2772  ;;  %v3026_v12 = vsel %vm1467_vm12, %v2995_v7, %v5779_v16  ;;  %v6509_v15 = vld [vmem:[#allocation20_spill] sm:$0xff] }
 0x42a   : > { %v3020_v49 = vsel %vm1467_vm12, %v2989_v9, %v2773_v20  ;;  %v3057_v16 = vsel %vm1499_vm13, %v3026_v12, %v6497_v44  ;;  %v2843_v2 = vsel %vm1274_vm6, %v6501_v52, %v2597_v21  ;;  %v6506_v9 = vld [vmem:[#allocation34_spill] sm:$0xff]  ;;  %v6507_v21 = vld [vmem:[#allocation36_spill] sm:$0xff] }
 0x42b   : > { %v3051_v34 = vsel %vm1499_vm13, %v3020_v49, %v5660_v50  ;;  %v2873_v5 = vsel %vm1305_vm7, %v2843_v2, %v6504_v23 }
 0x42c   : > { %3845 = vmatprep.mubr.msk.bf16.mxu1 %vm1546_vm14, %v3051_v34  ;;  %v2905_v49 = vsel %vm1336_vm8, %v2873_v5, %v6508_v45  ;;  %v6527_v5 = vld [vmem:[#allocation45_spill] sm:$0xff] }
 0x42d   : > { %v2599_v43 = vpop.permute.xlu0 %2598  ;;  %v2683_v41 = vpop.permute.xlu1 %2682  ;;  %3846 = vmatmul.mubr.msk.bf16.gmra.mrb[8].mxu1 %vm1546_vm14, %v3053_v40  ;;  %v6510_v40 = vld [vmem:[#allocation7_spill] sm:$0xff]  ;;  %v6531_v45 = vld [vmem:[#allocation25_spill] sm:$0xff] }
 0x42e   : > { %v2929_v50 = vsel %vm1369_vm9, %v2897_v51, %v2683_v41  ;;  %v2845_v62 = vsel %vm1274_vm6, %v6494_v63, %v2599_v43  ;;  %v6511_v43 = vld [vmem:[#allocation6_spill] sm:$0xff] }
 0x42f   : > { %v2961_v53 = vsel %vm1402_vm10, %v2929_v50, %v5684_v29  ;;  %v2875_v3 = vsel %vm1305_vm7, %v2845_v62, %v5690_v47  ;;  %v2967_v29 = vsel %vm1402_vm10, %v2935_v31, %v6496_v33  ;;  %v2901_v47 = vsel %vm1336_vm8, %v2869_v32, %v6499_v27  ;;  %v6514_v50 = vld [vmem:[#allocation22_spill] sm:$0xff]  ;;  %v6519_v33 = vld [vmem:[#allocation40_spill] sm:$0xff] }
 0x430   : > { %v2993_v36 = vsel %vm1435_vm11, %v2961_v53, %v6495_v35  ;;  %v2907_v54 = vsel %vm1336_vm8, %v2875_v3, %v6498_v60  ;;  %v2999_v38 = vsel %vm1435_vm11, %v2967_v29, %v6500_v55  ;;  %v6516_v35 = vld [vmem:[#allocation41_spill] sm:$0xff]  ;;  %v6518_v3 = vld [vmem:[#allocation39_spill] sm:$0xff]  ;;  %v6522_v27 = vld [vmem:[#allocation42_spill] sm:$0xff] }
 0x431   : > { %v2693_v18 = vpop.permute.xlu0 %2692  ;;  %v2777_v10 = vpop.permute.xlu1 %2776  ;;  %v3030_v14 = vsel %vm1467_vm12, %v2999_v38, %v2783_v19  ;;  %v6523_v55 = vld [vmem:[#allocation23_spill] sm:$0xff] }
 0x432   : > { %v3024_v11 = vsel %vm1467_vm12, %v2993_v36, %v2777_v10  ;;  %v2939_v24 = vsel %vm1369_vm9, %v2907_v54, %v2693_v18  ;;  %v3061_v20 = vsel %vm1499_vm13, %v3030_v14, %v6507_v21  ;;  %v6517_v10 = vld [vmem:[#allocation31_spill] sm:$0xff]  ;;  %v6521_v54 = vld [vmem:[#allocation24_spill] sm:$0xff]  ;;  %v6530_v21 = vld [vmem:[#allocation26_spill] sm:$0xff] }
 0x433   : > { %v3055_v4 = vsel %vm1499_vm13, %v3024_v11, %v5692_v39  ;;  %v2971_v56 = vsel %vm1402_vm10, %v2939_v24, %v6505_v59  ;;  %v6526_v14 = vld [vmem:[#allocation44_spill] sm:$0xff]  ;;  %v6528_v59 = vld [vmem:[#allocation9_spill] sm:$0xff] }
 0x434   : > { %3849 = vmatprep.mubr.msk.bf16.mxu1 %vm1546_vm14, %v3055_v4  ;;  %v3003_v34 = vsel %vm1435_vm11, %v2971_v56, %v6509_v15 }
 0x435   : > { %v2787_v57 = vpop.permute.xlu0 %2786  ;;  %v2687_v30 = vpop.permute.xlu1 %2686  ;;  %3850 = vmatmul.mubr.msk.bf16.gmra.mrb[12].mxu1 %vm1546_vm14, %v3057_v16  ;;  %v6520_v16 = vld [vmem:[#allocation21_spill] sm:$0xff] }
 0x436   : > { %v2933_v39 = vsel %vm1369_vm9, %v2901_v47, %v2687_v30  ;;  %v3034_v62 = vsel %vm1467_vm12, %v3003_v34, %v2787_v57 }
 0x437   : > { %v2965_v61 = vsel %vm1402_vm10, %v2933_v39, %v6502_v0  ;;  %v3065_v29 = vsel %vm1499_vm13, %v3034_v62, %v6519_v33 }
 0x438   : > { %v2997_v42 = vsel %vm1435_vm11, %v2965_v61, %v6503_v28  ;;  %v6524_v61 = vld [vmem:[#allocation8_spill] sm:$0xff]  ;;  %v6525_v28 = vld [vmem:[#allocation43_spill] sm:$0xff] }
 0x439   : > { %v2601_v8 = vpop.permute.xlu0 %2600  ;;  %v2781_v46 = vpop.permute.xlu1 %2780 }
 0x43a   : > { %v3028_v37 = vsel %vm1467_vm12, %v2997_v42, %v2781_v46  ;;  %v2847_v41 = vsel %vm1274_vm6, %v6511_v43, %v2601_v8 }
 0x43b   : > { %v3059_v25 = vsel %vm1499_vm13, %v3028_v37, %v6506_v9  ;;  %v2877_v36 = vsel %vm1305_vm7, %v2847_v41, %v6516_v35  ;;  %v6529_v9 = vld [vmem:[#allocation33_spill] sm:$0xff] }
 0x43c   : > { %3853 = vmatprep.mubr.msk.bf16.mxu1 %vm1546_vm14, %v3059_v25  ;;  %v2909_v60 = vsel %vm1336_vm8, %v2877_v36, %v6520_v16 }
 0x43d   : > { %v2603_v13 = vpop.permute.xlu0 %2602  ;;  %v2691_v19 = vpop.permute.xlu1 %2690  ;;  %3854 = vmatmul.mubr.msk.bf16.gmra.mrb[16].mxu1 %vm1546_vm14, %v3061_v20 }
 0x43e   : > { %v2849_v6 = vsel %vm1274_vm6, %v6510_v40, %v2603_v13  ;;  %v2937_v1 = vsel %vm1369_vm9, %v2905_v49, %v2691_v19  ;;  %v6532_v40 = vld [vmem:[#allocation35_spill] sm:$0xff] }
 0x43f   : > { %v2879_v51 = vsel %vm1305_vm7, %v2849_v6, %v6512_v17  ;;  %v2969_v7 = vsel %vm1402_vm10, %v2937_v1, %v6513_v22 }
 0x440   : > { %v2911_v58 = vsel %vm1336_vm8, %v2879_v51, %v6514_v50  ;;  %v3001_v63 = vsel %vm1435_vm11, %v2969_v7, %v6515_v48 }
 0x441   : > { %v2697_v53 = vpop.permute.xlu0 %2696  ;;  %v2785_v31 = vpop.permute.xlu1 %2784 }
 0x442   : > { %v2943_v12 = vsel %vm1369_vm9, %v2911_v58, %v2697_v53  ;;  %v3032_v18 = vsel %vm1467_vm12, %v3001_v63, %v2785_v31 }
 0x443   : > { %v2975_v32 = vsel %vm1402_vm10, %v2943_v12, %v6517_v10  ;;  %v3063_v11 = vsel %vm1499_vm13, %v3032_v18, %v6518_v3 }
 0x444   : > { %3857 = vmatprep.mubr.msk.bf16.mxu1 %vm1546_vm14, %v3063_v11  ;;  %v3007_v57 = vsel %vm1435_vm11, %v2975_v32, %v6521_v54 }
 0x445   : > { %v2791_v4 = vpop.permute.xlu0 %2790  ;;  %v2695_v44 = vpop.permute.xlu1 %2694  ;;  %3858 = vmatmul.mubr.msk.bf16.gmra.mrb[20].mxu1 %vm1546_vm14, %v3065_v29 }
 0x446   : > { %v2941_v30 = vsel %vm1369_vm9, %v2909_v60, %v2695_v44  ;;  %v3038_v39 = vsel %vm1467_vm12, %v3007_v57, %v2791_v4 }
 0x447   : > { %v2973_v47 = vsel %vm1402_vm10, %v2941_v30, %v6522_v27  ;;  %v3069_v8 = vsel %vm1499_vm13, %v3038_v39, %v6526_v14 }
 0x448   : > { %v3005_v38 = vsel %vm1435_vm11, %v2973_v47, %v6523_v55 }
 0x449   : > { %v2605_v52 = vpop.permute.xlu0 %2604  ;;  %v2789_v2 = vpop.permute.xlu1 %2788 }
 0x44a   : > { %v3036_v0 = vsel %vm1467_vm12, %v3005_v38, %v2789_v2  ;;  %v2851_v24 = vsel %vm1274_vm6, %v6524_v61, %v2605_v52 }
 0x44b   : > { %v3067_v42 = vsel %vm1499_vm13, %v3036_v0, %v6525_v28  ;;  %v2881_v37 = vsel %vm1305_vm7, %v2851_v24, %v6527_v5 }
 0x44c   : > { %3861 = vmatprep.mubr.msk.bf16.mxu1 %vm1546_vm14, %v3067_v42  ;;  %v2913_v49 = vsel %vm1336_vm8, %v2881_v37, %v6531_v45 }
 0x44d   : > { %v2607_v46 = vpop.permute.xlu0 %2606  ;;  %v2763_v23 = vpop.permute.xlu1 %2762  ;;  %3862 = vmatmul.mubr.msk.bf16.gmra.mrb[24].mxu1 %vm1546_vm14, %v3069_v8 }
 0x44e   : > { %v2853_v56 = vsel %vm1274_vm6, %v6528_v59, %v2607_v46 }
 0x44f   : > { %v2883_v25 = vsel %vm1305_vm7, %v2853_v56, %v6529_v9 }
 0x450   : > { %v2915_v20 = vsel %vm1336_vm8, %v2883_v25, %v6530_v21 }
 0x451   : > { %v2701_v13 = vpop.permute.xlu0 %2700  ;;  %v2699_v19 = vpop.permute.xlu1 %2698 }
 0x452   : > { %v2947_v15 = vsel %vm1369_vm9, %v2915_v20, %v2701_v13  ;;  %v2945_v34 = vsel %vm1369_vm9, %v2913_v49, %v2699_v19 }
 0x453   : > { %v2979_v6 = vsel %vm1402_vm10, %v2947_v15, %v6532_v40  ;;  %v2977_v1 = vsel %vm1402_vm10, %v2945_v34, %v5760_v26 }
 0x454   : > { %v3010_v43 = vsel %vm1435_vm11, %v2979_v6, %v6521_v54  ;;  %v3009_v41 = vsel %vm1435_vm11, %v2977_v1, %v2763_v23 }
 0x455   : > { %v2793_v17 = vpop.permute.xlu0 %2792  ;;  %v2823_v51 = vpop.permute.xlu1 %2822  ;;  %v3041_v22 = vsel %vm1467_vm12, %v3010_v43, %v2791_v4 }
 0x456   : > { %v3040_v7 = vsel %vm1467_vm12, %v3009_v41, %v2793_v17  ;;  %v3072_v58 = vsel %vm1499_vm13, %v3041_v22, %v6526_v14 }
 0x457   : > { %v3071_v50 = vsel %vm1499_vm13, %v3040_v7, %v2823_v51 }
 0x458   : > { %3865 = vmatprep.mubr.msk.bf16.mxu1 %vm1546_vm14, %v3071_v50 }
 0x459   : > { %3866 = vmatmul.mubr.msk.bf16.gmra.mrb[28].mxu1 %vm1546_vm14, %v3072_v58 }
 0x4ec   : > { %v5994_v26 = vpop.f32.mrb[0].mxu1 }
 0x4ed   : > { %v5996_v48 = vpop.f32.mrb[1].mxu1  ;;  %v3287_v36 = vsel %vm1274_vm6, %v5994_v26, 0.0 }
 0x4ee   : > { %v5998_v63 = vpop.f32.mrb[2].mxu1  ;;  %v3284_v53 = vsel %vm1274_vm6, %v5996_v48, 0.0 }
 0x4ef   : > { %v6000_v62 = vpop.f32.mrb[3].mxu1  ;;  %v3289_v18 = vsel %vm1274_vm6, %v5998_v63, 0.0 }
 0x4f0   : > { %v3285_v31 = vsel %vm1274_vm6, %v6000_v62, 0.0 }
 0x4f1   : > { %v3286_v35 = vadd.f32 %v3285_v31, %v3284_v53 }
 0x4f3   : > { %v3288_v12 = vadd.f32 %v3287_v36, %v3286_v35 }
 0x4f5   : > { %v3290_v10 = vadd.f32 %v3289_v18, %v3288_v12 }
 0x4f8   : > { %v6010_v32 = vpop.f32.mrb[4].mxu1 }
 0x4f9   : > { %v6012_v3 = vpop.f32.mrb[5].mxu1  ;;  %v3295_v60 = vsel %vm1274_vm6, %v6010_v32, 0.0 }
 0x4fa   : > { %v3291_v11 = vsel %vm1274_vm6, %v6012_v3, 0.0  ;;  %v6016_v33 = vpop.f32.mrb[6].mxu1 }
 0x4fb   : > { %v3292_v29 = vadd.f32 %v3291_v11, %v3290_v10  ;;  %v6018_v4 = vpop.f32.mrb[7].mxu1  ;;  %v3297_v57 = vsel %vm1274_vm6, %v6016_v33, 0.0 }
 0x4fc   : > { %v3293_v44 = vsel %vm1274_vm6, %v6018_v4, 0.0 }
 0x4fd   : > { %v3294_v16 = vadd.f32 %v3293_v44, %v3292_v29 }
 0x4ff   : > { %v3296_v54 = vadd.f32 %v3295_v60, %v3294_v16 }
 0x500   : > { %v6026_v30 = vpop.f32.mrb[8].mxu1 }
 0x501   : > { %v6028_v27 = vpop.f32.mrb[9].mxu1  ;;  %v3298_v47 = vadd.f32 %v3297_v57, %v3296_v54  ;;  %v3303_v61 = vsel %vm1274_vm6, %v6026_v30, 0.0 }
 0x502   : > { %v3299_v55 = vsel %vm1274_vm6, %v6028_v27, 0.0  ;;  %v6032_v38 = vpop.f32.mrb[10].mxu1 }
 0x503   : > { %v3300_v39 = vadd.f32 %v3299_v55, %v3298_v47  ;;  %v6034_v52 = vpop.f32.mrb[11].mxu1  ;;  %v3305_v28 = vsel %vm1274_vm6, %v6032_v38, 0.0 }
 0x504   : > { %v3301_v2 = vsel %vm1274_vm6, %v6034_v52, 0.0 }
 0x505   : > { %v3302_v0 = vadd.f32 %v3301_v2, %v3300_v39 }
 0x507   : > { %v3304_v24 = vadd.f32 %v3303_v61, %v3302_v0 }
 0x508   : > { %v6042_v42 = vpop.f32.mrb[12].mxu1 }
 0x509   : > { %v6044_v14 = vpop.f32.mrb[13].mxu1  ;;  %v3306_v8 = vadd.f32 %v3305_v28, %v3304_v24  ;;  %v3311_v9 = vsel %vm1274_vm6, %v6042_v42, 0.0 }
 0x50a   : > { %v3307_v46 = vsel %vm1274_vm6, %v6044_v14, 0.0  ;;  %v6048_v23 = vpop.f32.mrb[14].mxu1 }
 0x50b   : > { %v3308_v5 = vadd.f32 %v3307_v46, %v3306_v8  ;;  %v6050_v37 = vpop.f32.mrb[15].mxu1  ;;  %v3313_v21 = vsel %vm1274_vm6, %v6048_v23, 0.0 }
 0x50c   : > { %v3309_v59 = vsel %vm1274_vm6, %v6050_v37, 0.0 }
 0x50d   : > { %v3310_v56 = vadd.f32 %v3309_v59, %v3308_v5 }
 0x50f   : > { %v3312_v25 = vadd.f32 %v3311_v9, %v3310_v56 }
 0x510   : > { %v6058_v20 = vpop.f32.mrb[16].mxu1 }
 0x511   : > { %v6060_v13 = vpop.f32.mrb[17].mxu1  ;;  %v3314_v19 = vadd.f32 %v3313_v21, %v3312_v25  ;;  %v3319_v1 = vsel %vm1274_vm6, %v6058_v20, 0.0 }
 0x512   : > { %v3315_v45 = vsel %vm1274_vm6, %v6060_v13, 0.0  ;;  %v6064_v49 = vpop.f32.mrb[18].mxu1 }
 0x513   : > { %v3316_v15 = vadd.f32 %v3315_v45, %v3314_v19  ;;  %v6066_v34 = vpop.f32.mrb[19].mxu1  ;;  %v3321_v41 = vsel %vm1274_vm6, %v6064_v49, 0.0 }
 0x514   : > { %v3317_v40 = vsel %vm1274_vm6, %v6066_v34, 0.0 }
 0x515   : > { %v3318_v6 = vadd.f32 %v3317_v40, %v3316_v15 }
 0x517   : > { %v3320_v43 = vadd.f32 %v3319_v1, %v3318_v6 }
 0x518   : > { %v6074_v17 = vpop.f32.mrb[20].mxu1 }
 0x519   : > { %v6076_v51 = vpop.f32.mrb[21].mxu1  ;;  %v3322_v22 = vadd.f32 %v3321_v41, %v3320_v43  ;;  %v3327_v36 = vsel %vm1274_vm6, %v6074_v17, 0.0 }
 0x51a   : > { %v3323_v7 = vsel %vm1274_vm6, %v6076_v51, 0.0  ;;  %v6080_v50 = vpop.f32.mrb[22].mxu1 }
 0x51b   : > { %v3324_v58 = vadd.f32 %v3323_v7, %v3322_v22  ;;  %v3240_v53 = vpop.f32.mrb[23].mxu1  ;;  %v3329_v18 = vsel %vm1274_vm6, %v6080_v50, 0.0 }
 0x51c   : > { %v3325_v31 = vsel %vm1274_vm6, %v3240_v53, 0.0 }
 0x51d   : > { %v3326_v35 = vadd.f32 %v3325_v31, %v3324_v58 }
 0x51f   : > { %v3328_v12 = vadd.f32 %v3327_v36, %v3326_v35 }
 0x520   : > { %v3863_v10 = vpop.f32.mrb[24].mxu1 }
 0x521   : > { %v3253_v11 = vpop.f32.mrb[25].mxu1  ;;  %v3330_v29 = vadd.f32 %v3329_v18, %v3328_v12  ;;  %v3335_v55 = vsel %vm1274_vm6, %v3863_v10, 0.0 }
 0x522   : > { %v3331_v44 = vsel %vm1274_vm6, %v3253_v11, 0.0  ;;  %v3864_v16 = vpop.f32.mrb[26].mxu1 }
 0x523   : > { %v3332_v60 = vadd.f32 %v3331_v44, %v3330_v29  ;;  %v3256_v54 = vpop.f32.mrb[27].mxu1  ;;  %v3337_v2 = vsel %vm1274_vm6, %v3864_v16, 0.0 }
 0x524   : > { %v3333_v57 = vsel %vm1274_vm6, %v3256_v54, 0.0 }
 0x525   : > { %v3334_v47 = vadd.f32 %v3333_v57, %v3332_v60 }
 0x527   : > { %v3336_v39 = vadd.f32 %v3335_v55, %v3334_v47 }
 0x529   : > { %v3338_v0 = vadd.f32 %v3337_v2, %v3336_v39 }
 0x52c   : > { %v3867_v61 = vpop.f32.mrb[28].mxu1 }
 0x52d   : > { %v3269_v24 = vpop.f32.mrb[29].mxu1  ;;  %v3343_v9 = vsel %vm1274_vm6, %v3867_v61, 0.0 }
 0x52e   : > { %v3339_v28 = vsel %vm1274_vm6, %v3269_v24, 0.0  ;;  %v3868_v8 = vpop.f32.mrb[30].mxu1 }
 0x52f   : > { %v3340_v46 = vadd.f32 %v3339_v28, %v3338_v0  ;;  %v3272_v5 = vpop.f32.mrb[31].mxu1  ;;  %v3345_v21 = vsel %vm1274_vm6, %v3868_v8, 0.0 }
 0x530   : > { %v3341_v59 = vsel %vm1274_vm6, %v3272_v5, 0.0 }
 0x531   : > { %v3342_v56 = vadd.f32 %v3341_v59, %v3340_v46 }
 0x533   : > { %v3344_v25 = vadd.f32 %v3343_v9, %v3342_v56 }
 0x535   : > { %v3346_v19 = vadd.f32 %v3345_v21, %v3344_v25 }
 0x537   : > { %v3347_v45 = vrot.slane %v3346_v19, 4 }
 0x539   : > { %v3348_v15 = vadd.f32 %v3347_v45, %v3346_v19 }
 0x53b   : > { %v3349_v40 = vrot.slane %v3348_v15, 2 }
 0x53d   : > { %v3350_v6 = vadd.f32 %v3349_v40, %v3348_v15 }
 0x53f   : > { %v3351_v1 = vrot.slane %v3350_v6, 1 }
 0x541   : > { %v3352_v43 = vadd.f32 %v3351_v1, %v3350_v6 }
 0x543   : > { %v3353_v41 = vmul.f32 0.00390625, %v3352_v43 }
 0x545   : > { %v6096_v22 = vsub.f32 %v5996_v48, %v3353_v41  ;;  %v6099_v7 = vsub.f32 %v6000_v62, %v3353_v41  ;;  %v6102_v58 = vsub.f32 %v5994_v26, %v3353_v41  ;;  %v6105_v31 = vsub.f32 %v5998_v63, %v3353_v41 }
 0x546   : > { %v6108_v35 = vsub.f32 %v6012_v3, %v3353_v41  ;;  %v6111_v36 = vsub.f32 %v6018_v4, %v3353_v41  ;;  %v6114_v12 = vsub.f32 %v6010_v32, %v3353_v41  ;;  %v6117_v48 = vsub.f32 %v6016_v33, %v3353_v41 }
 0x547   : > { %v6120_v62 = vsub.f32 %v6028_v27, %v3353_v41  ;;  %v6123_v26 = vsub.f32 %v6034_v52, %v3353_v41  ;;  %v6126_v63 = vsub.f32 %v6026_v30, %v3353_v41  ;;  %v6129_v3 = vsub.f32 %v6032_v38, %v3353_v41 }
 0x548   : > { %v6132_v4 = vsub.f32 %v6044_v14, %v3353_v41  ;;  %v6135_v32 = vsub.f32 %v6050_v37, %v3353_v41  ;;  %v6138_v33 = vsub.f32 %v6042_v42, %v3353_v41  ;;  %v6141_v27 = vsub.f32 %v6048_v23, %v3353_v41 }
 0x549   : > { %v6144_v52 = vsub.f32 %v6060_v13, %v3353_v41  ;;  %v6147_v30 = vsub.f32 %v6066_v34, %v3353_v41  ;;  %v6150_v38 = vsub.f32 %v6058_v20, %v3353_v41  ;;  %v6153_v14 = vsub.f32 %v6064_v49, %v3353_v41 }
 0x54a   : > { %v6156_v37 = vsub.f32 %v6076_v51, %v3353_v41  ;;  %v6158_v42 = vsub.f32 %v3240_v53, %v3353_v41  ;;  %v6161_v23 = vsub.f32 %v6074_v17, %v3353_v41  ;;  %v6164_v13 = vsub.f32 %v6080_v50, %v3353_v41 }
 0x54b   : > { %v6166_v18 = vsub.f32 %v3253_v11, %v3353_v41  ;;  %v6168_v34 = vsub.f32 %v3256_v54, %v3353_v41  ;;  %v6170_v20 = vsub.f32 %v3863_v10, %v3353_v41  ;;  %v6172_v29 = vsub.f32 %v3864_v16, %v3353_v41 }
 0x54c   : > { %v6174_v49 = vsub.f32 %v3269_v24, %v3353_v41  ;;  %v6176_v51 = vsub.f32 %v3272_v5, %v3353_v41  ;;  %v6178_v53 = vsub.f32 %v3867_v61, %v3353_v41  ;;  %v6180_v44 = vsub.f32 %v3868_v8, %v3353_v41 }
 0x54d   : > { %v3386_v17 = vmul.f32 %v6096_v22, %v6096_v22  ;;  %v3387_v50 = vmul.f32 %v6099_v7, %v6099_v7  ;;  %v3388_v10 = vmul.f32 %v6102_v58, %v6102_v58  ;;  %v3389_v11 = vmul.f32 %v6105_v31, %v6105_v31 }
 0x54e   : > { %v3390_v57 = vmul.f32 %v6108_v35, %v6108_v35  ;;  %v3391_v39 = vmul.f32 %v6111_v36, %v6111_v36  ;;  %v3392_v61 = vmul.f32 %v6114_v12, %v6114_v12  ;;  %v3393_v8 = vmul.f32 %v6117_v48, %v6117_v48 }
 0x54f   : > { %v3418_v16 = vsel %vm1274_vm6, %v3386_v17, 0.0  ;;  %v3419_v60 = vsel %vm1274_vm6, %v3387_v50, 0.0  ;;  %v3421_v47 = vsel %vm1274_vm6, %v3388_v10, 0.0  ;;  %v3423_v2 = vsel %vm1274_vm6, %v3389_v11, 0.0 }
 0x550   : > { %v3420_v54 = vadd.f32 %v3419_v60, %v3418_v16  ;;  %v3425_v24 = vsel %vm1274_vm6, %v3390_v57, 0.0  ;;  %v3427_v46 = vsel %vm1274_vm6, %v3391_v39, 0.0  ;;  %v3394_v59 = vmul.f32 %v6120_v62, %v6120_v62 }
 0x551   : > { %v3429_v56 = vsel %vm1274_vm6, %v3392_v61, 0.0  ;;  %v3395_v25 = vmul.f32 %v6123_v26, %v6123_v26  ;;  %v3431_v21 = vsel %vm1274_vm6, %v3393_v8, 0.0  ;;  %v3396_v45 = vmul.f32 %v6126_v63, %v6126_v63 }
 0x552   : > { %v3422_v55 = vadd.f32 %v3421_v47, %v3420_v54  ;;  %v3433_v15 = vsel %vm1274_vm6, %v3394_v59, 0.0  ;;  %v3397_v6 = vmul.f32 %v6129_v3, %v6129_v3  ;;  %v3398_v41 = vmul.f32 %v6132_v4, %v6132_v4 }
 0x553   : > { %v3435_v1 = vsel %vm1274_vm6, %v3395_v25, 0.0  ;;  %v3437_v17 = vsel %vm1274_vm6, %v3396_v45, 0.0  ;;  %v3399_v10 = vmul.f32 %v6135_v32, %v6135_v32  ;;  %v3400_v60 = vmul.f32 %v6138_v33, %v6138_v33 }
 0x554   : > { %v3424_v0 = vadd.f32 %v3423_v2, %v3422_v55  ;;  %v3439_v11 = vsel %vm1274_vm6, %v3397_v6, 0.0  ;;  %v3441_v54 = vsel %vm1274_vm6, %v3398_v41, 0.0  ;;  %v3401_v47 = vmul.f32 %v6141_v27, %v6141_v27 }
 0x555   : > { %v3443_v55 = vsel %vm1274_vm6, %v3399_v10, 0.0  ;;  %v3402_v2 = vmul.f32 %v6144_v52, %v6144_v52 }
 0x556   : > { %v3426_v28 = vadd.f32 %v3425_v24, %v3424_v0  ;;  %v3445_v0 = vsel %vm1274_vm6, %v3400_v60, 0.0  ;;  %v3403_v24 = vmul.f32 %v6147_v30, %v6147_v30 }
 0x558   : > { %v3428_v5 = vadd.f32 %v3427_v46, %v3426_v28  ;;  %v3447_v28 = vsel %vm1274_vm6, %v3401_v47, 0.0  ;;  %v3404_v46 = vmul.f32 %v6150_v38, %v6150_v38 }
 0x55a   : > { %v3430_v9 = vadd.f32 %v3429_v56, %v3428_v5  ;;  %v3449_v5 = vsel %vm1274_vm6, %v3402_v2, 0.0  ;;  %v3405_v56 = vmul.f32 %v6153_v14, %v6153_v14 }
 0x55c   : > { %v3432_v19 = vadd.f32 %v3431_v21, %v3430_v9  ;;  %v3451_v9 = vsel %vm1274_vm6, %v3403_v24, 0.0  ;;  %v3406_v21 = vmul.f32 %v6156_v37, %v6156_v37 }
 0x55e   : > { %v3434_v40 = vadd.f32 %v3433_v15, %v3432_v19  ;;  %v3453_v19 = vsel %vm1274_vm6, %v3404_v46, 0.0  ;;  %v3407_v15 = vmul.f32 %v6158_v42, %v6158_v42 }
 0x560   : > { %v3436_v43 = vadd.f32 %v3435_v1, %v3434_v40  ;;  %v3455_v40 = vsel %vm1274_vm6, %v3405_v56, 0.0  ;;  %v3408_v1 = vmul.f32 %v6161_v23, %v6161_v23 }
 0x562   : > { %v3438_v50 = vadd.f32 %v3437_v17, %v3436_v43  ;;  %v3457_v43 = vsel %vm1274_vm6, %v3406_v21, 0.0  ;;  %v3409_v17 = vmul.f32 %v6164_v13, %v6164_v13 }
 0x564   : > { %v3440_v16 = vadd.f32 %v3439_v11, %v3438_v50  ;;  %v3459_v50 = vsel %vm1274_vm6, %v3407_v15, 0.0  ;;  %v3410_v11 = vmul.f32 %v6166_v18, %v6166_v18 }
 0x566   : > { %v3442_v57 = vadd.f32 %v3441_v54, %v3440_v16  ;;  %v3461_v16 = vsel %vm1274_vm6, %v3408_v1, 0.0  ;;  %v3411_v54 = vmul.f32 %v6168_v34, %v6168_v34 }
 0x568   : > { %v3444_v39 = vadd.f32 %v3443_v55, %v3442_v57  ;;  %v3463_v57 = vsel %vm1274_vm6, %v3409_v17, 0.0  ;;  %v3412_v55 = vmul.f32 %v6170_v20, %v6170_v20 }
 0x56a   : > { %v3446_v61 = vadd.f32 %v3445_v0, %v3444_v39  ;;  %v3465_v39 = vsel %vm1274_vm6, %v3410_v11, 0.0  ;;  %v3413_v0 = vmul.f32 %v6172_v29, %v6172_v29 }
 0x56c   : > { %v3448_v8 = vadd.f32 %v3447_v28, %v3446_v61  ;;  %v3467_v61 = vsel %vm1274_vm6, %v3411_v54, 0.0  ;;  %v3414_v28 = vmul.f32 %v6174_v49, %v6174_v49 }
 0x56e   : > { %v3450_v59 = vadd.f32 %v3449_v5, %v3448_v8  ;;  %v3469_v8 = vsel %vm1274_vm6, %v3412_v55, 0.0  ;;  %v3415_v5 = vmul.f32 %v6176_v51, %v6176_v51 }
 0x570   : > { %v3452_v25 = vadd.f32 %v3451_v9, %v3450_v59  ;;  %v3471_v59 = vsel %vm1274_vm6, %v3413_v0, 0.0  ;;  %v3416_v9 = vmul.f32 %v6178_v53, %v6178_v53 }
 0x572   : > { %v3454_v45 = vadd.f32 %v3453_v19, %v3452_v25  ;;  %v3473_v25 = vsel %vm1274_vm6, %v3414_v28, 0.0  ;;  %v3417_v19 = vmul.f32 %v6180_v44, %v6180_v44 }
 0x574   : > { %v3456_v6 = vadd.f32 %v3455_v40, %v3454_v45  ;;  %v3475_v45 = vsel %vm1274_vm6, %v3415_v5, 0.0  ;;  %v3477_v40 = vsel %vm1274_vm6, %v3416_v9, 0.0  ;;  %v3479_v1 = vsel %vm1274_vm6, %v3417_v19, 0.0 }
 0x576   : > { %v3458_v41 = vadd.f32 %v3457_v43, %v3456_v6 }
 0x578   : > { %v3460_v10 = vadd.f32 %v3459_v50, %v3458_v41 }
 0x57a   : > { %v3462_v60 = vadd.f32 %v3461_v16, %v3460_v10 }
 0x57c   : > { %v3464_v47 = vadd.f32 %v3463_v57, %v3462_v60  ;;  %v2080_v57 = vld [vmem:[%s6430_s5] sm:$0x1] }
 0x57e   : > { %v3466_v2 = vadd.f32 %v3465_v39, %v3464_v47  ;;  %v6533_v39 = vld [vmem:[#allocation2_spill] sm:$0xff] }
 0x580   : > { %v3468_v24 = vadd.f32 %v3467_v61, %v3466_v2  ;;  %v6534_v2 = vsub.s32 0, %v6533_v39 }
 0x582   : > { %v3470_v46 = vadd.f32 %v3469_v8, %v3468_v24 }
 0x584   : > { %v3472_v56 = vadd.f32 %v3471_v59, %v3470_v46 }
 0x586   : > { %v3474_v21 = vadd.f32 %v3473_v25, %v3472_v56 }
 0x588   : > { %v3476_v15 = vadd.f32 %v3475_v45, %v3474_v21 }
 0x58a   : > { %v3478_v6 = vadd.f32 %v3477_v40, %v3476_v15 }
 0x58c   : > { %v3480_v43 = vadd.f32 %v3479_v1, %v3478_v6 }
 0x58e   : > { %v3481_v41 = vrot.slane %v3480_v43, 4 }
 0x590   : > { %v3482_v17 = vadd.f32 %v3481_v41, %v3480_v43 }
 0x592   : > { %v3483_v50 = vrot.slane %v3482_v17, 2 }
 0x594   : > { %v3484_v10 = vadd.f32 %v3483_v50, %v3482_v17 }
 0x596   : > { %v3485_v11 = vrot.slane %v3484_v10, 1 }
 0x598   : > { %v3486_v16 = vadd.f32 %v3485_v11, %v3484_v10 }
 0x59a   : > { %v3487_v60 = vmul.f32 0.00390625, %v3486_v16 }
 0x59c   : > { %v3488_v54 = vadd.f32 1e-05, %v3487_v60 }
 0x59e   : > { %3943 = vrsqrt.f32 %v3488_v54 }
 0x5a8   : > { %v3944_v47 = vpop.eup %3943 }
 0x5a9   : > { %v3490_v55 = vmul.f32 %v3944_v47, %v2080_v57 }
 0x5ab   : > { %v3495_v0 = vrot.slane %v3490_v55, %v6534_v2 }
 0x5ad   : > { %v3497_v61 = vmul.f32 %v3495_v0, %v6096_v22  ;;  %v3498_v24 = vmul.f32 %v3495_v0, %v6099_v7  ;;  %v3499_v28 = vmul.f32 %v3495_v0, %v6102_v58  ;;  %v3500_v8 = vmul.f32 %v3495_v0, %v6105_v31 }
 0x5ae   : > { %v3501_v46 = vmul.f32 %v3495_v0, %v6108_v35  ;;  %v3502_v5 = vmul.f32 %v3495_v0, %v6111_v36  ;;  %v3503_v59 = vmul.f32 %v3495_v0, %v6114_v12  ;;  %v3504_v56 = vmul.f32 %v3495_v0, %v6117_v48 }
 0x5af   : > { %v3505_v9 = vmul.f32 %v3495_v0, %v6120_v62  ;;  %v3506_v25 = vmul.f32 %v3495_v0, %v6123_v26  ;;  %v3507_v22 = vmul.f32 %v3495_v0, %v6126_v63  ;;  %v3508_v7 = vmul.f32 %v3495_v0, %v6129_v3  ;;  %v6307_v63 = vld [vmem:[%s6431_s6] ss:$0 sm:$0xff] }
 0x5b0   : > { %v3509_v58 = vmul.f32 %v3495_v0, %v6132_v4  ;;  %v3510_v31 = vmul.f32 %v3495_v0, %v6135_v32  ;;  %v3511_v35 = vmul.f32 %v3495_v0, %v6138_v33  ;;  %v3512_v36 = vmul.f32 %v3495_v0, %v6141_v27 }
 0x5b1   : > { %v3513_v12 = vmul.f32 %v3495_v0, %v6144_v52  ;;  %v3514_v48 = vmul.f32 %v3495_v0, %v6147_v30  ;;  %v3515_v62 = vmul.f32 %v3495_v0, %v6150_v38  ;;  %v3516_v26 = vmul.f32 %v3495_v0, %v6153_v14 }
 0x5b2   : > { %v3517_v3 = vmul.f32 %v3495_v0, %v6156_v37  ;;  %v3518_v4 = vmul.f32 %v3495_v0, %v6158_v42  ;;  %v3519_v32 = vmul.f32 %v3495_v0, %v6161_v23  ;;  %v3520_v33 = vmul.f32 %v3495_v0, %v6164_v13 }
 0x5b3   : > { %v3521_v27 = vmul.f32 %v3495_v0, %v6166_v18  ;;  %v3522_v52 = vmul.f32 %v3495_v0, %v6168_v34  ;;  %v3523_v30 = vmul.f32 %v3495_v0, %v6170_v20  ;;  %v3524_v38 = vmul.f32 %v3495_v0, %v6172_v29 }
 0x5b4   : > { %v3525_v14 = vmul.f32 %v3495_v0, %v6174_v49  ;;  %v3526_v37 = vmul.f32 %v3495_v0, %v6176_v51  ;;  %v3527_v42 = vmul.f32 %v3495_v0, %v6178_v53  ;;  %v3528_v23 = vmul.f32 %v3495_v0, %v6180_v44 }
 0x5b5   : > { %v3535_v13 = vadd.f32 %v6307_v63, %v3497_v61  ;;  %v3536_v18 = vadd.f32 %v6307_v63, %v3498_v24  ;;  %v3537_v34 = vadd.f32 %v6307_v63, %v3499_v28  ;;  %v3538_v20 = vadd.f32 %v6307_v63, %v3500_v8 }
 0x5b6   : > { %v3539_v29 = vadd.f32 %v6307_v63, %v3501_v46  ;;  %v3540_v49 = vadd.f32 %v6307_v63, %v3502_v5  ;;  %v3541_v51 = vadd.f32 %v6307_v63, %v3503_v59  ;;  %v3542_v53 = vadd.f32 %v6307_v63, %v3504_v56 }
 0x5b7   : > { %v3543_v44 = vadd.f32 %v6307_v63, %v3505_v9  ;;  %v3544_v21 = vadd.f32 %v6307_v63, %v3506_v25  ;;  %v3545_v19 = vadd.f32 %v6307_v63, %v3507_v22  ;;  %v3546_v45 = vadd.f32 %v6307_v63, %v3508_v7  ;;  %3567 = vst.msk [vmem:[%s6320_s16] sm:$0xff] %vm1274_vm6, %v3535_v13 }
 0x5b8   : > { %3568 = vst.msk [vmem:[%s6320_s16 + $0x8] sm:$0xff] %vm1274_vm6, %v3536_v18  ;;  %3569 = vst.msk [vmem:[%s6320_s16 + $0x10] sm:$0xff] %vm1274_vm6, %v3537_v34  ;;  %v3547_v15 = vadd.f32 %v6307_v63, %v3509_v58  ;;  %v3548_v40 = vadd.f32 %v6307_v63, %v3510_v31  ;;  %v3549_v6 = vadd.f32 %v6307_v63, %v3511_v35 }
 0x5b9   : > { %3570 = vst.msk [vmem:[%s6320_s16 + $0x18] sm:$0xff] %vm1274_vm6, %v3538_v20  ;;  %v3550_v1 = vadd.f32 %v6307_v63, %v3512_v36  ;;  %3571 = vst.msk [vmem:[%s6320_s16 + $0x20] sm:$0xff] %vm1274_vm6, %v3539_v29  ;;  %v3551_v43 = vadd.f32 %v6307_v63, %v3513_v12  ;;  %v3552_v41 = vadd.f32 %v6307_v63, %v3514_v48 }
 0x5ba   : > { %3572 = vst.msk [vmem:[%s6320_s16 + $0x28] sm:$0xff] %vm1274_vm6, %v3540_v49  ;;  %3573 = vst.msk [vmem:[%s6320_s16 + $0x30] sm:$0xff] %vm1274_vm6, %v3541_v51  ;;  %v3553_v17 = vadd.f32 %v6307_v63, %v3515_v62  ;;  %v3554_v50 = vadd.f32 %v6307_v63, %v3516_v26  ;;  %v3555_v10 = vadd.f32 %v6307_v63, %v3517_v3 }
 0x5bb   : > { %3574 = vst.msk [vmem:[%s6320_s16 + $0x38] sm:$0xff] %vm1274_vm6, %v3542_v53  ;;  %3575 = vst.msk [vmem:[%s6320_s16 + $0x40] sm:$0xff] %vm1274_vm6, %v3543_v44  ;;  %v3556_v11 = vadd.f32 %v6307_v63, %v3518_v4  ;;  %v3557_v16 = vadd.f32 %v6307_v63, %v3519_v32  ;;  %v3558_v60 = vadd.f32 %v6307_v63, %v3520_v33 }
 0x5bc   : > { %3576 = vst.msk [vmem:[%s6320_s16 + $0x48] sm:$0xff] %vm1274_vm6, %v3544_v21  ;;  %3577 = vst.msk [vmem:[%s6320_s16 + $0x50] sm:$0xff] %vm1274_vm6, %v3545_v19  ;;  %v3559_v54 = vadd.f32 %v6307_v63, %v3521_v27  ;;  %v3560_v57 = vadd.f32 %v6307_v63, %v3522_v52  ;;  %v3561_v47 = vadd.f32 %v6307_v63, %v3523_v30 }
 0x5bd   : > { %3578 = vst.msk [vmem:[%s6320_s16 + $0x58] sm:$0xff] %vm1274_vm6, %v3546_v45  ;;  %3579 = vst.msk [vmem:[%s6320_s16 + $0x60] sm:$0xff] %vm1274_vm6, %v3547_v15  ;;  %v3562_v55 = vadd.f32 %v6307_v63, %v3524_v38  ;;  %v3563_v39 = vadd.f32 %v6307_v63, %v3525_v14  ;;  %v3564_v2 = vadd.f32 %v6307_v63, %v3526_v37 }
 0x5be   : > { %3580 = vst.msk [vmem:[%s6320_s16 + $0x68] sm:$0xff] %vm1274_vm6, %v3548_v40  ;;  %3581 = vst.msk [vmem:[%s6320_s16 + $0x70] sm:$0xff] %vm1274_vm6, %v3549_v6  ;;  %v3565_v0 = vadd.f32 %v6307_v63, %v3527_v42  ;;  %v3566_v61 = vadd.f32 %v6307_v63, %v3528_v23 }
 0x5bf   : > { %3582 = vst.msk [vmem:[%s6320_s16 + $0x78] sm:$0xff] %vm1274_vm6, %v3550_v1  ;;  %3583 = vst.msk [vmem:[%s6320_s16 + $0x80] sm:$0xff] %vm1274_vm6, %v3551_v43 }
 0x5c0   : > { %3584 = vst.msk [vmem:[%s6320_s16 + $0x88] sm:$0xff] %vm1274_vm6, %v3552_v41  ;;  %3585 = vst.msk [vmem:[%s6320_s16 + $0x90] sm:$0xff] %vm1274_vm6, %v3553_v17 }
 0x5c1   : > { %3586 = vst.msk [vmem:[%s6320_s16 + $0x98] sm:$0xff] %vm1274_vm6, %v3554_v50  ;;  %3587 = vst.msk [vmem:[%s6320_s16 + $0xa0] sm:$0xff] %vm1274_vm6, %v3555_v10 }
 0x5c2   : > { %3588 = vst.msk [vmem:[%s6320_s16 + $0xa8] sm:$0xff] %vm1274_vm6, %v3556_v11  ;;  %3589 = vst.msk [vmem:[%s6320_s16 + $0xb0] sm:$0xff] %vm1274_vm6, %v3557_v16 }
 0x5c3   : > { %3590 = vst.msk [vmem:[%s6320_s16 + $0xb8] sm:$0xff] %vm1274_vm6, %v3558_v60  ;;  %3591 = vst.msk [vmem:[%s6320_s16 + $0xc0] sm:$0xff] %vm1274_vm6, %v3559_v54 }
 0x5c4   : > { %3592 = vst.msk [vmem:[%s6320_s16 + $0xc8] sm:$0xff] %vm1274_vm6, %v3560_v57  ;;  %3593 = vst.msk [vmem:[%s6320_s16 + $0xd0] sm:$0xff] %vm1274_vm6, %v3561_v47 }
 0x5c5   : > { %3594 = vst.msk [vmem:[%s6320_s16 + $0xd8] sm:$0xff] %vm1274_vm6, %v3562_v55  ;;  %3595 = vst.msk [vmem:[%s6320_s16 + $0xe0] sm:$0xff] %vm1274_vm6, %v3563_v39 }
 0x5c6   : > { %3596 = vst.msk [vmem:[%s6320_s16 + $0xe8] sm:$0xff] %vm1274_vm6, %v3564_v2  ;;  %3597 = vst.msk [vmem:[%s6320_s16 + $0xf0] sm:$0xff] %vm1274_vm6, %v3565_v0 }
 0x5c7   : > { %3598 = vst.msk [vmem:[%s6320_s16 + $0xf8] sm:$0xff] %vm1274_vm6, %v3566_v61 }
 0x5c8 PF: > { %s17_s24 = sadd.s32 1, %s3951_s24  }
 0x5c9   : > { %p14_p4 = scmp.ge.s32.totalorder %s17_s24, 4  }
 0x5cb   :  { %16 = sbr.rel (!%p14_p4) target bundleno = 1 (0x1), region = 78 }

</bundles_post_ra>
